<compile_context>
chip_gen: v6e
topology: v6e:2x2x1
jax: 0.10.0
libtpu: 0.0.40
codegen_flags: <defaults>
</compile_context>

<pallas_src>
import jax
import jax.numpy as jnp
from jax.experimental import pallas as pl
from jax.experimental.pallas import tpu as pltpu

HIDDEN = 640


def _mlp_kernel(x_ref,
                w1_ref, b1_ref, w2_ref, b2_ref, w3_ref, b3_ref,
                w4_ref, b4_ref, w5_ref, b5_ref, w6_ref, b6_ref,
                o_ref):
    """Fused 6-layer MLP on one batch tile. Weights are bf16, accum is f32."""

    def layer(h, w_ref, b_ref, relu):
        acc = jnp.dot(h.astype(jnp.bfloat16), w_ref[...],
                      preferred_element_type=jnp.float32) + b_ref[...]
        return jnp.maximum(acc, 0.0) if relu else acc

    h = x_ref[...]
    h = layer(h, w1_ref, b1_ref, True)   # relu(layer1); dropout = identity (eval)
    h = layer(h, w2_ref, b2_ref, True)   # relu(layer2)
    h = layer(h, w3_ref, b3_ref, True)   # relu(layer3)
    h = layer(h, w4_ref, b4_ref, True)   # relu(layer4)
    h = layer(h, w5_ref, b5_ref, True)   # relu(layer5)
    h = layer(h, w6_ref, b6_ref, False)  # layer6 (no relu)
    o_ref[...] = h.astype(o_ref.dtype)


def _round_up(n, m):
    return ((n + m - 1) // m) * m


def _choose_block_b(batch, requested):
    """Pick the batch tile: clamp to the real batch for small B, and for large
    B cap it so there are at least 2 tiles (keeps both v7x TensorCores busy)."""
    bb = min(requested, _round_up(batch, 8))          # small-B clamp (no padded rows)
    if batch > 256:
        bb = min(bb, _round_up(pl.cdiv(batch, 2), 256))  # >= 2 tiles at large B
    return max(8, _round_up(bb, 8))                   # sublane-aligned


def simple_linear_nn2_forward(x, params, *, block_b=512,
                              out_store_dtype=jnp.float32):
    """x: [B, input_dim] f32. params: w{i} as [in, out] (PyTorch weight.T), b{i} as [out]."""
    B, in_dim = x.shape
    out_dim = params["w6"].shape[1]
    out_pad = _round_up(out_dim, 128)          # lane-dense output stores

    bb = _choose_block_b(B, block_b)
    n_tiles = pl.cdiv(B, bb)
    b_pad = n_tiles * bb
    x_p = jnp.pad(x, ((0, b_pad - B), (0, 0))) if b_pad != B else x

    flat_args = [x_p]
    for i in range(1, 7):
        w = params[f"w{i}"]
        b = params[f"b{i}"].reshape(1, -1)
        if i == 6 and out_pad != out_dim:      # zero-pad final layer to 128 lanes
            w = jnp.pad(w, ((0, 0), (0, out_pad - out_dim)))
            b = jnp.pad(b, ((0, 0), (0, out_pad - out_dim)))
        flat_args.append(w.astype(jnp.bfloat16))   # MXU operand dtype
        flat_args.append(b.astype(jnp.float32))    # bias added in f32

    in_specs = [pl.BlockSpec((bb, in_dim), lambda i: (i, 0))]
    for a in flat_args[1:]:
        # Full array as a single block, constant index_map -> DMA'd once,
        # resident in VMEM across all batch tiles. Single-buffered: the block
        # never changes, so double-buffering would only double VMEM use.
        in_specs.append(pl.BlockSpec(a.shape, lambda i: (0, 0),
                                     pipeline_mode=pl.Buffered(1)))

    out_itemsize = jnp.dtype(out_store_dtype).itemsize
    flops = 2 * b_pad * (in_dim * HIDDEN + 4 * HIDDEN * HIDDEN + HIDDEN * out_pad)
    bytes_accessed = (sum(int(a.size) * a.dtype.itemsize for a in flat_args)
                      + b_pad * out_pad * out_itemsize)

    out = pl.pallas_call(
        _mlp_kernel,
        out_shape=jax.ShapeDtypeStruct((b_pad, out_pad), out_store_dtype),
        grid=(n_tiles,),
        in_specs=in_specs,
        out_specs=pl.BlockSpec((bb, out_pad), lambda i: (i, 0)),
        compiler_params=pltpu.CompilerParams(
            dimension_semantics=("parallel",),
            vmem_limit_bytes=32 << 20),
        cost_estimate=pl.CostEstimate(
            flops=flops, transcendentals=0, bytes_accessed=bytes_accessed),
    )(*flat_args)

    out = out[:B, :out_dim]
    if out_store_dtype != jnp.float32:
        out = out.astype(jnp.float32)
    return out


def init_params(key, input_dim, output_dim, hidden=HIDDEN):
    """Deterministic init mimicking nn.Linear default (uniform +/- 1/sqrt(fan_in))."""
    dims = [(input_dim, hidden), (hidden, hidden), (hidden, hidden),
            (hidden, hidden), (hidden, hidden), (hidden, output_dim)]
    params = {}
    for i, (fan_in, fan_out) in enumerate(dims, start=1):
        key, kw, kb = jax.random.split(key, 3)
        bound = 1.0 / (fan_in ** 0.5)
        # Stored directly as [in, out] (PyTorch weight transposed).
        params[f"w{i}"] = jax.random.uniform(
            kw, (fan_in, fan_out), jnp.float32, minval=-bound, maxval=bound)
        params[f"b{i}"] = jax.random.uniform(
            kb, (fan_out,), jnp.float32, minval=-bound, maxval=bound)
    return params


def _reference_forward(x, params, *, bf16_operands=True):
    """Pure-JAX reference. With bf16_operands=True it mirrors the kernel's math."""
    h = x
    for i in range(1, 7):
        w = params[f"w{i}"]
        lhs = h.astype(jnp.bfloat16) if bf16_operands else h
        rhs = w.astype(jnp.bfloat16) if bf16_operands else w
        h = jnp.dot(lhs, rhs, preferred_element_type=jnp.float32) + params[f"b{i}"]
        if i < 6:
            h = jnp.maximum(h, 0.0)
    return h


if __name__ == "__main__":
    key = jax.random.PRNGKey(0)
    batch, input_dim, output_dim = 8, 32, 16

    kx, kp = jax.random.split(key)
    x = jax.random.normal(kx, (batch, input_dim), dtype=jnp.float32)
    params = init_params(kp, input_dim, output_dim)

    out = simple_linear_nn2_forward(x, params)
    out = jax.block_until_ready(out)
    assert out.shape == (batch, output_dim)

    # Tight check vs a reference using the same bf16-operand / f32-accum math.
    ref_bf16 = _reference_forward(x, params, bf16_operands=True)
    assert jnp.allclose(out, ref_bf16, atol=2e-3, rtol=2e-3), "mismatch vs bf16 reference"

    # Loose sanity check vs the full-f32 reference (bf16 operand rounding only).
    ref_f32 = _reference_forward(x, params, bf16_operands=False)
    assert jnp.allclose(out, ref_f32, atol=5e-2, rtol=5e-2), "mismatch vs f32 reference"

    print("KERNEL_OK")
</pallas_src>

<mosaic_0001>
module attributes {stable_mosaic.version = 11 : i64} {
  func.func @_mlp_kernel(%arg0: i32, %arg1: memref<8x32xf32, #tpu.memory_space<vmem>>, %arg2: memref<32x640xbf16, #tpu.memory_space<vmem>>, %arg3: memref<1x640xf32, #tpu.memory_space<vmem>>, %arg4: memref<640x640xbf16, #tpu.memory_space<vmem>>, %arg5: memref<1x640xf32, #tpu.memory_space<vmem>>, %arg6: memref<640x640xbf16, #tpu.memory_space<vmem>>, %arg7: memref<1x640xf32, #tpu.memory_space<vmem>>, %arg8: memref<640x640xbf16, #tpu.memory_space<vmem>>, %arg9: memref<1x640xf32, #tpu.memory_space<vmem>>, %arg10: memref<640x640xbf16, #tpu.memory_space<vmem>>, %arg11: memref<1x640xf32, #tpu.memory_space<vmem>>, %arg12: memref<640x128xbf16, #tpu.memory_space<vmem>>, %arg13: memref<1x128xf32, #tpu.memory_space<vmem>>, %arg14: memref<8x128xf32, #tpu.memory_space<vmem>>) attributes {dimension_semantics = [#tpu.dimension_semantics<parallel>], iteration_bounds = array<i64: 1>, scalar_prefetch = 0 : i64, scratch_operands = 0 : i64, tpu.core_type = #tpu.core_type<tc>, window_params = [{transform_indices = @transform_0, window_bounds = array<i64: 8, 32>}, {pipeline_mode = #tpu.pipeline_mode<synchronous>, transform_indices = @transform_1, window_bounds = array<i64: 32, 640>}, {pipeline_mode = #tpu.pipeline_mode<synchronous>, transform_indices = @transform_2, window_bounds = array<i64: 1, 640>}, {pipeline_mode = #tpu.pipeline_mode<synchronous>, transform_indices = @transform_3, window_bounds = array<i64: 640, 640>}, {pipeline_mode = #tpu.pipeline_mode<synchronous>, transform_indices = @transform_4, window_bounds = array<i64: 1, 640>}, {pipeline_mode = #tpu.pipeline_mode<synchronous>, transform_indices = @transform_5, window_bounds = array<i64: 640, 640>}, {pipeline_mode = #tpu.pipeline_mode<synchronous>, transform_indices = @transform_6, window_bounds = array<i64: 1, 640>}, {pipeline_mode = #tpu.pipeline_mode<synchronous>, transform_indices = @transform_7, window_bounds = array<i64: 640, 640>}, {pipeline_mode = #tpu.pipeline_mode<synchronous>, transform_indices = @transform_8, window_bounds = array<i64: 1, 640>}, {pipeline_mode = #tpu.pipeline_mode<synchronous>, transform_indices = @transform_9, window_bounds = array<i64: 640, 640>}, {pipeline_mode = #tpu.pipeline_mode<synchronous>, transform_indices = @transform_10, window_bounds = array<i64: 1, 640>}, {pipeline_mode = #tpu.pipeline_mode<synchronous>, transform_indices = @transform_11, window_bounds = array<i64: 640, 128>}, {pipeline_mode = #tpu.pipeline_mode<synchronous>, transform_indices = @transform_12, window_bounds = array<i64: 1, 128>}, {transform_indices = @transform_13, window_bounds = array<i64: 8, 128>}]} {
    %c0 = arith.constant 0 : index
    %c0_0 = arith.constant 0 : index
    %0 = vector.load %arg1[%c0, %c0_0] : memref<8x32xf32, #tpu.memory_space<vmem>>, vector<8x32xf32>
    %1 = arith.truncf %0 : vector<8x32xf32> to vector<8x32xbf16>
    %c0_1 = arith.constant 0 : index
    %c0_2 = arith.constant 0 : index
    %2 = vector.load %arg2[%c0_1, %c0_2] : memref<32x640xbf16, #tpu.memory_space<vmem>>, vector<32x640xbf16>
    %cst = arith.constant dense<0.000000e+00> : vector<8x640xf32>
    %3 = tpu.matmul %1, %2, %cst {dimension_numbers = #tpu.dot_dimension_numbers<[1], [0], [0], [1], [0, 0, 1, 1], [], []>} : vector<8x32xbf16>, vector<32x640xbf16>, vector<8x640xf32> -> vector<8x640xf32>
    %c0_3 = arith.constant 0 : index
    %c0_4 = arith.constant 0 : index
    %4 = vector.load %arg3[%c0_3, %c0_4] : memref<1x640xf32, #tpu.memory_space<vmem>>, vector<1x640xf32>
    %5 = vector.broadcast %4 : vector<1x640xf32> to vector<8x640xf32>
    %6 = arith.addf %3, %5 : vector<8x640xf32>
    %cst_5 = arith.constant 0.000000e+00 : f32
    %7 = vector.broadcast %cst_5 : f32 to vector<8x640xf32>
    %8 = arith.maximumf %6, %7 : vector<8x640xf32>
    %9 = arith.truncf %8 : vector<8x640xf32> to vector<8x640xbf16>
    %c0_6 = arith.constant 0 : index
    %c0_7 = arith.constant 0 : index
    %10 = vector.load %arg4[%c0_6, %c0_7] : memref<640x640xbf16, #tpu.memory_space<vmem>>, vector<640x640xbf16>
    %cst_8 = arith.constant dense<0.000000e+00> : vector<8x640xf32>
    %11 = tpu.matmul %9, %10, %cst_8 {dimension_numbers = #tpu.dot_dimension_numbers<[1], [0], [0], [1], [0, 0, 1, 1], [], []>} : vector<8x640xbf16>, vector<640x640xbf16>, vector<8x640xf32> -> vector<8x640xf32>
    %c0_9 = arith.constant 0 : index
    %c0_10 = arith.constant 0 : index
    %12 = vector.load %arg5[%c0_9, %c0_10] : memref<1x640xf32, #tpu.memory_space<vmem>>, vector<1x640xf32>
    %13 = vector.broadcast %12 : vector<1x640xf32> to vector<8x640xf32>
    %14 = arith.addf %11, %13 : vector<8x640xf32>
    %cst_11 = arith.constant 0.000000e+00 : f32
    %15 = vector.broadcast %cst_11 : f32 to vector<8x640xf32>
    %16 = arith.maximumf %14, %15 : vector<8x640xf32>
    %17 = arith.truncf %16 : vector<8x640xf32> to vector<8x640xbf16>
    %c0_12 = arith.constant 0 : index
    %c0_13 = arith.constant 0 : index
    %18 = vector.load %arg6[%c0_12, %c0_13] : memref<640x640xbf16, #tpu.memory_space<vmem>>, vector<640x640xbf16>
    %cst_14 = arith.constant dense<0.000000e+00> : vector<8x640xf32>
    %19 = tpu.matmul %17, %18, %cst_14 {dimension_numbers = #tpu.dot_dimension_numbers<[1], [0], [0], [1], [0, 0, 1, 1], [], []>} : vector<8x640xbf16>, vector<640x640xbf16>, vector<8x640xf32> -> vector<8x640xf32>
    %c0_15 = arith.constant 0 : index
    %c0_16 = arith.constant 0 : index
    %20 = vector.load %arg7[%c0_15, %c0_16] : memref<1x640xf32, #tpu.memory_space<vmem>>, vector<1x640xf32>
    %21 = vector.broadcast %20 : vector<1x640xf32> to vector<8x640xf32>
    %22 = arith.addf %19, %21 : vector<8x640xf32>
    %cst_17 = arith.constant 0.000000e+00 : f32
    %23 = vector.broadcast %cst_17 : f32 to vector<8x640xf32>
    %24 = arith.maximumf %22, %23 : vector<8x640xf32>
    %25 = arith.truncf %24 : vector<8x640xf32> to vector<8x640xbf16>
    %c0_18 = arith.constant 0 : index
    %c0_19 = arith.constant 0 : index
    %26 = vector.load %arg8[%c0_18, %c0_19] : memref<640x640xbf16, #tpu.memory_space<vmem>>, vector<640x640xbf16>
    %cst_20 = arith.constant dense<0.000000e+00> : vector<8x640xf32>
    %27 = tpu.matmul %25, %26, %cst_20 {dimension_numbers = #tpu.dot_dimension_numbers<[1], [0], [0], [1], [0, 0, 1, 1], [], []>} : vector<8x640xbf16>, vector<640x640xbf16>, vector<8x640xf32> -> vector<8x640xf32>
    %c0_21 = arith.constant 0 : index
    %c0_22 = arith.constant 0 : index
    %28 = vector.load %arg9[%c0_21, %c0_22] : memref<1x640xf32, #tpu.memory_space<vmem>>, vector<1x640xf32>
    %29 = vector.broadcast %28 : vector<1x640xf32> to vector<8x640xf32>
    %30 = arith.addf %27, %29 : vector<8x640xf32>
    %cst_23 = arith.constant 0.000000e+00 : f32
    %31 = vector.broadcast %cst_23 : f32 to vector<8x640xf32>
    %32 = arith.maximumf %30, %31 : vector<8x640xf32>
    %33 = arith.truncf %32 : vector<8x640xf32> to vector<8x640xbf16>
    %c0_24 = arith.constant 0 : index
    %c0_25 = arith.constant 0 : index
    %34 = vector.load %arg10[%c0_24, %c0_25] : memref<640x640xbf16, #tpu.memory_space<vmem>>, vector<640x640xbf16>
    %cst_26 = arith.constant dense<0.000000e+00> : vector<8x640xf32>
    %35 = tpu.matmul %33, %34, %cst_26 {dimension_numbers = #tpu.dot_dimension_numbers<[1], [0], [0], [1], [0, 0, 1, 1], [], []>} : vector<8x640xbf16>, vector<640x640xbf16>, vector<8x640xf32> -> vector<8x640xf32>
    %c0_27 = arith.constant 0 : index
    %c0_28 = arith.constant 0 : index
    %36 = vector.load %arg11[%c0_27, %c0_28] : memref<1x640xf32, #tpu.memory_space<vmem>>, vector<1x640xf32>
    %37 = vector.broadcast %36 : vector<1x640xf32> to vector<8x640xf32>
    %38 = arith.addf %35, %37 : vector<8x640xf32>
    %cst_29 = arith.constant 0.000000e+00 : f32
    %39 = vector.broadcast %cst_29 : f32 to vector<8x640xf32>
    %40 = arith.maximumf %38, %39 : vector<8x640xf32>
    %41 = arith.truncf %40 : vector<8x640xf32> to vector<8x640xbf16>
    %c0_30 = arith.constant 0 : index
    %c0_31 = arith.constant 0 : index
    %42 = vector.load %arg12[%c0_30, %c0_31] : memref<640x128xbf16, #tpu.memory_space<vmem>>, vector<640x128xbf16>
    %cst_32 = arith.constant dense<0.000000e+00> : vector<8x128xf32>
    %43 = tpu.matmul %41, %42, %cst_32 {dimension_numbers = #tpu.dot_dimension_numbers<[1], [0], [0], [1], [0, 0, 1, 1], [], []>} : vector<8x640xbf16>, vector<640x128xbf16>, vector<8x128xf32> -> vector<8x128xf32>
    %c0_33 = arith.constant 0 : index
    %c0_34 = arith.constant 0 : index
    %44 = vector.load %arg13[%c0_33, %c0_34] : memref<1x128xf32, #tpu.memory_space<vmem>>, vector<1x128xf32>
    %45 = vector.broadcast %44 : vector<1x128xf32> to vector<8x128xf32>
    %46 = arith.addf %43, %45 : vector<8x128xf32>
    %c0_35 = arith.constant 0 : index
    %c0_36 = arith.constant 0 : index
    %47 = vector.load %arg14[%c0_35, %c0_36] : memref<8x128xf32, #tpu.memory_space<vmem>>, vector<8x128xf32>
    tpu.vector_store %arg14[%c0_35, %c0_36], %46 {strides = array<i32>} : memref<8x128xf32, #tpu.memory_space<vmem>>, vector<8x128xf32>,
    return
  }
  func.func @transform_0(%arg0: i32) -> (i32, i32) {
    %c0_i32 = arith.constant 0 : i32
    %c0_i32_0 = arith.constant 0 : i32
    return %arg0, %c0_i32 : i32, i32
  }
  func.func @transform_1(%arg0: i32) -> (i32, i32) {
    %c0_i32 = arith.constant 0 : i32
    %c0_i32_0 = arith.constant 0 : i32
    %c0_i32_1 = arith.constant 0 : i32
    return %c0_i32, %c0_i32_0 : i32, i32
  }
  func.func @transform_2(%arg0: i32) -> (i32, i32) {
    %c0_i32 = arith.constant 0 : i32
    %c0_i32_0 = arith.constant 0 : i32
    %c0_i32_1 = arith.constant 0 : i32
    return %c0_i32, %c0_i32_0 : i32, i32
  }
  func.func @transform_3(%arg0: i32) -> (i32, i32) {
    %c0_i32 = arith.constant 0 : i32
    %c0_i32_0 = arith.constant 0 : i32
    %c0_i32_1 = arith.constant 0 : i32
    return %c0_i32, %c0_i32_0 : i32, i32
  }
  func.func @transform_4(%arg0: i32) -> (i32, i32) {
    %c0_i32 = arith.constant 0 : i32
    %c0_i32_0 = arith.constant 0 : i32
    %c0_i32_1 = arith.constant 0 : i32
    return %c0_i32, %c0_i32_0 : i32, i32
  }
  func.func @transform_5(%arg0: i32) -> (i32, i32) {
    %c0_i32 = arith.constant 0 : i32
    %c0_i32_0 = arith.constant 0 : i32
    %c0_i32_1 = arith.constant 0 : i32
    return %c0_i32, %c0_i32_0 : i32, i32
  }
  func.func @transform_6(%arg0: i32) -> (i32, i32) {
    %c0_i32 = arith.constant 0 : i32
    %c0_i32_0 = arith.constant 0 : i32
    %c0_i32_1 = arith.constant 0 : i32
    return %c0_i32, %c0_i32_0 : i32, i32
  }
  func.func @transform_7(%arg0: i32) -> (i32, i32) {
    %c0_i32 = arith.constant 0 : i32
    %c0_i32_0 = arith.constant 0 : i32
    %c0_i32_1 = arith.constant 0 : i32
    return %c0_i32, %c0_i32_0 : i32, i32
  }
  func.func @transform_8(%arg0: i32) -> (i32, i32) {
    %c0_i32 = arith.constant 0 : i32
    %c0_i32_0 = arith.constant 0 : i32
    %c0_i32_1 = arith.constant 0 : i32
    return %c0_i32, %c0_i32_0 : i32, i32
  }
  func.func @transform_9(%arg0: i32) -> (i32, i32) {
    %c0_i32 = arith.constant 0 : i32
    %c0_i32_0 = arith.constant 0 : i32
    %c0_i32_1 = arith.constant 0 : i32
    return %c0_i32, %c0_i32_0 : i32, i32
  }
  func.func @transform_10(%arg0: i32) -> (i32, i32) {
    %c0_i32 = arith.constant 0 : i32
    %c0_i32_0 = arith.constant 0 : i32
    %c0_i32_1 = arith.constant 0 : i32
    return %c0_i32, %c0_i32_0 : i32, i32
  }
  func.func @transform_11(%arg0: i32) -> (i32, i32) {
    %c0_i32 = arith.constant 0 : i32
    %c0_i32_0 = arith.constant 0 : i32
    %c0_i32_1 = arith.constant 0 : i32
    return %c0_i32, %c0_i32_0 : i32, i32
  }
  func.func @transform_12(%arg0: i32) -> (i32, i32) {
    %c0_i32 = arith.constant 0 : i32
    %c0_i32_0 = arith.constant 0 : i32
    %c0_i32_1 = arith.constant 0 : i32
    return %c0_i32, %c0_i32_0 : i32, i32
  }
  func.func @transform_13(%arg0: i32) -> (i32, i32) {
    %c0_i32 = arith.constant 0 : i32
    %c0_i32_0 = arith.constant 0 : i32
    return %arg0, %c0_i32 : i32, i32
  }
}

</mosaic_0001>

<bundles_post_ra>
// kernel: tpu_custom_call.1
= control target key start
LH: loop header
LB: loop body
LE: loop exit
PB: predicated region body
PF: predicated region fallthrough
CT: control target
= control target key end

     0   :  { %18 = vsyncpa [#allocation3], 0  ;;  %s10634_s0 = inlined_call_operand.hbm [shape: f32[8,32], index: 0, kind: input, shape index: {}]   ;;  %s10635_s1 = inlined_call_operand.hbm [shape: bf16[32,640], index: 1, kind: input, shape index: {}]   ;;  %s10636_s2 = inlined_call_operand.hbm [shape: f32[1,640], index: 2, kind: input, shape index: {}]   ;;  %s10637_s3 = inlined_call_operand.hbm [shape: bf16[640,640], index: 3, kind: input, shape index: {}]   ;;  %s10638_s4 = inlined_call_operand.vmem [shape: f32[1,640], index: 4, kind: input, shape index: {}]   ;;  %s10639_s5 = inlined_call_operand.hbm [shape: bf16[640,640], index: 5, kind: input, shape index: {}]   ;;  %s10640_s6 = inlined_call_operand.vmem [shape: f32[1,640], index: 6, kind: input, shape index: {}]   ;;  %s10641_s7 = inlined_call_operand.hbm [shape: bf16[640,640], index: 7, kind: input, shape index: {}]   ;;  %s10642_s8 = inlined_call_operand.hbm [shape: f32[1,640], index: 8, kind: input, shape index: {}]   ;;  %s10643_s9 = inlined_call_operand.hbm [shape: bf16[640,640], index: 9, kind: input, shape index: {}]   ;;  %s10644_s10 = inlined_call_operand.vmem [shape: f32[1,640], index: 10, kind: input, shape index: {}]   ;;  %s10645_s11 = inlined_call_operand.hbm [shape: bf16[640,128], index: 11, kind: input, shape index: {}]   ;;  %s10646_s12 = inlined_call_operand.vmem [shape: f32[1,128], index: 12, kind: input, shape index: {}]   ;;  %s10647_s13 = inlined_call_operand.hbm [shape: f32[8,128], index: 13, kind: output, shape index: {}]  }
   0x1   :  { %19 = vsyncpa [#allocation6], 0 }
   0x2   :  { %20 = vsyncpa [#allocation9], 0 }
   0x3   :  { %21 = vsyncpa [#allocation12], 0 }
   0x4   :  { %22 = vsyncpa [#allocation15], 0 }
   0x5   :  { %23 = vsyncpa [#allocation4], 0  ;;  %s10223_s25 = smov [#allocation5]  }
   0x6   :  { %s39_s26 = sshll.u32 %s10223_s25, 4  ;;  %s40_s26 = int_to_ptr.vmem [resolvable:$true] %s39_s26 }
   0x7   :  { %s10019_s27 = scalar_lea.vmem %s40_s26, 1280  ;;  %p10024_p1 = scmp.lt.s32.totalorder %s40_s26, %s40_s26 }
   0x8   :  { %p10020_p0 = scmp.ne.s32.totalorder %s40_s26, %s10019_s27  ;;  %p10025_p2 = scmp.lt.s32.totalorder %s10019_s27, %s10019_s27 }
   0xa   :  { %p10026_p3 = por %p10025_p2, %p10024_p1 }
   0xc   :  { %p10027_p4 = pnand %p10026_p3, %p10020_p0 }
   0xe   :  { %10030 = shalt.err (!%p10027_p4)
}
   0xf   :  { %s10224_s28 = smov 320   ;;  %s10225_s29 = smov 20  }
  0x10   :  { %45 = dma.hbm_to_vmem [thread:$0]  %s10635_s1, 1280, %s40_s26, [#allocation6], %s10224_s28, %s10224_s28, %s10225_s29  }
  0x11   :  { %s10226_s15 = smov [#allocation8]   ;;  %s10227_s17 = smov [#allocation11]  }
  0x12   :  { %s61_s16 = sshll.u32 %s10226_s15, 4  ;;  %s89_s18 = sshll.u32 %s10227_s17, 4  ;;  %s62_s16 = int_to_ptr.vmem [resolvable:$true] %s61_s16  ;;  %s90_s18 = int_to_ptr.vmem [resolvable:$true] %s89_s18 }
  0x13   :  { %s10039_s19 = scalar_lea.vmem %s62_s16, 25600  ;;  %p10044_p6 = scmp.lt.s32.totalorder %s62_s16, %s62_s16 }
  0x14   :  { %p10040_p5 = scmp.ne.s32.totalorder %s62_s16, %s10039_s19  ;;  %p10045_p7 = scmp.lt.s32.totalorder %s10039_s19, %s10039_s19 }
  0x16   :  { %p10046_p8 = por %p10045_p7, %p10044_p6 }
  0x18   :  { %p10047_p9 = pnand %p10046_p8, %p10040_p5 }
  0x1a   :  { %10050 = shalt.err (!%p10047_p9)
}
  0x1b   :  { %67 = dma.hbm_to_vmem [thread:$0]  %s10637_s3, 25600, %s62_s16, [#allocation9], %s10224_s28, %s10224_s28, %s10225_s29  }
  0x1c   :  { %s10059_s1 = scalar_lea.vmem %s90_s18, 25600  ;;  %p10064_p11 = scmp.lt.s32.totalorder %s90_s18, %s90_s18 }
  0x1d   :  { %p10060_p10 = scmp.ne.s32.totalorder %s90_s18, %s10059_s1  ;;  %p10065_p12 = scmp.lt.s32.totalorder %s10059_s1, %s10059_s1 }
  0x1f   :  { %p10066_p13 = por %p10065_p12, %p10064_p11 }
  0x21   :  { %p10067_p0 = pnand %p10066_p13, %p10060_p10 }
  0x23   :  { %10070 = shalt.err (!%p10067_p0)
}
  0x24   :  { %95 = dma.hbm_to_vmem [thread:$0]  %s10641_s7, 25600, %s90_s18, [#allocation12], %s10224_s28, %s10224_s28, %s10225_s29  }
  0x25   :  { %s10228_s24 = smov [#allocation14]   ;;  %s10229_s26 = smov [#allocation2]  }
  0x26   :  { %s111_s25 = sshll.u32 %s10228_s24, 4  ;;  %s30_s3 = sshll.u32 %s10229_s26, 4  ;;  %s112_s25 = int_to_ptr.vmem [resolvable:$true] %s111_s25  ;;  %s31_s3 = int_to_ptr.vmem [resolvable:$true] %s30_s3 }
  0x27   :  { %s10079_s27 = scalar_lea.vmem %s112_s25, 25600  ;;  %p10084_p2 = scmp.lt.s32.totalorder %s112_s25, %s112_s25 }
  0x28   :  { %p10080_p1 = scmp.ne.s32.totalorder %s112_s25, %s10079_s27  ;;  %p10085_p3 = scmp.lt.s32.totalorder %s10079_s27, %s10079_s27 }
  0x2a   :  { %p10086_p4 = por %p10085_p3, %p10084_p2 }
  0x2c   :  { %p10087_p5 = pnand %p10086_p4, %p10080_p1 }
  0x2e   :  { %10090 = shalt.err (!%p10087_p5)
}
  0x2f   :  { %117 = dma.hbm_to_vmem [thread:$0]  %s10643_s9, 25600, %s112_s25, [#allocation15], %s10224_s28, %s10224_s28, %s10225_s29  }
  0x30   :  { %s10099_s7 = scalar_lea.vmem %s31_s3, 128  ;;  %p10104_p7 = scmp.lt.s32.totalorder %s31_s3, %s31_s3 }
  0x31   :  { %p10100_p6 = scmp.ne.s32.totalorder %s31_s3, %s10099_s7  ;;  %p10105_p8 = scmp.lt.s32.totalorder %s10099_s7, %s10099_s7 }
  0x33   :  { %p10106_p9 = por %p10105_p8, %p10104_p7 }
  0x35   :  { %p10107_p10 = pnand %p10106_p9, %p10100_p6 }
  0x37   :  { %10110 = shalt.err (!%p10107_p10)
}
  0x38   :  { %33 = dma.hbm_to_vmem [thread:$0]  %s10634_s0, 128, %s31_s3, [#allocation3]  }
  0x39   :  { %s10230_s17 = smov [#allocation7]   ;;  %s10231_s19 = smov [#allocation10]  }
  0x3a   :  { %s52_s18 = sshll.u32 %s10230_s17, 4  ;;  %s75_s20 = sshll.u32 %s10231_s19, 4  ;;  %s53_s18 = int_to_ptr.vmem [resolvable:$true] %s52_s18  ;;  %s76_s20 = int_to_ptr.vmem [resolvable:$true] %s75_s20 }
  0x3b   :  { %s10119_s21 = scalar_lea.vmem %s53_s18, 80  ;;  %s10123_s9 = scalar_lea.vmem %s53_s18, 96 }
  0x3c   :  { %p10120_p11 = scmp.ne.s32.totalorder %s53_s18, %s10119_s21  ;;  %p10124_p12 = scmp.lt.s32.totalorder %s53_s18, %s53_s18 }
  0x3d   :  { %p10125_p13 = scmp.lt.s32.totalorder %s10123_s9, %s10119_s21 }
  0x3f   :  { %p10126_p0 = por %p10125_p13, %p10124_p12 }
  0x41   :  { %p10127_p1 = pnand %p10126_p0, %p10120_p11 }
  0x43   :  { %10130 = shalt.err (!%p10127_p1)
}
  0x44   :  { %55 = dma.hbm_to_vmem [thread:$0]  %s10636_s2, 80, %s53_s18, [#allocation6]  }
  0x45   :  { %s10139_s23 = scalar_lea.vmem %s76_s20, 25600  ;;  %p10144_p3 = scmp.lt.s32.totalorder %s76_s20, %s76_s20 }
  0x46   :  { %p10140_p2 = scmp.ne.s32.totalorder %s76_s20, %s10139_s23  ;;  %p10145_p4 = scmp.lt.s32.totalorder %s10139_s23, %s10139_s23 }
  0x48   :  { %p10146_p5 = por %p10145_p4, %p10144_p3 }
  0x4a   :  { %p10147_p6 = pnand %p10146_p5, %p10140_p2 }
  0x4c   :  { %10150 = shalt.err (!%p10147_p6)
}
  0x4d   :  { %81 = dma.hbm_to_vmem [thread:$0]  %s10639_s5, 25600, %s76_s20, [#allocation9], %s10224_s28, %s10224_s28, %s10225_s29  }
  0x4e   :  { %s10232_s25 = smov [#allocation13]   ;;  %s10233_s3 = smov [#allocation16]  }
  0x4f   :  { %s102_s26 = sshll.u32 %s10232_s25, 4  ;;  %s125_s2 = sshll.u32 %s10233_s3, 4  ;;  %s103_s26 = int_to_ptr.vmem [resolvable:$true] %s102_s26  ;;  %s126_s2 = int_to_ptr.vmem [resolvable:$true] %s125_s2 }
  0x50   :  { %s10159_s27 = scalar_lea.vmem %s103_s26, 80  ;;  %s10163_s30 = scalar_lea.vmem %s103_s26, 96 }
  0x51   :  { %p10160_p7 = scmp.ne.s32.totalorder %s103_s26, %s10159_s27  ;;  %p10164_p8 = scmp.lt.s32.totalorder %s103_s26, %s103_s26 }
  0x52   :  { %p10165_p9 = scmp.lt.s32.totalorder %s10163_s30, %s10159_s27 }
  0x54   :  { %p10166_p10 = por %p10165_p9, %p10164_p8 }
  0x56   :  { %p10167_p11 = pnand %p10166_p10, %p10160_p7 }
  0x58   :  { %10170 = shalt.err (!%p10167_p11)
}
  0x59   :  { %105 = dma.hbm_to_vmem [thread:$0]  %s10642_s8, 80, %s103_s26, [#allocation12]  }
  0x5a   :  { %s10179_s15 = scalar_lea.vmem %s126_s2, 5120  ;;  %p10184_p13 = scmp.lt.s32.totalorder %s126_s2, %s126_s2 }
  0x5b   :  { %p10180_p12 = scmp.ne.s32.totalorder %s126_s2, %s10179_s15  ;;  %p10185_p0 = scmp.lt.s32.totalorder %s10179_s15, %s10179_s15 }
  0x5d   :  { %p10186_p1 = por %p10185_p0, %p10184_p13 }
  0x5f   :  { %p10187_p2 = pnand %p10186_p1, %p10180_p12 }
  0x61   :  { %10190 = shalt.err (!%p10187_p2)
}
  0x62   :  { %s10234_s5 = smov 64   ;;  %s10235_s28 = smov 4  }
  0x63   :  { %131 = dma.hbm_to_vmem [thread:$0]  %s10645_s11, 5120, %s126_s2, [#allocation15], %s10234_s5, %s10234_s5, %s10235_s28  }
  0x64   :  { %10211 = dma.done.wait [#allocation3], 128  }
  0x65   :  { %10212 = vsyncadd [#allocation3], 4294967168 }
  0x66   :  { %10213 = dma.done.wait [#allocation6], 1360  }
  0x67   :  { %10214 = vsyncadd [#allocation6], 4294965936 }
  0x68   :  { %10215 = dma.done.wait [#allocation9], 51200  }
  0x69   :  { %10216 = vsyncadd [#allocation9], 4294916096 }
  0x6a   :  { %10217 = dma.done.wait [#allocation12], 25680  }
  0x6b   :  { %10218 = vsyncadd [#allocation12], 4294941616 }
  0x6c   :  { %10219 = dma.done.wait [#allocation15], 30720  }
  0x6d   :  { %10220 = vsyncadd [#allocation15], 4294936576  ;;  %v10236_v0 = vmov 0   ;;  %v8837_v1 = vld [vmem:[#allocation5 + $0x2c] ss:$20 sps:$4 sm:$0xff]   ;;  %v162_v5 = vld [vmem:[#allocation2] sm:$0xff] }
  0x6e   :  { %291 = vmatprep.mubr.bf16.mxu0 %v10236_v0  ;;  %v8839_v2 = vld [vmem:[#allocation5 + $0x28] ss:$20 sps:$4 sm:$0xff]   ;;  %271 = vmatprep.subr.bf16.mxu0 %v8837_v1  ;;  %v8840_v3 = vld [vmem:[#allocation5 + $0x4] ss:$20 sps:$4 sm:$0xff]   ;;  %v8842_v4 = vld [vmem:[#allocation5] ss:$20 sps:$4 sm:$0xff]   ;;  %v163_v7 = vpack.c.bf16 %v162_v5, %v162_v5 }
  0x6f   :  { %272 = vmatpush1.bf16.msra.mxu0 %v8839_v2  ;;  %v8845_v6 = vld [vmem:[#allocation5 + $0x34] ss:$20 sps:$4 sm:$0xff]   ;;  %v8843_v8 = vld [vmem:[#allocation5 + $0x30] ss:$20 sps:$4 sm:$0xff]   ;;  %vm255_vm0 = vcmask 261120   ;;  %v10237_v17 = vmov 0.0  }
  0x70   :  { %273 = vmatprep.subr.bf16.mxu0 %v8840_v3  ;;  %v8848_v9 = vld [vmem:[#allocation5 + $0xc] ss:$20 sps:$4 sm:$0xff]   ;;  %v8851_v10 = vld [vmem:[#allocation8 + $0x11c] ss:$20 sps:$4 sm:$0xff]   ;;  %vm10238_vm1 = vmmov 0   ;;  %s10239_s20 = smov [#allocation17]  }
  0x71   :  { %v8853_v11 = vld [vmem:[#allocation8 + $0x118] ss:$20 sps:$4 sm:$0xff]   ;;  %v8854_v12 = vld [vmem:[#allocation8 + $0xf4] ss:$20 sps:$4 sm:$0xff]   ;;  %1698 = vmatprep.subr.bf16.mxu1 %v8851_v10  ;;  %v8856_v14 = vld [vmem:[#allocation8 + $0xf0] ss:$20 sps:$4 sm:$0xff]  }
  0x72   :  { %v8846_v13 = vld [vmem:[#allocation5 + $0x8] ss:$20 sps:$4 sm:$0xff]   ;;  %1699 = vmatpush1.bf16.msra.mxu1 %v8853_v11  ;;  %v8857_v15 = vld [vmem:[#allocation8 + $0xcc] ss:$20 sps:$4 sm:$0xff]   ;;  %s7577_s21 = sshll.u32 %s10239_s20, 4  ;;  %s7578_s21 = int_to_ptr.vmem [resolvable:$true] %s7577_s21 }
  0x73   :  { %274 = vmatpush1.bf16.msra.mxu0 %v8842_v4  ;;  %1700 = vmatprep.subr.bf16.mxu1 %v8854_v12  ;;  %v8849_v16 = vld [vmem:[#allocation5 + $0x38] ss:$20 sps:$4 sm:$0xff]   ;;  %v8862_v18 = vld [vmem:[#allocation8 + $0xc8] ss:$20 sps:$4 sm:$0xff]   ;;  %s10191_s9 = scalar_lea.vmem %s7578_s21, 128  ;;  %p10196_p4 = scmp.lt.s32.totalorder %s7578_s21, %s7578_s21 }
  0x74   :  { %312 = vmatprep.subr.bf16.mxu0 %v8845_v6  ;;  %v8863_v19 = vld [vmem:[#allocation8 + $0xa4] ss:$20 sps:$4 sm:$0xff]   ;;  %v8861_v21 = vld [vmem:[#allocation8 + $0x39c] ss:$20 sps:$4 sm:$0xff]   ;;  %v8868_v22 = vld [vmem:[#allocation8 + $0xa0] ss:$20 sps:$4 sm:$0xff]   ;;  %p10192_p3 = scmp.ne.s32.totalorder %s7578_s21, %s10191_s9  ;;  %p10197_p5 = scmp.lt.s32.totalorder %s10191_s9, %s10191_s9 }
  0x75   :  { %v8850_v20 = vld [vmem:[#allocation5 + $0x10] ss:$20 sps:$4 sm:$0xff]   ;;  %v8867_v25 = vld [vmem:[#allocation8 + $0x374] ss:$20 sps:$4 sm:$0xff]  }
  0x76   :  { %7600 = vmatmul.mubr.msk.bf16.vlgmr.msra.gmra.mxu0 %vm255_vm0, %v163_v7  ;;  %1701 = vmatpush1.bf16.msra.mxu1 %v8856_v14  ;;  %v8869_v23 = vld [vmem:[#allocation8 + $0x7c] ss:$20 sps:$4 sm:$0xff]   ;;  %v8859_v24 = vld [vmem:[#allocation8 + $0x398] ss:$20 sps:$4 sm:$0xff]   ;;  %v8875_v27 = vld [vmem:[#allocation8 + $0x54] ss:$20 sps:$4 sm:$0xff]   ;;  %p10198_p6 = por %p10197_p5, %p10196_p4 }
  0x77   :  { %313 = vmatpush1.bf16.msra.mxu0 %v8843_v8  ;;  %332 = vmatprep.mubr.bf16.mxu0 %v10236_v0  ;;  %v8874_v26 = vld [vmem:[#allocation8 + $0x78] ss:$20 sps:$4 sm:$0xff]   ;;  %v8865_v28 = vld [vmem:[#allocation8 + $0x370] ss:$20 sps:$4 sm:$0xff]   ;;  %v8871_v32 = vld [vmem:[#allocation8 + $0x348] ss:$20 sps:$4 sm:$0xff]  }
  0x78   :  { %314 = vmatprep.subr.bf16.mxu0 %v8848_v9  ;;  %1702 = vmatprep.subr.bf16.mxu1 %v8857_v15  ;;  %v8873_v29 = vld [vmem:[#allocation8 + $0x34c] ss:$20 sps:$4 sm:$0xff]   ;;  %v8880_v30 = vld [vmem:[#allocation8 + $0x50] ss:$20 sps:$4 sm:$0xff]   ;;  %v8886_v34 = vld [vmem:[#allocation8 + $0x28] ss:$20 sps:$4 sm:$0xff]   ;;  %p10199_p7 = pnand %p10198_p6, %p10192_p3 }
  0x79   :  { %v8881_v31 = vld [vmem:[#allocation8 + $0x2c] ss:$20 sps:$4 sm:$0xff]   ;;  %v8879_v33 = vld [vmem:[#allocation8 + $0x324] ss:$20 sps:$4 sm:$0xff]   ;;  %v8885_v37 = vld [vmem:[#allocation8 + $0x2fc] ss:$20 sps:$4 sm:$0xff]  }
  0x7a   :  { %1703 = vmatpush1.bf16.msra.mxu1 %v8862_v18  ;;  %v8887_v35 = vld [vmem:[#allocation8 + $0x4] ss:$20 sps:$4 sm:$0xff]   ;;  %v8877_v36 = vld [vmem:[#allocation8 + $0x320] ss:$20 sps:$4 sm:$0xff]   ;;  %v8893_v39 = vld [vmem:[#allocation8 + $0x25c] ss:$20 sps:$4 sm:$0xff]   ;;  %v178_v18 = vlaneseq }
  0x7b   :  { %315 = vmatpush1.bf16.msra.mxu0 %v8846_v13  ;;  %1704 = vmatprep.subr.bf16.mxu1 %v8863_v19  ;;  %v8892_v38 = vld [vmem:[#allocation8] ss:$20 sps:$4 sm:$0xff]   ;;  %v8883_v40 = vld [vmem:[#allocation8 + $0x2f8] ss:$20 sps:$4 sm:$0xff]   ;;  %v8889_v43 = vld [vmem:[#allocation8 + $0x2d0] ss:$20 sps:$4 sm:$0xff]  }
  0x7c   :  { %8712 = vmatprep.subr.bf16.mxu0 %v10237_v17  ;;  %v8891_v41 = vld [vmem:[#allocation8 + $0x2d4] ss:$20 sps:$4 sm:$0xff]   ;;  %v8898_v42 = vld [vmem:[#allocation8 + $0x258] ss:$20 sps:$4 sm:$0xff]   ;;  %v8904_v46 = vld [vmem:[#allocation8 + $0x230] ss:$20 sps:$4 sm:$0xff]  }
  0x7d   :  { %v8899_v44 = vld [vmem:[#allocation8 + $0x234] ss:$20 sps:$4 sm:$0xff]   ;;  %v8897_v45 = vld [vmem:[#allocation8 + $0x2ac] ss:$20 sps:$4 sm:$0xff]   ;;  %v8903_v49 = vld [vmem:[#allocation8 + $0x284] ss:$20 sps:$4 sm:$0xff]  }
  0x7e   :  { %7601 = vmatmul.mubr.msk.bf16.vlgmr.msra.gmra.mxu0 %vm255_vm0, %v163_v7  ;;  %1705 = vmatpush1.bf16.msra.mxu1 %v8868_v22  ;;  %v8905_v47 = vld [vmem:[#allocation8 + $0x20c] ss:$20 sps:$4 sm:$0xff]   ;;  %v8895_v48 = vld [vmem:[#allocation8 + $0x2a8] ss:$20 sps:$4 sm:$0xff]   ;;  %v8911_v51 = vld [vmem:[#allocation8 + $0x1e4] ss:$20 sps:$4 sm:$0xff]  }
  0x7f   :  { %8713 = vmatpush3.bf16.msra.mxu0 %v8849_v16  ;;  %8716 = vmatprep.mubr.msk.bf16.mxu0 %vm10238_vm1, %v10237_v17  ;;  %v8910_v50 = vld [vmem:[#allocation8 + $0x208] ss:$20 sps:$4 sm:$0xff]   ;;  %v8901_v52 = vld [vmem:[#allocation8 + $0x280] ss:$20 sps:$4 sm:$0xff]   ;;  %v8907_v56 = vld [vmem:[#allocation8 + $0x4d8] ss:$20 sps:$4 sm:$0xff]  }
  0x80   :  { %8714 = vmatprep.subr.bf16.mxu0 %v10237_v17  ;;  %1706 = vmatprep.subr.bf16.mxu1 %v8869_v23  ;;  %v8909_v53 = vld [vmem:[#allocation8 + $0x4dc] ss:$20 sps:$4 sm:$0xff]   ;;  %v8916_v54 = vld [vmem:[#allocation8 + $0x1e0] ss:$20 sps:$4 sm:$0xff]   ;;  %v8922_v58 = vld [vmem:[#allocation8 + $0x1b8] ss:$20 sps:$4 sm:$0xff]  }
  0x81   :  { %v8917_v55 = vld [vmem:[#allocation8 + $0x1bc] ss:$20 sps:$4 sm:$0xff]   ;;  %v8915_v57 = vld [vmem:[#allocation8 + $0x4b4] ss:$20 sps:$4 sm:$0xff]   ;;  %v8921_v61 = vld [vmem:[#allocation8 + $0x48c] ss:$20 sps:$4 sm:$0xff]  }
  0x82   :  { %1707 = vmatpush1.bf16.msra.mxu1 %v8874_v26  ;;  %v8923_v59 = vld [vmem:[#allocation8 + $0x194] ss:$20 sps:$4 sm:$0xff]   ;;  %v8913_v60 = vld [vmem:[#allocation8 + $0x4b0] ss:$20 sps:$4 sm:$0xff]   ;;  %v8929_v3 = vld [vmem:[#allocation8 + $0x16c] ss:$20 sps:$4 sm:$0xff]  }
  0x83   :  { %8715 = vmatpush3.bf16.msra.mxu0 %v8850_v20  ;;  %1708 = vmatprep.subr.bf16.mxu1 %v8875_v27  ;;  %v8928_v62 = vld [vmem:[#allocation8 + $0x190] ss:$20 sps:$4 sm:$0xff]   ;;  %v8919_v63 = vld [vmem:[#allocation8 + $0x488] ss:$20 sps:$4 sm:$0xff]   ;;  %v8925_v2 = vld [vmem:[#allocation8 + $0x460] ss:$20 sps:$4 sm:$0xff]  }
  0x84   :  { %1739 = vmatprep.subr.bf16.mxu0 %v8861_v21  ;;  %v8927_v1 = vld [vmem:[#allocation8 + $0x464] ss:$20 sps:$4 sm:$0xff]   ;;  %v8933_v4 = vld [vmem:[#allocation8 + $0x43c] ss:$20 sps:$4 sm:$0xff]   ;;  %v8939_v8 = vld [vmem:[#allocation8 + $0x414] ss:$20 sps:$4 sm:$0xff]  }
  0x85   :  { %v8931_v5 = vld [vmem:[#allocation8 + $0x438] ss:$20 sps:$4 sm:$0xff]   ;;  %v8934_v6 = vld [vmem:[#allocation8 + $0x168] ss:$20 sps:$4 sm:$0xff]   ;;  %v8937_v9 = vld [vmem:[#allocation8 + $0x410] ss:$20 sps:$4 sm:$0xff]  }
  0x86   :  { %8717 = vmatmul.mubr.msk.bf16.vlgmr.msra.gmra.mxu0 %vm255_vm0, %v163_v7  ;;  %1709 = vmatpush1.bf16.msra.mxu1 %v8880_v30  ;;  %v8935_v7 = vld [vmem:[#allocation8 + $0x144] ss:$20 sps:$4 sm:$0xff]   ;;  %v8940_v10 = vld [vmem:[#allocation8 + $0x140] ss:$20 sps:$4 sm:$0xff]   ;;  %v8946_v12 = vld [vmem:[#allocation8 + $0x61c] ss:$20 sps:$4 sm:$0xff]  }
  0x87   :  { %1740 = vmatpush1.bf16.msra.mxu0 %v8859_v24  ;;  %1710 = vmatprep.subr.bf16.mxu1 %v8881_v31  ;;  %v8943_v11 = vld [vmem:[#allocation8 + $0x3ec] ss:$20 sps:$4 sm:$0xff]   ;;  %v8941_v13 = vld [vmem:[#allocation8 + $0x3e8] ss:$20 sps:$4 sm:$0xff]   ;;  %v8949_v14 = vld [vmem:[#allocation8 + $0x3c4] ss:$20 sps:$4 sm:$0xff]  }
  0x88   :  { %1741 = vmatprep.subr.bf16.mxu0 %v8867_v25  ;;  %v8947_v15 = vld [vmem:[#allocation8 + $0x3c0] ss:$20 sps:$4 sm:$0xff]   ;;  %v8958_v16 = vld [vmem:[#allocation8 + $0x124] ss:$20 sps:$4 sm:$0xff]   ;;  %v179_v19 = vshrl.u32 %v178_v18, 7 }
  0x89   :  { %v10363_v21 = vld [vmem:[#allocation7] sm:$0x1f]  ;;  %v8983_v18 = vld [vmem:[#allocation8 + $0x500] ss:$20 sps:$4 sm:$0xff]  }
  0x8a   :  { %1711 = vmatpush1.bf16.msra.mxu1 %v8886_v34  ;;  %v10361_v20 = vsub.s32 0, %v179_v19  ;;  %v10365_v22 = vsub.s32 1, %v179_v19  ;;  %v10371_v26 = vsub.s32 2, %v179_v19  ;;  %v10373_v30 = vsub.s32 3, %v179_v19 }
  0x8b   :  { %1742 = vmatpush1.bf16.msra.mxu0 %v8865_v28  ;;  %1712 = vmatprep.subr.bf16.mxu1 %v8887_v35  ;;  %v8944_v35 = vld [vmem:[#allocation8 + $0x618] ss:$20 sps:$4 sm:$0xff]  }
  0x8c   :  { %1743 = vmatprep.subr.bf16.mxu0 %v8873_v29  ;;  %v181_v23 = vrot.slane %v10363_v21, %v10361_v20  ;;  %v185_v24 = vrot.slane %v10363_v21, %v10365_v22  ;;  %v189_v34 = vrot.slane %v10363_v21, %v10371_v26 }
  0x8e   :  { %1713 = vmatpush1.bf16.msra.mxu1 %v8892_v38 }
  0x8f   :  { %1744 = vmatpush1.bf16.msra.mxu0 %v8871_v32  ;;  %1714 = vmatprep.subr.bf16.mxu1 %v8893_v39  ;;  %v193_v39 = vrot.slane %v10363_v21, %v10373_v30 }
  0x90   :  { %1745 = vmatprep.subr.bf16.mxu0 %v8879_v33 }
  0x92   :  { %1715 = vmatpush2.bf16.msra.mxu1 %v8898_v42 }
  0x93   :  { %1746 = vmatpush1.bf16.msra.mxu0 %v8877_v36  ;;  %1716 = vmatprep.subr.bf16.mxu1 %v8899_v44 }
  0x94   :  { %1747 = vmatprep.subr.bf16.mxu0 %v8885_v37  ;;  %v8952_v37 = vld [vmem:[#allocation8 + $0x5f4] ss:$20 sps:$4 sm:$0xff]  }
  0x96   :  { %1717 = vmatpush2.bf16.msra.mxu1 %v8904_v46  ;;  %v8950_v46 = vld [vmem:[#allocation8 + $0x5f0] ss:$20 sps:$4 sm:$0xff]  }
  0x97   :  { %1748 = vmatpush1.bf16.msra.mxu0 %v8883_v40  ;;  %1718 = vmatprep.subr.bf16.mxu1 %v8905_v47  ;;  %v8955_v47 = vld [vmem:[#allocation8 + $0x5cc] ss:$20 sps:$4 sm:$0xff]  }
  0x98   :  { %1749 = vmatprep.subr.bf16.mxu0 %v8891_v41 }
  0x9a   :  { %1719 = vmatpush2.bf16.msra.mxu1 %v8910_v50  ;;  %v8953_v50 = vld [vmem:[#allocation8 + $0x5c8] ss:$20 sps:$4 sm:$0xff]  }
  0x9b   :  { %1750 = vmatpush1.bf16.msra.mxu0 %v8889_v43  ;;  %1720 = vmatprep.subr.bf16.mxu1 %v8911_v51  ;;  %v8956_v51 = vld [vmem:[#allocation8 + $0x120] ss:$20 sps:$4 sm:$0xff]  }
  0x9c   :  { %1751 = vmatprep.subr.bf16.mxu0 %v8897_v45 }
  0x9e   :  { %1721 = vmatpush2.bf16.msra.mxu1 %v8916_v54 }
  0x9f   :  { %1752 = vmatpush1.bf16.msra.mxu0 %v8895_v48  ;;  %1722 = vmatprep.subr.bf16.mxu1 %v8917_v55 }
  0xa0   :  { %1753 = vmatprep.subr.bf16.mxu0 %v8903_v49 }
  0xa2   :  { %1723 = vmatpush2.bf16.msra.mxu1 %v8922_v58  ;;  %v8959_v58 = vld [vmem:[#allocation8 + $0x5a0] ss:$20 sps:$4 sm:$0xff]  }
  0xa3   :  { %1754 = vmatpush1.bf16.msra.mxu0 %v8901_v52  ;;  %1724 = vmatprep.subr.bf16.mxu1 %v8923_v59  ;;  %v8962_v59 = vld [vmem:[#allocation8 + $0xf8] ss:$20 sps:$4 sm:$0xff]  }
  0xa4   :  { %1755 = vmatprep.subr.bf16.mxu0 %v8909_v53  ;;  %v8961_v53 = vld [vmem:[#allocation8 + $0x5a4] ss:$20 sps:$4 sm:$0xff]  }
  0xa6   :  { %1725 = vmatpush2.bf16.msra.mxu1 %v8928_v62 }
  0xa7   :  { %1756 = vmatpush2.bf16.msra.mxu0 %v8907_v56  ;;  %1726 = vmatprep.subr.bf16.mxu1 %v8929_v3  ;;  %v8964_v56 = vld [vmem:[#allocation8 + $0xfc] ss:$20 sps:$4 sm:$0xff]  }
  0xa8   :  { %1757 = vmatprep.subr.bf16.mxu0 %v8915_v57  ;;  %v8968_v3 = vld [vmem:[#allocation8 + $0xd0] ss:$20 sps:$4 sm:$0xff]  }
  0xaa   :  { %1727 = vmatpush2.bf16.msra.mxu1 %v8934_v6  ;;  %v8976_v6 = vld [vmem:[#allocation8 + $0xac] ss:$20 sps:$4 sm:$0xff]  }
  0xab   :  { %1758 = vmatpush2.bf16.msra.mxu0 %v8913_v60  ;;  %1728 = vmatprep.subr.bf16.mxu1 %v8935_v7  ;;  %v8967_v60 = vld [vmem:[#allocation8 + $0x57c] ss:$20 sps:$4 sm:$0xff]  }
  0xac   :  { %1759 = vmatprep.subr.bf16.mxu0 %v8921_v61  ;;  %v8970_v61 = vld [vmem:[#allocation8 + $0xd4] ss:$20 sps:$4 sm:$0xff]   ;;  %v8971_v7 = vld [vmem:[#allocation8 + $0x550] ss:$20 sps:$4 sm:$0xff]  }
  0xae   :  { %1729 = vmatpush2.bf16.msra.mxu1 %v8940_v10  ;;  %v8979_v10 = vld [vmem:[#allocation8 + $0x52c] ss:$20 sps:$4 sm:$0xff]  }
  0xaf   :  { %1760 = vmatpush2.bf16.msra.mxu0 %v8919_v63  ;;  %1780 = vmatprep.subr.bf16.mxu1 %v8946_v12  ;;  %v10393_v63 = vsub.s32 4, %v179_v19  ;;  %v8977_v12 = vld [vmem:[#allocation8 + $0x528] ss:$20 sps:$4 sm:$0xff]   ;;  %v8986_v19 = vld [vmem:[#allocation8 + $0x58] ss:$20 sps:$4 sm:$0xff]  }
  0xb0   :  { %1761 = vmatprep.subr.bf16.mxu0 %v8927_v1 }
  0xb3   :  { %1762 = vmatpush2.bf16.msra.mxu0 %v8925_v2  ;;  %v8965_v2 = vld [vmem:[#allocation8 + $0x578] ss:$20 sps:$4 sm:$0xff]  }
  0xb4   :  { %1763 = vmatprep.subr.bf16.mxu0 %v8933_v4  ;;  %v8973_v4 = vld [vmem:[#allocation8 + $0x554] ss:$20 sps:$4 sm:$0xff]  }
  0xb7   :  { %1764 = vmatpush2.bf16.msra.mxu0 %v8931_v5 }
  0xb8   :  { %1765 = vmatprep.subr.bf16.mxu0 %v8939_v8  ;;  %v8974_v8 = vld [vmem:[#allocation8 + $0xa8] ss:$20 sps:$4 sm:$0xff]  }
  0xbb   :  { %1766 = vmatpush2.bf16.msra.mxu0 %v8937_v9  ;;  %v197_v9 = vrot.slane %v10363_v21, %v10393_v63  ;;  %v8994_v21 = vld [vmem:[#allocation8 + $0x3a4] ss:$20 sps:$4 sm:$0xff]  }
  0xbc   :  { %1767 = vmatprep.subr.bf16.mxu0 %v8943_v11  ;;  %v8982_v11 = vld [vmem:[#allocation8 + $0x84] ss:$20 sps:$4 sm:$0xff]  }
  0xbf   :  { %1768 = vmatpush2.bf16.msra.mxu0 %v8941_v13  ;;  %v8980_v13 = vld [vmem:[#allocation8 + $0x80] ss:$20 sps:$4 sm:$0xff]  }
  0xc0   :  { %1769 = vmatprep.subr.bf16.mxu0 %v8949_v14 }
  0xc3   :  { %1770 = vmatpush2.bf16.msra.mxu0 %v8947_v15  ;;  %v8985_v15 = vld [vmem:[#allocation8 + $0x504] ss:$20 sps:$4 sm:$0xff]  }
  0xc4   :  { %1821 = vmatprep.subr.bf16.mxu0 %v8958_v16  ;;  %v8988_v16 = vld [vmem:[#allocation8 + $0x5c] ss:$20 sps:$4 sm:$0xff]  }
 0x136   :  { %v293_v25 = vpop.f32.mrf.mxu0 }
 0x137   :  { %v294_v27 = vadd.f32 %v293_v25, %v181_v23  ;;  %v8989_v25 = vld [vmem:[#allocation8 + $0x30] ss:$20 sps:$4 sm:$0xff]  }
 0x138   :  { %v295_v28 = vpop.f32.mrf.mxu0 }
 0x139   :  { %v296_v29 = vadd.f32 %v295_v28, %v185_v24  ;;  %v381_v31 = vmax.f32 %v294_v27, 0.0  ;;  %v8991_v24 = vld [vmem:[#allocation8 + $0x34] ss:$20 sps:$4 sm:$0xff]  }
 0x13a   :  { %v297_v32 = vpop.f32.mrf.mxu0  ;;  %v8992_v27 = vld [vmem:[#allocation8 + $0x3a0] ss:$20 sps:$4 sm:$0xff]  }
 0x13b   :  { %v382_v33 = vmax.f32 %v296_v29, 0.0  ;;  %v10381_v40 = vpack.c.bf16 %v381_v31, %v381_v31  ;;  %v8997_v29 = vld [vmem:[#allocation8 + $0xc] ss:$20 sps:$4 sm:$0xff]   ;;  %v9000_v31 = vld [vmem:[#allocation8 + $0x37c] ss:$20 sps:$4 sm:$0xff]  }
 0x13c   :  { %v298_v36 = vpop.f32.mrf.mxu0  ;;  %v8995_v32 = vld [vmem:[#allocation8 + $0x8] ss:$20 sps:$4 sm:$0xff]  }
 0x13d   :  { %v10377_v38 = vpack.c.bf16 %v382_v33, %v382_v33  ;;  %v8998_v33 = vld [vmem:[#allocation8 + $0x378] ss:$20 sps:$4 sm:$0xff]   ;;  %v9001_v36 = vld [vmem:[#allocation8 + $0x260] ss:$20 sps:$4 sm:$0xff]  }
 0x13e   :  { %v334_v41 = vpop.f32.mrf.mxu0 }
 0x13f   :  { %v335_v42 = vadd.f32 %v334_v41, %v189_v34  ;;  %1730 = vmatprep.mubr.bf16.mxu1 %v10377_v38  ;;  %v9003_v34 = vld [vmem:[#allocation8 + $0x264] ss:$20 sps:$4 sm:$0xff]   ;;  %v9012_v41 = vld [vmem:[#allocation8 + $0x32c] ss:$20 sps:$4 sm:$0xff]  }
 0x140   :  { %v336_v43 = vpop.f32.mrf.mxu0  ;;  %1731 = vmatmul.mubr.bf16.vlgmr.msra.gmra.mxu1 %v10381_v40 }
 0x141   :  { %v383_v44 = vmax.f32 %v335_v42, 0.0  ;;  %v337_v45 = vadd.f32 %v336_v43, %v193_v39  ;;  %1781 = vmatpush1.bf16.msra.mxu1 %v8944_v35  ;;  %1812 = vmatprep.mubr.bf16.mxu1 %v10236_v0  ;;  %v9006_v35 = vld [vmem:[#allocation8 + $0x354] ss:$20 sps:$4 sm:$0xff]   ;;  %v9009_v39 = vld [vmem:[#allocation8 + $0x23c] ss:$20 sps:$4 sm:$0xff]  }
 0x142   :  { %1782 = vmatprep.subr.bf16.mxu1 %v8952_v37  ;;  %v338_v48 = vpop.f32.mrf.mxu0  ;;  %v9004_v37 = vld [vmem:[#allocation8 + $0x350] ss:$20 sps:$4 sm:$0xff]   ;;  %v9007_v42 = vld [vmem:[#allocation8 + $0x238] ss:$20 sps:$4 sm:$0xff]   ;;  %v9010_v43 = vld [vmem:[#allocation8 + $0x328] ss:$20 sps:$4 sm:$0xff]  }
 0x143   :  { %v384_v49 = vmax.f32 %v337_v45, 0.0  ;;  %v10386_v52 = vpack.c.bf16 %v383_v44, %v383_v44  ;;  %v9015_v44 = vld [vmem:[#allocation8 + $0x214] ss:$20 sps:$4 sm:$0xff]   ;;  %v9018_v45 = vld [vmem:[#allocation8 + $0x304] ss:$20 sps:$4 sm:$0xff]  }
 0x144   :  { %v339_v54 = vpop.f32.mrf.mxu0  ;;  %v9021_v48 = vld [vmem:[#allocation8 + $0x1ec] ss:$20 sps:$4 sm:$0xff]  }
 0x145   :  { %v10388_v55 = vpack.c.bf16 %v384_v49, %v384_v49  ;;  %1783 = vmatpush1.bf16.msra.mxu1 %v8950_v46  ;;  %v9013_v46 = vld [vmem:[#allocation8 + $0x210] ss:$20 sps:$4 sm:$0xff]   ;;  %v9030_v54 = vld [vmem:[#allocation8 + $0x2b4] ss:$20 sps:$4 sm:$0xff]  }
 0x146   :  { %1784 = vmatprep.subr.bf16.mxu1 %v8955_v47  ;;  %v375_v57 = vpop.f32.mrf.mxu0  ;;  %v9016_v47 = vld [vmem:[#allocation8 + $0x300] ss:$20 sps:$4 sm:$0xff]   ;;  %v9024_v49 = vld [vmem:[#allocation8 + $0x2dc] ss:$20 sps:$4 sm:$0xff]  }
 0x147   :  { %1771 = vmatprep.mubr.bf16.mxu0 %v10388_v55  ;;  %v376_v14 = vadd.f32 %v375_v57, %v197_v9  ;;  %v9028_v57 = vld [vmem:[#allocation8 + $0x2b0] ss:$20 sps:$4 sm:$0xff]  }
 0x148   :  { %1772 = vmatmul.mubr.bf16.vlgmr.msra.gmra.mxu0 %v10386_v52  ;;  %v8718_v62 = vpop.f32.mrf.mxu0  ;;  %v9054_v9 = vld [vmem:[#allocation8 + $0x624] ss:$20 sps:$4 sm:$0xff]  }
 0x149   :  { %1785 = vmatpush1.bf16.msra.mxu1 %v8953_v50  ;;  %1822 = vmatpush1.bf16.msra.mxu0 %v8956_v51  ;;  %v385_v23 = vmax.f32 %v376_v14, 0.0  ;;  %v9019_v50 = vld [vmem:[#allocation8 + $0x1e8] ss:$20 sps:$4 sm:$0xff]   ;;  %v9022_v51 = vld [vmem:[#allocation8 + $0x2d8] ss:$20 sps:$4 sm:$0xff]  }
 0x14a   :  { %1853 = vmatprep.mubr.bf16.mxu0 %v10377_v38  ;;  %1786 = vmatprep.subr.bf16.mxu1 %v8961_v53  ;;  %v378_v1 = vpop.f32.mrf.mxu0  ;;  %v9027_v53 = vld [vmem:[#allocation8 + $0x1c4] ss:$20 sps:$4 sm:$0xff]   ;;  %v9039_v62 = vld [vmem:[#allocation8 + $0x174] ss:$20 sps:$4 sm:$0xff]  }
 0x14b   :  { %1823 = vmatprep.subr.bf16.mxu0 %v8964_v56  ;;  %v10397_v28 = vpack.c.bf16 %v385_v23, %v385_v23  ;;  %v9025_v56 = vld [vmem:[#allocation8 + $0x1c0] ss:$20 sps:$4 sm:$0xff]   ;;  %v9042_v1 = vld [vmem:[#allocation8 + $0x4e4] ss:$20 sps:$4 sm:$0xff]   ;;  %v9055_v14 = vld [vmem:[#allocation8 + $0x468] ss:$20 sps:$4 sm:$0xff]  }
 0x14c   :  { %v8719_v5 = vpop.f32.mrf.mxu0  ;;  %v9064_v23 = vld [vmem:[#allocation8 + $0x5d0] ss:$20 sps:$4 sm:$0xff]  }
 0x14d   :  { %1787 = vmatpush1.bf16.msra.mxu1 %v8959_v58  ;;  %1824 = vmatpush1.bf16.msra.mxu0 %v8962_v59  ;;  %v9033_v58 = vld [vmem:[#allocation8 + $0x19c] ss:$20 sps:$4 sm:$0xff]   ;;  %v9036_v59 = vld [vmem:[#allocation8 + $0x28c] ss:$20 sps:$4 sm:$0xff]  }
 0x14e   :  { %1788 = vmatprep.subr.bf16.mxu1 %v8967_v60  ;;  %1825 = vmatprep.subr.bf16.mxu0 %v8970_v61  ;;  %v9031_v60 = vld [vmem:[#allocation8 + $0x198] ss:$20 sps:$4 sm:$0xff]   ;;  %v9034_v61 = vld [vmem:[#allocation8 + $0x288] ss:$20 sps:$4 sm:$0xff]  }
 0x14f   :  { %v9048_v5 = vld [vmem:[#allocation8 + $0x4bc] ss:$20 sps:$4 sm:$0xff]  }
 0x151   :  { %1789 = vmatpush1.bf16.msra.mxu1 %v8965_v2  ;;  %1826 = vmatpush1.bf16.msra.mxu0 %v8968_v3  ;;  %v9037_v2 = vld [vmem:[#allocation8 + $0x170] ss:$20 sps:$4 sm:$0xff]   ;;  %v9040_v3 = vld [vmem:[#allocation8 + $0x4e0] ss:$20 sps:$4 sm:$0xff]  }
 0x152   :  { %1790 = vmatprep.subr.bf16.mxu1 %v8973_v4  ;;  %1827 = vmatprep.subr.bf16.mxu0 %v8976_v6  ;;  %v9045_v4 = vld [vmem:[#allocation8 + $0x14c] ss:$20 sps:$4 sm:$0xff]   ;;  %v9043_v6 = vld [vmem:[#allocation8 + $0x148] ss:$20 sps:$4 sm:$0xff]  }
 0x155   :  { %1791 = vmatpush1.bf16.msra.mxu1 %v8971_v7  ;;  %1828 = vmatpush1.bf16.msra.mxu0 %v8974_v8  ;;  %v9046_v7 = vld [vmem:[#allocation8 + $0x4b8] ss:$20 sps:$4 sm:$0xff]   ;;  %v9051_v8 = vld [vmem:[#allocation8 + $0x494] ss:$20 sps:$4 sm:$0xff]  }
 0x156   :  { %1792 = vmatprep.subr.bf16.mxu1 %v8979_v10  ;;  %1829 = vmatprep.subr.bf16.mxu0 %v8982_v11  ;;  %v9049_v10 = vld [vmem:[#allocation8 + $0x490] ss:$20 sps:$4 sm:$0xff]   ;;  %v9052_v11 = vld [vmem:[#allocation8 + $0x620] ss:$20 sps:$4 sm:$0xff]  }
 0x159   :  { %1793 = vmatpush1.bf16.msra.mxu1 %v8977_v12  ;;  %1830 = vmatpush1.bf16.msra.mxu0 %v8980_v13  ;;  %v9057_v12 = vld [vmem:[#allocation8 + $0x46c] ss:$20 sps:$4 sm:$0xff]   ;;  %v9060_v13 = vld [vmem:[#allocation8 + $0x5fc] ss:$20 sps:$4 sm:$0xff]  }
 0x15a   :  { %1794 = vmatprep.subr.bf16.mxu1 %v8985_v15  ;;  %1831 = vmatprep.subr.bf16.mxu0 %v8988_v16  ;;  %v9058_v15 = vld [vmem:[#allocation8 + $0x5f8] ss:$20 sps:$4 sm:$0xff]  }
 0x15b   :  { %v9063_v16 = vld [vmem:[#allocation8 + $0x444] ss:$20 sps:$4 sm:$0xff]  }
 0x15d   :  { %1795 = vmatpush1.bf16.msra.mxu1 %v8983_v18  ;;  %1832 = vmatpush1.bf16.msra.mxu0 %v8986_v19  ;;  %v9066_v18 = vld [vmem:[#allocation8 + $0x5d4] ss:$20 sps:$4 sm:$0xff]  }
 0x15e   :  { %1833 = vmatprep.subr.bf16.mxu0 %v8991_v24  ;;  %1862 = vmatprep.subr.bf16.mxu1 %v8994_v21  ;;  %v9061_v19 = vld [vmem:[#allocation8 + $0x440] ss:$20 sps:$4 sm:$0xff]   ;;  %v9069_v24 = vld [vmem:[#allocation8 + $0x41c] ss:$20 sps:$4 sm:$0xff]  }
 0x15f   :  { %v9072_v21 = vld [vmem:[#allocation8 + $0x5ac] ss:$20 sps:$4 sm:$0xff]  }
 0x160   :  { %1813 = vmatmul.mubr.bf16.vlgmr.msra.gmra.mxu1 %v10397_v28 }
 0x161   :  { %1834 = vmatpush1.bf16.msra.mxu0 %v8989_v25  ;;  %1863 = vmatpush1.bf16.msra.mxu1 %v8992_v27  ;;  %v9067_v25 = vld [vmem:[#allocation8 + $0x418] ss:$20 sps:$4 sm:$0xff]   ;;  %v9070_v27 = vld [vmem:[#allocation8 + $0x5a8] ss:$20 sps:$4 sm:$0xff]  }
 0x162   :  { %1894 = vmatprep.mubr.bf16.mxu1 %v10388_v55  ;;  %1835 = vmatprep.subr.bf16.mxu0 %v8997_v29  ;;  %v9075_v29 = vld [vmem:[#allocation8 + $0x3f4] ss:$20 sps:$4 sm:$0xff]  }
 0x163   :  { %1864 = vmatprep.subr.bf16.mxu1 %v9000_v31  ;;  %v9078_v31 = vld [vmem:[#allocation8 + $0x584] ss:$20 sps:$4 sm:$0xff]  }
 0x165   :  { %1836 = vmatpush1.bf16.msra.mxu0 %v8995_v32  ;;  %1865 = vmatpush1.bf16.msra.mxu1 %v8998_v33  ;;  %v9073_v32 = vld [vmem:[#allocation8 + $0x3f0] ss:$20 sps:$4 sm:$0xff]   ;;  %v9076_v33 = vld [vmem:[#allocation8 + $0x580] ss:$20 sps:$4 sm:$0xff]  }
 0x166   :  { %1837 = vmatprep.subr.bf16.mxu0 %v9003_v34  ;;  %1866 = vmatprep.subr.bf16.mxu1 %v9006_v35  ;;  %v9081_v34 = vld [vmem:[#allocation8 + $0x3cc] ss:$20 sps:$4 sm:$0xff]   ;;  %v9084_v35 = vld [vmem:[#allocation8 + $0x55c] ss:$20 sps:$4 sm:$0xff]  }
 0x169   :  { %1838 = vmatpush2.bf16.msra.mxu0 %v9001_v36  ;;  %1867 = vmatpush1.bf16.msra.mxu1 %v9004_v37  ;;  %v9079_v36 = vld [vmem:[#allocation8 + $0x3c8] ss:$20 sps:$4 sm:$0xff]   ;;  %v9082_v37 = vld [vmem:[#allocation8 + $0x558] ss:$20 sps:$4 sm:$0xff]  }
 0x16a   :  { %1839 = vmatprep.subr.bf16.mxu0 %v9009_v39  ;;  %1868 = vmatprep.subr.bf16.mxu1 %v9012_v41  ;;  %v9087_v39 = vld [vmem:[#allocation8 + $0x534] ss:$20 sps:$4 sm:$0xff]  }
 0x16b   :  { %v9088_v41 = vld [vmem:[#allocation8 + $0x268] ss:$20 sps:$4 sm:$0xff]  }
 0x16d   :  { %1840 = vmatpush2.bf16.msra.mxu0 %v9007_v42  ;;  %1869 = vmatpush1.bf16.msra.mxu1 %v9010_v43  ;;  %v9085_v42 = vld [vmem:[#allocation8 + $0x530] ss:$20 sps:$4 sm:$0xff]   ;;  %v9089_v43 = vld [vmem:[#allocation8 + $0x128] ss:$20 sps:$4 sm:$0xff]  }
 0x16e   :  { %1841 = vmatprep.subr.bf16.mxu0 %v9015_v44  ;;  %1870 = vmatprep.subr.bf16.mxu1 %v9018_v45  ;;  %v9092_v44 = vld [vmem:[#allocation8 + $0x50c] ss:$20 sps:$4 sm:$0xff]  }
 0x16f   :  { %v9093_v45 = vld [vmem:[#allocation8 + $0x240] ss:$20 sps:$4 sm:$0xff]  }
 0x171   :  { %1842 = vmatpush2.bf16.msra.mxu0 %v9013_v46  ;;  %1871 = vmatpush1.bf16.msra.mxu1 %v9016_v47  ;;  %v9090_v46 = vld [vmem:[#allocation8 + $0x508] ss:$20 sps:$4 sm:$0xff]   ;;  %v9094_v47 = vld [vmem:[#allocation8 + $0x100] ss:$20 sps:$4 sm:$0xff]  }
 0x172   :  { %1843 = vmatprep.subr.bf16.mxu0 %v9021_v48  ;;  %1872 = vmatprep.subr.bf16.mxu1 %v9024_v49  ;;  %v9095_v48 = vld [vmem:[#allocation8 + $0x218] ss:$20 sps:$4 sm:$0xff]   ;;  %v9096_v49 = vld [vmem:[#allocation8 + $0x4e8] ss:$20 sps:$4 sm:$0xff]  }
 0x175   :  { %1844 = vmatpush2.bf16.msra.mxu0 %v9019_v50  ;;  %1873 = vmatpush1.bf16.msra.mxu1 %v9022_v51  ;;  %v9097_v50 = vld [vmem:[#allocation8 + $0xd8] ss:$20 sps:$4 sm:$0xff]   ;;  %v9098_v51 = vld [vmem:[#allocation8 + $0x3a8] ss:$20 sps:$4 sm:$0xff]  }
 0x176   :  { %1845 = vmatprep.subr.bf16.mxu0 %v9027_v53  ;;  %1874 = vmatprep.subr.bf16.mxu1 %v9030_v54  ;;  %v9099_v53 = vld [vmem:[#allocation8 + $0x1f0] ss:$20 sps:$4 sm:$0xff]   ;;  %v9100_v54 = vld [vmem:[#allocation8 + $0x4c0] ss:$20 sps:$4 sm:$0xff]  }
 0x179   :  { %1846 = vmatpush2.bf16.msra.mxu0 %v9025_v56  ;;  %1875 = vmatpush1.bf16.msra.mxu1 %v9028_v57  ;;  %v9101_v56 = vld [vmem:[#allocation8 + $0xb0] ss:$20 sps:$4 sm:$0xff]   ;;  %v9102_v57 = vld [vmem:[#allocation8 + $0x380] ss:$20 sps:$4 sm:$0xff]  }
 0x17a   :  { %1847 = vmatprep.subr.bf16.mxu0 %v9033_v58  ;;  %1876 = vmatprep.subr.bf16.mxu1 %v9036_v59  ;;  %v9104_v58 = vld [vmem:[#allocation8 + $0x498] ss:$20 sps:$4 sm:$0xff]   ;;  %v9105_v59 = vld [vmem:[#allocation8 + $0x88] ss:$20 sps:$4 sm:$0xff]  }
 0x17d   :  { %1848 = vmatpush2.bf16.msra.mxu0 %v9031_v60  ;;  %1877 = vmatpush1.bf16.msra.mxu1 %v9034_v61  ;;  %v9106_v60 = vld [vmem:[#allocation8 + $0x358] ss:$20 sps:$4 sm:$0xff]   ;;  %v9107_v61 = vld [vmem:[#allocation8 + $0x1a0] ss:$20 sps:$4 sm:$0xff]  }
 0x17e   :  { %1849 = vmatprep.subr.bf16.mxu0 %v9039_v62  ;;  %1878 = vmatprep.subr.bf16.mxu1 %v9042_v1  ;;  %v9108_v62 = vld [vmem:[#allocation8 + $0x470] ss:$20 sps:$4 sm:$0xff]   ;;  %v9109_v1 = vld [vmem:[#allocation8 + $0x60] ss:$20 sps:$4 sm:$0xff]  }
 0x181   :  { %1850 = vmatpush2.bf16.msra.mxu0 %v9037_v2  ;;  %1879 = vmatpush2.bf16.msra.mxu1 %v9040_v3  ;;  %v9110_v2 = vld [vmem:[#allocation8 + $0x330] ss:$20 sps:$4 sm:$0xff]   ;;  %v9111_v3 = vld [vmem:[#allocation8 + $0x178] ss:$20 sps:$4 sm:$0xff]  }
 0x182   :  { %1851 = vmatprep.subr.bf16.mxu0 %v9045_v4  ;;  %1880 = vmatprep.subr.bf16.mxu1 %v9048_v5  ;;  %v9112_v4 = vld [vmem:[#allocation8 + $0x448] ss:$20 sps:$4 sm:$0xff]  }
 0x183   :  { %v9114_v5 = vld [vmem:[#allocation8 + $0x308] ss:$20 sps:$4 sm:$0xff]  }
 0x185   :  { %1852 = vmatpush2.bf16.msra.mxu0 %v9043_v6  ;;  %1881 = vmatpush2.bf16.msra.mxu1 %v9046_v7  ;;  %v9115_v6 = vld [vmem:[#allocation8 + $0x150] ss:$20 sps:$4 sm:$0xff]   ;;  %v9116_v7 = vld [vmem:[#allocation8 + $0x420] ss:$20 sps:$4 sm:$0xff]  }
 0x186   :  { %1882 = vmatprep.subr.bf16.mxu1 %v9051_v8  ;;  %1903 = vmatprep.subr.bf16.mxu0 %v9054_v9  ;;  %v9117_v8 = vld [vmem:[#allocation8 + $0x10] ss:$20 sps:$4 sm:$0xff]   ;;  %v9118_v9 = vld [vmem:[#allocation8 + $0x2e0] ss:$20 sps:$4 sm:$0xff]  }
 0x188   :  { %1854 = vmatmul.mubr.bf16.vlgmr.msra.gmra.mxu0 %v10381_v40 }
 0x189   :  { %1883 = vmatpush2.bf16.msra.mxu1 %v9049_v10  ;;  %1904 = vmatpush1.bf16.msra.mxu0 %v9052_v11  ;;  %v9119_v10 = vld [vmem:[#allocation8 + $0x3f8] ss:$20 sps:$4 sm:$0xff]  }
 0x18a   :  { %1884 = vmatprep.subr.bf16.mxu1 %v9057_v12  ;;  %1905 = vmatprep.subr.bf16.mxu0 %v9060_v13  ;;  %v9120_v11 = vld [vmem:[#allocation8 + $0x2b8] ss:$20 sps:$4 sm:$0xff]   ;;  %v9121_v12 = vld [vmem:[#allocation8 + $0x628] ss:$20 sps:$4 sm:$0xff]   ;;  %v9122_v13 = vld [vmem:[#allocation8 + $0x3d0] ss:$20 sps:$4 sm:$0xff]  }
 0x18b   :  { %1935 = vmatprep.mubr.bf16.mxu0 %v10236_v0 }
 0x18d   :  { %1885 = vmatpush2.bf16.msra.mxu1 %v9055_v14  ;;  %1906 = vmatpush1.bf16.msra.mxu0 %v9058_v15  ;;  %v9123_v14 = vld [vmem:[#allocation8 + $0x290] ss:$20 sps:$4 sm:$0xff]   ;;  %v9124_v15 = vld [vmem:[#allocation8 + $0x600] ss:$20 sps:$4 sm:$0xff]  }
 0x18e   :  { %1886 = vmatprep.subr.bf16.mxu1 %v9063_v16  ;;  %1907 = vmatprep.subr.bf16.mxu0 %v9066_v18  ;;  %v9133_v16 = vld [vmem:[#allocation10 + $0x11c] ss:$20 sps:$4 sm:$0xff]   ;;  %v9125_v18 = vld [vmem:[#allocation8 + $0x5d8] ss:$20 sps:$4 sm:$0xff]  }
 0x191   :  { %1887 = vmatpush2.bf16.msra.mxu1 %v9061_v19  ;;  %1908 = vmatpush1.bf16.msra.mxu0 %v9064_v23  ;;  %v9131_v19 = vld [vmem:[#allocation10 + $0x118] ss:$20 sps:$4 sm:$0xff]   ;;  %v9136_v23 = vld [vmem:[#allocation10 + $0xf4] ss:$20 sps:$4 sm:$0xff]  }
 0x192   :  { %1888 = vmatprep.subr.bf16.mxu1 %v9069_v24  ;;  %1909 = vmatprep.subr.bf16.mxu0 %v9072_v21  ;;  %v9126_v24 = vld [vmem:[#allocation8 + $0x5b0] ss:$20 sps:$4 sm:$0xff]   ;;  %v9139_v21 = vld [vmem:[#allocation10 + $0xcc] ss:$20 sps:$4 sm:$0xff]  }
 0x195   :  { %1889 = vmatpush2.bf16.msra.mxu1 %v9067_v25  ;;  %1910 = vmatpush1.bf16.msra.mxu0 %v9070_v27  ;;  %v9127_v25 = vld [vmem:[#allocation8 + $0x588] ss:$20 sps:$4 sm:$0xff]  }
 0x196   :  { %1890 = vmatprep.subr.bf16.mxu1 %v9075_v29  ;;  %1911 = vmatprep.subr.bf16.mxu0 %v9078_v31  ;;  %v9137_v27 = vld [vmem:[#allocation10 + $0xc8] ss:$20 sps:$4 sm:$0xff]   ;;  %v9142_v29 = vld [vmem:[#allocation10 + $0xa4] ss:$20 sps:$4 sm:$0xff]   ;;  %v9128_v31 = vld [vmem:[#allocation8 + $0x560] ss:$20 sps:$4 sm:$0xff]  }
 0x199   :  { %1891 = vmatpush2.bf16.msra.mxu1 %v9073_v32  ;;  %1912 = vmatpush1.bf16.msra.mxu0 %v9076_v33  ;;  %v9140_v32 = vld [vmem:[#allocation10 + $0xa0] ss:$20 sps:$4 sm:$0xff]   ;;  %v9145_v33 = vld [vmem:[#allocation10 + $0x7c] ss:$20 sps:$4 sm:$0xff]  }
 0x19a   :  { %1892 = vmatprep.subr.bf16.mxu1 %v9081_v34  ;;  %1913 = vmatprep.subr.bf16.mxu0 %v9084_v35  ;;  %v9143_v34 = vld [vmem:[#allocation10 + $0x78] ss:$20 sps:$4 sm:$0xff]   ;;  %v9148_v35 = vld [vmem:[#allocation10 + $0x54] ss:$20 sps:$4 sm:$0xff]  }
 0x19d   :  { %1893 = vmatpush2.bf16.msra.mxu1 %v9079_v36  ;;  %1914 = vmatpush1.bf16.msra.mxu0 %v9082_v37  ;;  %v9130_v36 = vld [vmem:[#allocation8 + $0x510] ss:$20 sps:$4 sm:$0xff]  }
 0x19e   :  { %1915 = vmatprep.subr.bf16.mxu0 %v9087_v39  ;;  %8447 = vmatprep.subr.bf16.mxu1 %v9088_v41  ;;  %v9146_v37 = vld [vmem:[#allocation10 + $0x50] ss:$20 sps:$4 sm:$0xff]   ;;  %v9151_v39 = vld [vmem:[#allocation10 + $0x2c] ss:$20 sps:$4 sm:$0xff]  }
 0x19f   :  { %v9181_v41 = vld [vmem:[#allocation10 + $0x39c] ss:$20 sps:$4 sm:$0xff]  }
 0x1a0   :  { %1895 = vmatmul.mubr.bf16.vlgmr.msra.gmra.mxu1 %v10386_v52 }
 0x1a1   :  { %1916 = vmatpush1.bf16.msra.mxu0 %v9085_v42  ;;  %8448 = vmatpush3.bf16.msra.mxu1 %v9089_v43  ;;  %v9149_v42 = vld [vmem:[#allocation10 + $0x28] ss:$20 sps:$4 sm:$0xff]   ;;  %v9179_v43 = vld [vmem:[#allocation10 + $0x398] ss:$20 sps:$4 sm:$0xff]  }
 0x1a2   :  { %1976 = vmatprep.mubr.bf16.mxu1 %v10377_v38  ;;  %1917 = vmatprep.subr.bf16.mxu0 %v9092_v44  ;;  %v9103_v38 = vld [vmem:[#allocation8 + $0x1c8] ss:$20 sps:$4 sm:$0xff]   ;;  %v9154_v44 = vld [vmem:[#allocation10 + $0x4] ss:$20 sps:$4 sm:$0xff]  }
 0x1a3   :  { %8449 = vmatprep.subr.bf16.mxu1 %v9093_v45  ;;  %v9184_v45 = vld [vmem:[#allocation10 + $0x374] ss:$20 sps:$4 sm:$0xff]  }
 0x1a5   :  { %1918 = vmatpush1.bf16.msra.mxu0 %v9090_v46  ;;  %8450 = vmatpush3.bf16.msra.mxu1 %v9094_v47  ;;  %v9152_v46 = vld [vmem:[#allocation10] ss:$20 sps:$4 sm:$0xff]   ;;  %v9157_v47 = vld [vmem:[#allocation10 + $0x25c] ss:$20 sps:$4 sm:$0xff]  }
 0x1a6   :  { %8451 = vmatprep.subr.bf16.mxu1 %v9095_v48  ;;  %8469 = vmatprep.subr.bf16.mxu0 %v9096_v49  ;;  %v9182_v48 = vld [vmem:[#allocation10 + $0x370] ss:$20 sps:$4 sm:$0xff]   ;;  %v9187_v49 = vld [vmem:[#allocation10 + $0x34c] ss:$20 sps:$4 sm:$0xff]  }
 0x1a8   :  { %1936 = vmatmul.mubr.bf16.vlgmr.msra.gmra.mxu0 %v10397_v28 }
 0x1a9   :  { %8452 = vmatpush3.bf16.msra.mxu1 %v9097_v50  ;;  %8470 = vmatpush3.bf16.msra.mxu0 %v9098_v51  ;;  %v9155_v50 = vld [vmem:[#allocation10 + $0x258] ss:$20 sps:$4 sm:$0xff]   ;;  %v9160_v51 = vld [vmem:[#allocation10 + $0x234] ss:$20 sps:$4 sm:$0xff]  }
 0x1aa   :  { %2016 = vmatprep.mubr.bf16.mxu0 %v10388_v55  ;;  %8453 = vmatprep.subr.bf16.mxu1 %v9099_v53  ;;  %v9113_v55 = vld [vmem:[#allocation8 + $0x38] ss:$20 sps:$4 sm:$0xff]   ;;  %v9185_v53 = vld [vmem:[#allocation10 + $0x348] ss:$20 sps:$4 sm:$0xff]  }
 0x1ab   :  { %8471 = vmatprep.subr.bf16.mxu0 %v9100_v54  ;;  %v9190_v54 = vld [vmem:[#allocation10 + $0x324] ss:$20 sps:$4 sm:$0xff]  }
 0x1ad   :  { %8454 = vmatpush3.bf16.msra.mxu1 %v9101_v56  ;;  %8472 = vmatpush3.bf16.msra.mxu0 %v9102_v57  ;;  %v9158_v56 = vld [vmem:[#allocation10 + $0x230] ss:$20 sps:$4 sm:$0xff]   ;;  %v9163_v57 = vld [vmem:[#allocation10 + $0x20c] ss:$20 sps:$4 sm:$0xff]  }
 0x1ae   :  { %8455 = vmatprep.subr.bf16.mxu1 %v9103_v38  ;;  %8473 = vmatprep.subr.bf16.mxu0 %v9104_v58  ;;  %v9188_v38 = vld [vmem:[#allocation10 + $0x320] ss:$20 sps:$4 sm:$0xff]   ;;  %v9161_v58 = vld [vmem:[#allocation10 + $0x208] ss:$20 sps:$4 sm:$0xff]  }
 0x1b1   :  { %8456 = vmatpush3.bf16.msra.mxu1 %v9105_v59  ;;  %8474 = vmatpush3.bf16.msra.mxu0 %v9106_v60  ;;  %v9166_v59 = vld [vmem:[#allocation10 + $0x1e4] ss:$20 sps:$4 sm:$0xff]  }
 0x1b2   :  { %8457 = vmatprep.subr.bf16.mxu1 %v9107_v61  ;;  %8475 = vmatprep.subr.bf16.mxu0 %v9108_v62  ;;  %v9191_v60 = vld [vmem:[#allocation10 + $0x2f8] ss:$20 sps:$4 sm:$0xff]   ;;  %v9196_v61 = vld [vmem:[#allocation10 + $0x2d4] ss:$20 sps:$4 sm:$0xff]  }
 0x1b3   :  { %v9164_v62 = vld [vmem:[#allocation10 + $0x1e0] ss:$20 sps:$4 sm:$0xff]  }
 0x1b5   :  { %8458 = vmatpush3.bf16.msra.mxu1 %v9109_v1  ;;  %8476 = vmatpush3.bf16.msra.mxu0 %v9110_v2  ;;  %v9169_v1 = vld [vmem:[#allocation10 + $0x1bc] ss:$20 sps:$4 sm:$0xff]  }
 0x1b6   :  { %8459 = vmatprep.subr.bf16.mxu1 %v9111_v3  ;;  %8477 = vmatprep.subr.bf16.mxu0 %v9112_v4  ;;  %v9194_v2 = vld [vmem:[#allocation10 + $0x2d0] ss:$20 sps:$4 sm:$0xff]   ;;  %v9199_v3 = vld [vmem:[#allocation10 + $0x2ac] ss:$20 sps:$4 sm:$0xff]  }
 0x1b7   :  { %v9167_v4 = vld [vmem:[#allocation10 + $0x1b8] ss:$20 sps:$4 sm:$0xff]  }
 0x1b9   :  { %8460 = vmatpush3.bf16.msra.mxu1 %v9113_v55  ;;  %8478 = vmatpush3.bf16.msra.mxu0 %v9114_v5  ;;  %v9197_v55 = vld [vmem:[#allocation10 + $0x2a8] ss:$20 sps:$4 sm:$0xff]  }
 0x1ba   :  { %8461 = vmatprep.subr.bf16.mxu1 %v9115_v6  ;;  %8479 = vmatprep.subr.bf16.mxu0 %v9116_v7  ;;  %v9172_v5 = vld [vmem:[#allocation10 + $0x194] ss:$20 sps:$4 sm:$0xff]   ;;  %v9202_v6 = vld [vmem:[#allocation10 + $0x284] ss:$20 sps:$4 sm:$0xff]  }
 0x1bb   :  { %v9170_v7 = vld [vmem:[#allocation10 + $0x190] ss:$20 sps:$4 sm:$0xff]  }
 0x1bd   :  { %8462 = vmatpush3.bf16.msra.mxu1 %v9117_v8  ;;  %8480 = vmatpush3.bf16.msra.mxu0 %v9118_v9  ;;  %v9200_v8 = vld [vmem:[#allocation10 + $0x280] ss:$20 sps:$4 sm:$0xff]  }
 0x1be   :  { %8481 = vmatprep.subr.bf16.mxu0 %v9119_v10  ;;  %8720 = vmatprep.subr.bf16.mxu1 %v10237_v17  ;;  %v9175_v9 = vld [vmem:[#allocation10 + $0x16c] ss:$20 sps:$4 sm:$0xff]   ;;  %v9205_v10 = vld [vmem:[#allocation10 + $0x4dc] ss:$20 sps:$4 sm:$0xff]  }
 0x1c0   :  { %1977 = vmatmul.mubr.bf16.vlgmr.msra.gmra.mxu1 %v10381_v40  ;;  %v9134_v40 = vld [vmem:[#allocation10 + $0xf0] ss:$20 sps:$4 sm:$0xff]  }
 0x1c1   :  { %8482 = vmatpush3.bf16.msra.mxu0 %v9120_v11  ;;  %8721 = vmatpush3.bf16.msra.mxu1 %v9121_v12  ;;  %v9173_v11 = vld [vmem:[#allocation10 + $0x168] ss:$20 sps:$4 sm:$0xff]   ;;  %v9203_v12 = vld [vmem:[#allocation10 + $0x4d8] ss:$20 sps:$4 sm:$0xff]  }
 0x1c2   :  { %8483 = vmatprep.subr.bf16.mxu0 %v9122_v13  ;;  %8722 = vmatprep.subr.bf16.mxu1 %v10237_v17  ;;  %v9178_v13 = vld [vmem:[#allocation10 + $0x144] ss:$20 sps:$4 sm:$0xff]  }
 0x1c3   :  { %8736 = vmatprep.mubr.msk.bf16.mxu1 %vm10238_vm1, %v10237_v17 }
 0x1c5   :  { %8484 = vmatpush3.bf16.msra.mxu0 %v9123_v14  ;;  %8723 = vmatpush3.bf16.msra.mxu1 %v9124_v15  ;;  %v9208_v14 = vld [vmem:[#allocation10 + $0x4b4] ss:$20 sps:$4 sm:$0xff]  }
 0x1c6   :  { %8724 = vmatprep.subr.bf16.mxu1 %v10237_v17  ;;  %3381 = vmatprep.subr.bf16.mxu0 %v9133_v16  ;;  %v9176_v15 = vld [vmem:[#allocation10 + $0x140] ss:$20 sps:$4 sm:$0xff]  }
 0x1c8   :  { %2017 = vmatmul.mubr.bf16.vlgmr.msra.gmra.mxu0 %v10386_v52  ;;  %v9129_v52 = vld [vmem:[#allocation8 + $0x538] ss:$20 sps:$4 sm:$0xff]  }
 0x1c9   :  { %8725 = vmatpush3.bf16.msra.mxu1 %v9125_v18  ;;  %3382 = vmatpush1.bf16.msra.mxu0 %v9131_v19  ;;  %v9206_v18 = vld [vmem:[#allocation10 + $0x4b0] ss:$20 sps:$4 sm:$0xff]   ;;  %v9211_v19 = vld [vmem:[#allocation10 + $0x48c] ss:$20 sps:$4 sm:$0xff]  }
 0x1ca   :  { %8726 = vmatprep.subr.bf16.mxu1 %v10237_v17  ;;  %3383 = vmatprep.subr.bf16.mxu0 %v9136_v23 }
 0x1cd   :  { %8727 = vmatpush3.bf16.msra.mxu1 %v9126_v24  ;;  %3384 = vmatpush1.bf16.msra.mxu0 %v9134_v40  ;;  %v9209_v40 = vld [vmem:[#allocation10 + $0x488] ss:$20 sps:$4 sm:$0xff]  }
 0x1ce   :  { %8728 = vmatprep.subr.bf16.mxu1 %v10237_v17  ;;  %3385 = vmatprep.subr.bf16.mxu0 %v9139_v21  ;;  %v9247_v21 = vld [vmem:[#allocation10 + $0x61c] ss:$20 sps:$4 sm:$0xff]  }
 0x1d1   :  { %8729 = vmatpush3.bf16.msra.mxu1 %v9127_v25  ;;  %3386 = vmatpush1.bf16.msra.mxu0 %v9137_v27  ;;  %v9214_v27 = vld [vmem:[#allocation10 + $0x464] ss:$20 sps:$4 sm:$0xff]  }
 0x1d2   :  { %8730 = vmatprep.subr.bf16.mxu1 %v10237_v17  ;;  %3387 = vmatprep.subr.bf16.mxu0 %v9142_v29 }
 0x1d5   :  { %8731 = vmatpush3.bf16.msra.mxu1 %v9128_v31  ;;  %3388 = vmatpush1.bf16.msra.mxu0 %v9140_v32  ;;  %v9212_v31 = vld [vmem:[#allocation10 + $0x460] ss:$20 sps:$4 sm:$0xff]  }
 0x1d6   :  { %8732 = vmatprep.subr.bf16.mxu1 %v10237_v17  ;;  %3389 = vmatprep.subr.bf16.mxu0 %v9145_v33  ;;  %v9217_v33 = vld [vmem:[#allocation10 + $0x43c] ss:$20 sps:$4 sm:$0xff]  }
 0x1d9   :  { %8733 = vmatpush3.bf16.msra.mxu1 %v9129_v52  ;;  %3390 = vmatpush1.bf16.msra.mxu0 %v9143_v34  ;;  %v9215_v34 = vld [vmem:[#allocation10 + $0x438] ss:$20 sps:$4 sm:$0xff]  }
 0x1da   :  { %8734 = vmatprep.subr.bf16.mxu1 %v10237_v17  ;;  %3391 = vmatprep.subr.bf16.mxu0 %v9148_v35 }
 0x1dd   :  { %8735 = vmatpush3.bf16.msra.mxu1 %v9130_v36  ;;  %3392 = vmatpush1.bf16.msra.mxu0 %v9146_v37  ;;  %v9220_v36 = vld [vmem:[#allocation10 + $0x414] ss:$20 sps:$4 sm:$0xff]   ;;  %v9218_v37 = vld [vmem:[#allocation10 + $0x410] ss:$20 sps:$4 sm:$0xff]  }
 0x1de   :  { %3393 = vmatprep.subr.bf16.mxu0 %v9151_v39  ;;  %3422 = vmatprep.subr.bf16.mxu1 %v9181_v41  ;;  %v9223_v39 = vld [vmem:[#allocation10 + $0x3ec] ss:$20 sps:$4 sm:$0xff]  }
 0x1df   :  { %v10423_v41 = vld [vmem:[%s10638_s4] sm:$0x1f] }
 0x1e0   :  { %8737 = vmatmul.mubr.bf16.vlgmr.msra.gmra.mxu1 %v10397_v28  ;;  %v9193_v28 = vld [vmem:[#allocation10 + $0x2fc] ss:$20 sps:$4 sm:$0xff]  }
 0x1e1   :  { %3394 = vmatpush1.bf16.msra.mxu0 %v9149_v42  ;;  %3423 = vmatpush1.bf16.msra.mxu1 %v9179_v43  ;;  %v9221_v42 = vld [vmem:[#allocation10 + $0x3e8] ss:$20 sps:$4 sm:$0xff]   ;;  %v9226_v43 = vld [vmem:[#allocation10 + $0x3c4] ss:$20 sps:$4 sm:$0xff]  }
 0x1e2   :  { %3395 = vmatprep.subr.bf16.mxu0 %v9154_v44  ;;  %3424 = vmatprep.subr.bf16.mxu1 %v9184_v45  ;;  %v9224_v44 = vld [vmem:[#allocation10 + $0x3c0] ss:$20 sps:$4 sm:$0xff]   ;;  %v9229_v45 = vld [vmem:[#allocation10 + $0x124] ss:$20 sps:$4 sm:$0xff]  }
 0x1e5   :  { %3396 = vmatpush1.bf16.msra.mxu0 %v9152_v46  ;;  %3425 = vmatpush1.bf16.msra.mxu1 %v9182_v48  ;;  %v636_v46 = vrot.slane %v10423_v41, %v10361_v20 }
 0x1e6   :  { %3397 = vmatprep.subr.bf16.mxu0 %v9157_v47  ;;  %3426 = vmatprep.subr.bf16.mxu1 %v9187_v49  ;;  %v640_v47 = vrot.slane %v10423_v41, %v10365_v22 }
 0x1e9   :  { %3398 = vmatpush2.bf16.msra.mxu0 %v9155_v50  ;;  %3427 = vmatpush1.bf16.msra.mxu1 %v9185_v53 }
 0x1ea   :  { %3399 = vmatprep.subr.bf16.mxu0 %v9160_v51  ;;  %3428 = vmatprep.subr.bf16.mxu1 %v9190_v54 }
 0x1ed   :  { %3400 = vmatpush2.bf16.msra.mxu0 %v9158_v56  ;;  %3429 = vmatpush1.bf16.msra.mxu1 %v9188_v38 }
 0x1ee   :  { %3401 = vmatprep.subr.bf16.mxu0 %v9163_v57  ;;  %3430 = vmatprep.subr.bf16.mxu1 %v9193_v28 }
 0x1f1   :  { %3402 = vmatpush2.bf16.msra.mxu0 %v9161_v58  ;;  %3431 = vmatpush1.bf16.msra.mxu1 %v9191_v60  ;;  %v9245_v60 = vld [vmem:[#allocation10 + $0x618] ss:$20 sps:$4 sm:$0xff]  }
 0x1f2   :  { %3403 = vmatprep.subr.bf16.mxu0 %v9166_v59  ;;  %3432 = vmatprep.subr.bf16.mxu1 %v9196_v61 }
 0x1f5   :  { %3404 = vmatpush2.bf16.msra.mxu0 %v9164_v62  ;;  %3433 = vmatpush1.bf16.msra.mxu1 %v9194_v2  ;;  %v9251_v2 = vld [vmem:[#allocation10 + $0x5f0] ss:$20 sps:$4 sm:$0xff]  }
 0x1f6   :  { %3405 = vmatprep.subr.bf16.mxu0 %v9169_v1  ;;  %3434 = vmatprep.subr.bf16.mxu1 %v9199_v3  ;;  %v9253_v1 = vld [vmem:[#allocation10 + $0x5f4] ss:$20 sps:$4 sm:$0xff]   ;;  %v9259_v3 = vld [vmem:[#allocation10 + $0x5cc] ss:$20 sps:$4 sm:$0xff]  }
 0x1f9   :  { %3406 = vmatpush2.bf16.msra.mxu0 %v9167_v4  ;;  %3435 = vmatpush1.bf16.msra.mxu1 %v9197_v55  ;;  %v9257_v4 = vld [vmem:[#allocation10 + $0x5c8] ss:$20 sps:$4 sm:$0xff]   ;;  %v9265_v55 = vld [vmem:[#allocation10 + $0x5a4] ss:$20 sps:$4 sm:$0xff]  }
 0x1fa   :  { %3407 = vmatprep.subr.bf16.mxu0 %v9172_v5  ;;  %3436 = vmatprep.subr.bf16.mxu1 %v9202_v6  ;;  %v9263_v5 = vld [vmem:[#allocation10 + $0x5a0] ss:$20 sps:$4 sm:$0xff]   ;;  %v9271_v6 = vld [vmem:[#allocation10 + $0x57c] ss:$20 sps:$4 sm:$0xff]  }
 0x1fd   :  { %3408 = vmatpush2.bf16.msra.mxu0 %v9170_v7  ;;  %3437 = vmatpush1.bf16.msra.mxu1 %v9200_v8  ;;  %v9269_v7 = vld [vmem:[#allocation10 + $0x578] ss:$20 sps:$4 sm:$0xff]   ;;  %v9277_v8 = vld [vmem:[#allocation10 + $0x554] ss:$20 sps:$4 sm:$0xff]  }
 0x1fe   :  { %3409 = vmatprep.subr.bf16.mxu0 %v9175_v9  ;;  %3438 = vmatprep.subr.bf16.mxu1 %v9205_v10  ;;  %v9275_v9 = vld [vmem:[#allocation10 + $0x550] ss:$20 sps:$4 sm:$0xff]   ;;  %v9283_v10 = vld [vmem:[#allocation10 + $0x52c] ss:$20 sps:$4 sm:$0xff]  }
 0x200   :  { %v1732_v16 = vpop.f32.mrf.mxu1 }
 0x201   :  { %3410 = vmatpush2.bf16.msra.mxu0 %v9173_v11  ;;  %3439 = vmatpush2.bf16.msra.mxu1 %v9203_v12  ;;  %v1733_v48 = vadd.f32 %v1732_v16, %v636_v46  ;;  %v9281_v11 = vld [vmem:[#allocation10 + $0x528] ss:$20 sps:$4 sm:$0xff]   ;;  %v9289_v12 = vld [vmem:[#allocation10 + $0x504] ss:$20 sps:$4 sm:$0xff]  }
 0x202   :  { %v1734_v23 = vpop.f32.mrf.mxu1  ;;  %3411 = vmatprep.subr.bf16.mxu0 %v9178_v13  ;;  %3440 = vmatprep.subr.bf16.mxu1 %v9208_v14  ;;  %v9287_v13 = vld [vmem:[#allocation10 + $0x500] ss:$20 sps:$4 sm:$0xff]   ;;  %v9295_v14 = vld [vmem:[#allocation10 + $0x3a4] ss:$20 sps:$4 sm:$0xff]  }
 0x203   :  { %v1735_v49 = vadd.f32 %v1734_v23, %v640_v47  ;;  %v9232_v47 = vld [vmem:[#allocation10 + $0xfc] ss:$20 sps:$4 sm:$0xff]  }
 0x204   :  { %v1736_v24 = vpop.f32.mrf.mxu1 }
 0x205   :  { %3412 = vmatpush2.bf16.msra.mxu0 %v9176_v15  ;;  %3441 = vmatpush2.bf16.msra.mxu1 %v9206_v18  ;;  %v644_v24 = vrot.slane %v10423_v41, %v10371_v26 }
 0x206   :  { %v1737_v25 = vpop.f32.mrf.mxu1  ;;  %3442 = vmatprep.subr.bf16.mxu1 %v9211_v19  ;;  %3463 = vmatprep.subr.bf16.mxu0 %v9247_v21  ;;  %v648_v21 = vrot.slane %v10423_v41, %v10373_v30 }
 0x208   :  { %v1773_v29 = vpop.f32.mrf.mxu0 }
 0x209   :  { %3443 = vmatpush2.bf16.msra.mxu1 %v9209_v40  ;;  %v1774_v50 = vadd.f32 %v1773_v29, %v1733_v48  ;;  %v9230_v48 = vld [vmem:[#allocation10 + $0xf8] ss:$20 sps:$4 sm:$0xff]  }
 0x20a   :  { %v1775_v32 = vpop.f32.mrf.mxu0  ;;  %3444 = vmatprep.subr.bf16.mxu1 %v9214_v27 }
 0x20b   :  { %v1776_v53 = vadd.f32 %v1775_v32, %v1735_v49  ;;  %v9235_v49 = vld [vmem:[#allocation10 + $0xd4] ss:$20 sps:$4 sm:$0xff]  }
 0x20c   :  { %v1777_v52 = vpop.f32.mrf.mxu0 }
 0x20d   :  { %3445 = vmatpush2.bf16.msra.mxu1 %v9212_v31 }
 0x20e   :  { %v1778_v35 = vpop.f32.mrf.mxu0  ;;  %3446 = vmatprep.subr.bf16.mxu1 %v9217_v33 }
 0x211   :  { %3447 = vmatpush2.bf16.msra.mxu1 %v9215_v34 }
 0x212   :  { %3448 = vmatprep.subr.bf16.mxu1 %v9220_v36 }
 0x215   :  { %3449 = vmatpush2.bf16.msra.mxu1 %v9218_v37 }
 0x216   :  { %3450 = vmatprep.subr.bf16.mxu1 %v9223_v39 }
 0x219   :  { %3451 = vmatpush2.bf16.msra.mxu1 %v9221_v42 }
 0x21a   :  { %3452 = vmatprep.subr.bf16.mxu1 %v9226_v43 }
 0x21d   :  { %3453 = vmatpush2.bf16.msra.mxu1 %v9224_v44 }
 0x21e   :  { %3504 = vmatprep.subr.bf16.mxu1 %v9229_v45  ;;  %v9227_v45 = vld [vmem:[#allocation10 + $0x120] ss:$20 sps:$4 sm:$0xff]  }
 0x220   :  { %v1814_v51 = vpop.f32.mrf.mxu1 }
 0x221   :  { %v1815_v54 = vadd.f32 %v1814_v51, %v1774_v50  ;;  %v9233_v50 = vld [vmem:[#allocation10 + $0xd0] ss:$20 sps:$4 sm:$0xff]   ;;  %v9238_v51 = vld [vmem:[#allocation10 + $0xac] ss:$20 sps:$4 sm:$0xff]  }
 0x222   :  { %v1816_v56 = vpop.f32.mrf.mxu1 }
 0x223   :  { %v1817_v57 = vadd.f32 %v1816_v56, %v1776_v53  ;;  %v2064_v38 = vmax.f32 %v1815_v54, 0.0  ;;  %v9236_v53 = vld [vmem:[#allocation10 + $0xa8] ss:$20 sps:$4 sm:$0xff]   ;;  %v9241_v54 = vld [vmem:[#allocation10 + $0x84] ss:$20 sps:$4 sm:$0xff]  }
 0x224   :  { %v1818_v28 = vpop.f32.mrf.mxu1  ;;  %v9239_v56 = vld [vmem:[#allocation10 + $0x80] ss:$20 sps:$4 sm:$0xff]  }
 0x225   :  { %v2065_v58 = vmax.f32 %v1817_v57, 0.0  ;;  %v10431_v62 = vpack.c.bf16 %v2064_v38, %v2064_v38  ;;  %v9244_v38 = vld [vmem:[#allocation10 + $0x5c] ss:$20 sps:$4 sm:$0xff]  }
 0x226   :  { %v1819_v59 = vpop.f32.mrf.mxu1 }
 0x227   :  { %v10429_v61 = vpack.c.bf16 %v2065_v58, %v2065_v58  ;;  %v9242_v58 = vld [vmem:[#allocation10 + $0x58] ss:$20 sps:$4 sm:$0xff]  }
 0x229   :  { %3413 = vmatprep.mubr.bf16.mxu0 %v10429_v61 }
 0x22a   :  { %3414 = vmatmul.mubr.bf16.vlgmr.msra.gmra.mxu0 %v10431_v62 }
 0x22b   :  { %3464 = vmatpush1.bf16.msra.mxu0 %v9245_v60  ;;  %3495 = vmatprep.mubr.bf16.mxu0 %v10236_v0  ;;  %v9250_v60 = vld [vmem:[#allocation10 + $0x34] ss:$20 sps:$4 sm:$0xff]  }
 0x22c   :  { %3465 = vmatprep.subr.bf16.mxu0 %v9253_v1 }
 0x22f   :  { %3466 = vmatpush1.bf16.msra.mxu0 %v9251_v2  ;;  %v9248_v2 = vld [vmem:[#allocation10 + $0x30] ss:$20 sps:$4 sm:$0xff]  }
 0x230   :  { %3467 = vmatprep.subr.bf16.mxu0 %v9259_v3 }
 0x233   :  { %3468 = vmatpush1.bf16.msra.mxu0 %v9257_v4  ;;  %v9256_v4 = vld [vmem:[#allocation10 + $0xc] ss:$20 sps:$4 sm:$0xff]  }
 0x234   :  { %3469 = vmatprep.subr.bf16.mxu0 %v9265_v55 }
 0x237   :  { %3470 = vmatpush1.bf16.msra.mxu0 %v9263_v5  ;;  %v9254_v5 = vld [vmem:[#allocation10 + $0x8] ss:$20 sps:$4 sm:$0xff]  }
 0x238   :  { %3471 = vmatprep.subr.bf16.mxu0 %v9271_v6 }
 0x23b   :  { %3472 = vmatpush1.bf16.msra.mxu0 %v9269_v7  ;;  %v9262_v7 = vld [vmem:[#allocation10 + $0x264] ss:$20 sps:$4 sm:$0xff]  }
 0x23c   :  { %3473 = vmatprep.subr.bf16.mxu0 %v9277_v8 }
 0x23f   :  { %3474 = vmatpush1.bf16.msra.mxu0 %v9275_v9  ;;  %v9260_v9 = vld [vmem:[#allocation10 + $0x260] ss:$20 sps:$4 sm:$0xff]  }
 0x240   :  { %3475 = vmatprep.subr.bf16.mxu0 %v9283_v10  ;;  %v9268_v10 = vld [vmem:[#allocation10 + $0x23c] ss:$20 sps:$4 sm:$0xff]  }
 0x243   :  { %3476 = vmatpush1.bf16.msra.mxu0 %v9281_v11  ;;  %v9266_v11 = vld [vmem:[#allocation10 + $0x238] ss:$20 sps:$4 sm:$0xff]  }
 0x244   :  { %3477 = vmatprep.subr.bf16.mxu0 %v9289_v12  ;;  %v9274_v12 = vld [vmem:[#allocation10 + $0x214] ss:$20 sps:$4 sm:$0xff]  }
 0x247   :  { %3478 = vmatpush1.bf16.msra.mxu0 %v9287_v13  ;;  %v9272_v13 = vld [vmem:[#allocation10 + $0x210] ss:$20 sps:$4 sm:$0xff]  }
 0x248   :  { %v1855_v15 = vpop.f32.mrf.mxu0  ;;  %3545 = vmatprep.subr.bf16.mxu0 %v9295_v14  ;;  %v9280_v14 = vld [vmem:[#allocation10 + $0x1ec] ss:$20 sps:$4 sm:$0xff]  }
 0x249   :  { %v1856_v27 = vadd.f32 %v1855_v15, %v644_v24  ;;  %v652_v15 = vrot.slane %v10423_v41, %v10393_v63  ;;  %v9293_v41 = vld [vmem:[#allocation10 + $0x3a0] ss:$20 sps:$4 sm:$0xff]  }
 0x24a   :  { %v1857_v16 = vpop.f32.mrf.mxu0 }
 0x24b   :  { %v1858_v31 = vadd.f32 %v1857_v16, %v648_v21  ;;  %v9284_v21 = vld [vmem:[#allocation10 + $0x1c0] ss:$20 sps:$4 sm:$0xff]  }
 0x24c   :  { %v1859_v18 = vpop.f32.mrf.mxu0 }
 0x24e   :  { %v1860_v19 = vpop.f32.mrf.mxu0 }
 0x24f   :  { %v9278_v19 = vld [vmem:[#allocation10 + $0x1e8] ss:$20 sps:$4 sm:$0xff]  }
 0x260   :  { %v1896_v23 = vpop.f32.mrf.mxu1 }
 0x261   :  { %v1897_v32 = vadd.f32 %v1896_v23, %v1856_v27  ;;  %v9286_v23 = vld [vmem:[#allocation10 + $0x1c4] ss:$20 sps:$4 sm:$0xff]   ;;  %v9292_v27 = vld [vmem:[#allocation10 + $0x19c] ss:$20 sps:$4 sm:$0xff]  }
 0x262   :  { %v1898_v40 = vpop.f32.mrf.mxu1 }
 0x263   :  { %v1899_v52 = vadd.f32 %v1898_v40, %v1858_v31 }
 0x264   :  { %v1900_v25 = vpop.f32.mrf.mxu1 }
 0x266   :  { %v1901_v29 = vpop.f32.mrf.mxu1 }
 0x268   :  { %v1937_v33 = vpop.f32.mrf.mxu0 }
 0x269   :  { %v1938_v34 = vadd.f32 %v1937_v33, %v1897_v32  ;;  %v9290_v33 = vld [vmem:[#allocation10 + $0x198] ss:$20 sps:$4 sm:$0xff]  }
 0x26a   :  { %v1939_v35 = vpop.f32.mrf.mxu0 }
 0x26b   :  { %v1940_v36 = vadd.f32 %v1939_v35, %v1899_v52  ;;  %v2066_v37 = vmax.f32 %v1938_v34, 0.0  ;;  %v9298_v35 = vld [vmem:[#allocation10 + $0x174] ss:$20 sps:$4 sm:$0xff]  }
 0x26c   :  { %v1941_v39 = vpop.f32.mrf.mxu0 }
 0x26d   :  { %v2067_v42 = vmax.f32 %v1940_v36, 0.0  ;;  %v10442_v46 = vpack.c.bf16 %v2066_v37, %v2066_v37  ;;  %v9301_v36 = vld [vmem:[#allocation10 + $0x37c] ss:$20 sps:$4 sm:$0xff]  }
 0x26e   :  { %v1942_v43 = vpop.f32.mrf.mxu0  ;;  %v9296_v39 = vld [vmem:[#allocation10 + $0x170] ss:$20 sps:$4 sm:$0xff]  }
 0x26f   :  { %v10440_v44 = vpack.c.bf16 %v2067_v42, %v2067_v42  ;;  %v9299_v42 = vld [vmem:[#allocation10 + $0x378] ss:$20 sps:$4 sm:$0xff]  }
 0x270   :  { %v9304_v43 = vld [vmem:[#allocation10 + $0x14c] ss:$20 sps:$4 sm:$0xff]  }
 0x271   :  { %3454 = vmatprep.mubr.bf16.mxu1 %v10440_v44 }
 0x272   :  { %3455 = vmatmul.mubr.bf16.vlgmr.msra.gmra.mxu1 %v10442_v46 }
 0x273   :  { %3505 = vmatpush1.bf16.msra.mxu1 %v9227_v45  ;;  %3536 = vmatprep.mubr.bf16.mxu1 %v10429_v61  ;;  %v9307_v45 = vld [vmem:[#allocation10 + $0x354] ss:$20 sps:$4 sm:$0xff]  }
 0x274   :  { %3506 = vmatprep.subr.bf16.mxu1 %v9232_v47  ;;  %v9302_v47 = vld [vmem:[#allocation10 + $0x148] ss:$20 sps:$4 sm:$0xff]  }
 0x277   :  { %3507 = vmatpush1.bf16.msra.mxu1 %v9230_v48  ;;  %v9305_v48 = vld [vmem:[#allocation10 + $0x350] ss:$20 sps:$4 sm:$0xff]  }
 0x278   :  { %3508 = vmatprep.subr.bf16.mxu1 %v9235_v49  ;;  %v9310_v49 = vld [vmem:[#allocation10 + $0x624] ss:$20 sps:$4 sm:$0xff]  }
 0x27b   :  { %3509 = vmatpush1.bf16.msra.mxu1 %v9233_v50  ;;  %v9313_v50 = vld [vmem:[#allocation10 + $0x32c] ss:$20 sps:$4 sm:$0xff]  }
 0x27c   :  { %3510 = vmatprep.subr.bf16.mxu1 %v9238_v51  ;;  %v9308_v51 = vld [vmem:[#allocation10 + $0x620] ss:$20 sps:$4 sm:$0xff]  }
 0x27f   :  { %3511 = vmatpush1.bf16.msra.mxu1 %v9236_v53  ;;  %v9311_v53 = vld [vmem:[#allocation10 + $0x328] ss:$20 sps:$4 sm:$0xff]  }
 0x280   :  { %v8463_v57 = vpop.f32.mrf.mxu1  ;;  %3512 = vmatprep.subr.bf16.mxu1 %v9241_v54  ;;  %v9316_v54 = vld [vmem:[#allocation10 + $0x5fc] ss:$20 sps:$4 sm:$0xff]  }
 0x282   :  { %v8464_v28 = vpop.f32.mrf.mxu1 }
 0x283   :  { %3513 = vmatpush1.bf16.msra.mxu1 %v9239_v56  ;;  %v8465_v16 = vadd.f32 %v8464_v28, %v8463_v57  ;;  %v9319_v56 = vld [vmem:[#allocation10 + $0x304] ss:$20 sps:$4 sm:$0xff]   ;;  %v9322_v28 = vld [vmem:[#allocation10 + $0x5d4] ss:$20 sps:$4 sm:$0xff]  }
 0x284   :  { %v8466_v59 = vpop.f32.mrf.mxu1  ;;  %3514 = vmatprep.subr.bf16.mxu1 %v9244_v38  ;;  %v9314_v57 = vld [vmem:[#allocation10 + $0x5f8] ss:$20 sps:$4 sm:$0xff]   ;;  %v9317_v38 = vld [vmem:[#allocation10 + $0x300] ss:$20 sps:$4 sm:$0xff]  }
 0x285   :  { %v1979_v24 = vadd.f32 %v8465_v16, %v652_v15  ;;  %v9320_v59 = vld [vmem:[#allocation10 + $0x5d0] ss:$20 sps:$4 sm:$0xff]   ;;  %v9347_v15 = vld [vmem:[#allocation10 + $0x4b8] ss:$20 sps:$4 sm:$0xff]  }
 0x286   :  { %v8467_v1 = vpop.f32.mrf.mxu1  ;;  %v9352_v16 = vld [vmem:[#allocation10 + $0x50c] ss:$20 sps:$4 sm:$0xff]  }
 0x287   :  { %3515 = vmatpush1.bf16.msra.mxu1 %v9242_v58  ;;  %v9325_v58 = vld [vmem:[#allocation10 + $0x2dc] ss:$20 sps:$4 sm:$0xff]   ;;  %v9328_v1 = vld [vmem:[#allocation10 + $0x5ac] ss:$20 sps:$4 sm:$0xff]  }
 0x288   :  { %v8485_v3 = vpop.f32.mrf.mxu0  ;;  %3516 = vmatprep.subr.bf16.mxu1 %v9250_v60  ;;  %v9323_v60 = vld [vmem:[#allocation10 + $0x2d8] ss:$20 sps:$4 sm:$0xff]  }
 0x28a   :  { %v8486_v55 = vpop.f32.mrf.mxu0 }
 0x28b   :  { %3517 = vmatpush1.bf16.msra.mxu1 %v9248_v2  ;;  %v8487_v18 = vadd.f32 %v8486_v55, %v8485_v3  ;;  %v9331_v2 = vld [vmem:[#allocation10 + $0x2b4] ss:$20 sps:$4 sm:$0xff]   ;;  %v9334_v55 = vld [vmem:[#allocation10 + $0x584] ss:$20 sps:$4 sm:$0xff]  }
 0x28c   :  { %v8488_v6 = vpop.f32.mrf.mxu0  ;;  %3518 = vmatprep.subr.bf16.mxu1 %v9256_v4  ;;  %v9326_v3 = vld [vmem:[#allocation10 + $0x5a8] ss:$20 sps:$4 sm:$0xff]   ;;  %v9329_v4 = vld [vmem:[#allocation10 + $0x2b0] ss:$20 sps:$4 sm:$0xff]  }
 0x28d   :  { %v2019_v40 = vadd.f32 %v8487_v18, %v1979_v24  ;;  %v9332_v6 = vld [vmem:[#allocation10 + $0x580] ss:$20 sps:$4 sm:$0xff]   ;;  %v9356_v24 = vld [vmem:[#allocation10 + $0x4e8] ss:$20 sps:$4 sm:$0xff]  }
 0x28e   :  { %v8489_v8 = vpop.f32.mrf.mxu0  ;;  %v9355_v18 = vld [vmem:[#allocation10 + $0x494] ss:$20 sps:$4 sm:$0xff]  }
 0x28f   :  { %3519 = vmatpush1.bf16.msra.mxu1 %v9254_v5  ;;  %v9337_v5 = vld [vmem:[#allocation10 + $0x28c] ss:$20 sps:$4 sm:$0xff]   ;;  %v9340_v8 = vld [vmem:[#allocation10 + $0x55c] ss:$20 sps:$4 sm:$0xff]  }
 0x290   :  { %3520 = vmatprep.subr.bf16.mxu1 %v9262_v7  ;;  %v9335_v7 = vld [vmem:[#allocation10 + $0x288] ss:$20 sps:$4 sm:$0xff]  }
 0x293   :  { %3521 = vmatpush2.bf16.msra.mxu1 %v9260_v9  ;;  %v9343_v9 = vld [vmem:[#allocation10 + $0x4e4] ss:$20 sps:$4 sm:$0xff]  }
 0x294   :  { %3522 = vmatprep.subr.bf16.mxu1 %v9268_v10  ;;  %v9338_v10 = vld [vmem:[#allocation10 + $0x558] ss:$20 sps:$4 sm:$0xff]  }
 0x297   :  { %3523 = vmatpush2.bf16.msra.mxu1 %v9266_v11  ;;  %v9341_v11 = vld [vmem:[#allocation10 + $0x4e0] ss:$20 sps:$4 sm:$0xff]  }
 0x298   :  { %3524 = vmatprep.subr.bf16.mxu1 %v9274_v12  ;;  %v9346_v12 = vld [vmem:[#allocation10 + $0x534] ss:$20 sps:$4 sm:$0xff]  }
 0x29b   :  { %3525 = vmatpush2.bf16.msra.mxu1 %v9272_v13  ;;  %v9349_v13 = vld [vmem:[#allocation10 + $0x4bc] ss:$20 sps:$4 sm:$0xff]  }
 0x29c   :  { %3526 = vmatprep.subr.bf16.mxu1 %v9280_v14  ;;  %v9344_v14 = vld [vmem:[#allocation10 + $0x530] ss:$20 sps:$4 sm:$0xff]  }
 0x29f   :  { %3527 = vmatpush2.bf16.msra.mxu1 %v9278_v19  ;;  %v9350_v19 = vld [vmem:[#allocation10 + $0x508] ss:$20 sps:$4 sm:$0xff]  }
 0x2a0   :  { %v2058_v25 = vpop.f32.mrf.mxu1  ;;  %3528 = vmatprep.subr.bf16.mxu1 %v9286_v23  ;;  %v9353_v23 = vld [vmem:[#allocation10 + $0x490] ss:$20 sps:$4 sm:$0xff]  }
 0x2a1   :  { %v2059_v29 = vadd.f32 %v2058_v25, %v2019_v40  ;;  %v9359_v40 = vld [vmem:[#allocation10 + $0x46c] ss:$20 sps:$4 sm:$0xff]   ;;  %v9357_v25 = vld [vmem:[#allocation10 + $0x468] ss:$20 sps:$4 sm:$0xff]  }
 0x2a2   :  { %v8738_v31 = vpop.f32.mrf.mxu1 }
 0x2a3   :  { %v2068_v32 = vmax.f32 %v2059_v29, 0.0  ;;  %3529 = vmatpush2.bf16.msra.mxu1 %v9284_v21  ;;  %v9360_v21 = vld [vmem:[#allocation10 + $0x3a8] ss:$20 sps:$4 sm:$0xff]   ;;  %v9364_v29 = vld [vmem:[#allocation10 + $0x444] ss:$20 sps:$4 sm:$0xff]  }
 0x2a4   :  { %v2061_v52 = vpop.f32.mrf.mxu1  ;;  %3530 = vmatprep.subr.bf16.mxu1 %v9292_v27  ;;  %v9361_v27 = vld [vmem:[#allocation10 + $0x4c0] ss:$20 sps:$4 sm:$0xff]  }
 0x2a5   :  { %v10449_v34 = vpack.c.bf16 %v2068_v32, %v2068_v32  ;;  %v9365_v31 = vld [vmem:[#allocation10 + $0x380] ss:$20 sps:$4 sm:$0xff]   ;;  %v9369_v52 = vld [vmem:[#allocation10 + $0x41c] ss:$20 sps:$4 sm:$0xff]  }
 0x2a6   :  { %v8739_v37 = vpop.f32.mrf.mxu1  ;;  %v9362_v32 = vld [vmem:[#allocation10 + $0x440] ss:$20 sps:$4 sm:$0xff]  }
 0x2a7   :  { %3531 = vmatpush2.bf16.msra.mxu1 %v9290_v33  ;;  %3496 = vmatmul.mubr.bf16.vlgmr.msra.gmra.mxu0 %v10449_v34  ;;  %v9366_v33 = vld [vmem:[#allocation10 + $0x498] ss:$20 sps:$4 sm:$0xff]   ;;  %v9374_v37 = vld [vmem:[#allocation10 + $0x3f4] ss:$20 sps:$4 sm:$0xff]  }
 0x2a8   :  { %3546 = vmatpush1.bf16.msra.mxu0 %v9293_v41  ;;  %3577 = vmatprep.mubr.bf16.mxu0 %v10440_v44  ;;  %v9370_v41 = vld [vmem:[#allocation10 + $0x358] ss:$20 sps:$4 sm:$0xff]  }
 0x2a9   :  { %3532 = vmatprep.subr.bf16.mxu1 %v9298_v35  ;;  %3547 = vmatprep.subr.bf16.mxu0 %v9301_v36  ;;  %v9367_v35 = vld [vmem:[#allocation10 + $0x418] ss:$20 sps:$4 sm:$0xff]   ;;  %v9371_v36 = vld [vmem:[#allocation10 + $0x470] ss:$20 sps:$4 sm:$0xff]  }
 0x2ab   :  { %3533 = vmatpush2.bf16.msra.mxu1 %v9296_v39  ;;  %v9375_v39 = vld [vmem:[#allocation10 + $0x330] ss:$20 sps:$4 sm:$0xff]  }
 0x2ac   :  { %3548 = vmatpush1.bf16.msra.mxu0 %v9299_v42  ;;  %3534 = vmatprep.subr.bf16.mxu1 %v9304_v43  ;;  %v9376_v42 = vld [vmem:[#allocation10 + $0x448] ss:$20 sps:$4 sm:$0xff]   ;;  %v9379_v43 = vld [vmem:[#allocation10 + $0x3cc] ss:$20 sps:$4 sm:$0xff]  }
 0x2ad   :  { %3549 = vmatprep.subr.bf16.mxu0 %v9307_v45  ;;  %v9380_v45 = vld [vmem:[#allocation10 + $0x308] ss:$20 sps:$4 sm:$0xff]  }
 0x2af   :  { %3535 = vmatpush2.bf16.msra.mxu1 %v9302_v47  ;;  %v9377_v47 = vld [vmem:[#allocation10 + $0x3c8] ss:$20 sps:$4 sm:$0xff]  }
 0x2b0   :  { %3550 = vmatpush1.bf16.msra.mxu0 %v9305_v48  ;;  %3586 = vmatprep.subr.bf16.mxu1 %v9310_v49  ;;  %v9381_v48 = vld [vmem:[#allocation10 + $0x420] ss:$20 sps:$4 sm:$0xff]   ;;  %v9382_v49 = vld [vmem:[#allocation10 + $0x268] ss:$20 sps:$4 sm:$0xff]  }
 0x2b1   :  { %3551 = vmatprep.subr.bf16.mxu0 %v9313_v50  ;;  %v9383_v50 = vld [vmem:[#allocation10 + $0x2e0] ss:$20 sps:$4 sm:$0xff]  }
 0x2b2   :  { %3537 = vmatmul.mubr.bf16.vlgmr.msra.gmra.mxu1 %v10431_v62 }
 0x2b3   :  { %3587 = vmatpush1.bf16.msra.mxu1 %v9308_v51  ;;  %3618 = vmatprep.mubr.bf16.mxu1 %v10236_v0  ;;  %v9384_v51 = vld [vmem:[#allocation10 + $0x128] ss:$20 sps:$4 sm:$0xff]  }
 0x2b4   :  { %3552 = vmatpush1.bf16.msra.mxu0 %v9311_v53  ;;  %3588 = vmatprep.subr.bf16.mxu1 %v9316_v54  ;;  %v9385_v53 = vld [vmem:[#allocation10 + $0x3f8] ss:$20 sps:$4 sm:$0xff]   ;;  %v9386_v54 = vld [vmem:[#allocation10 + $0x240] ss:$20 sps:$4 sm:$0xff]  }
 0x2b5   :  { %3553 = vmatprep.subr.bf16.mxu0 %v9319_v56  ;;  %v9387_v56 = vld [vmem:[#allocation10 + $0x2b8] ss:$20 sps:$4 sm:$0xff]  }
 0x2b7   :  { %3589 = vmatpush1.bf16.msra.mxu1 %v9314_v57  ;;  %v9388_v57 = vld [vmem:[#allocation10 + $0x100] ss:$20 sps:$4 sm:$0xff]  }
 0x2b8   :  { %3554 = vmatpush1.bf16.msra.mxu0 %v9317_v38  ;;  %3590 = vmatprep.subr.bf16.mxu1 %v9322_v28  ;;  %v9389_v38 = vld [vmem:[#allocation10 + $0x3d0] ss:$20 sps:$4 sm:$0xff]   ;;  %v9390_v28 = vld [vmem:[#allocation10 + $0x218] ss:$20 sps:$4 sm:$0xff]  }
 0x2b9   :  { %3555 = vmatprep.subr.bf16.mxu0 %v9325_v58 }
 0x2bb   :  { %3591 = vmatpush1.bf16.msra.mxu1 %v9320_v59  ;;  %v9391_v59 = vld [vmem:[#allocation10 + $0x290] ss:$20 sps:$4 sm:$0xff]  }
 0x2bc   :  { %3556 = vmatpush1.bf16.msra.mxu0 %v9323_v60  ;;  %3592 = vmatprep.subr.bf16.mxu1 %v9328_v1  ;;  %v9392_v1 = vld [vmem:[#allocation10 + $0xd8] ss:$20 sps:$4 sm:$0xff]  }
 0x2bd   :  { %3557 = vmatprep.subr.bf16.mxu0 %v9331_v2  ;;  %v9413_v2 = vld [vmem:[#allocation11 + $0x11c] ss:$20 sps:$4 sm:$0xff]  }
 0x2bf   :  { %3593 = vmatpush1.bf16.msra.mxu1 %v9326_v3  ;;  %v9393_v3 = vld [vmem:[#allocation10 + $0x1f0] ss:$20 sps:$4 sm:$0xff]  }
 0x2c0   :  { %3558 = vmatpush1.bf16.msra.mxu0 %v9329_v4  ;;  %3594 = vmatprep.subr.bf16.mxu1 %v9334_v55 }
 0x2c1   :  { %3559 = vmatprep.subr.bf16.mxu0 %v9337_v5  ;;  %v9394_v5 = vld [vmem:[#allocation10 + $0xb0] ss:$20 sps:$4 sm:$0xff]  }
 0x2c3   :  { %3595 = vmatpush1.bf16.msra.mxu1 %v9332_v6  ;;  %v9416_v6 = vld [vmem:[#allocation11 + $0xf4] ss:$20 sps:$4 sm:$0xff]  }
 0x2c4   :  { %3560 = vmatpush1.bf16.msra.mxu0 %v9335_v7  ;;  %3596 = vmatprep.subr.bf16.mxu1 %v9340_v8  ;;  %v9395_v7 = vld [vmem:[#allocation10 + $0x1c8] ss:$20 sps:$4 sm:$0xff]   ;;  %v9414_v8 = vld [vmem:[#allocation11 + $0xf0] ss:$20 sps:$4 sm:$0xff]  }
 0x2c5   :  { %3561 = vmatprep.subr.bf16.mxu0 %v9343_v9  ;;  %v9396_v9 = vld [vmem:[#allocation10 + $0x88] ss:$20 sps:$4 sm:$0xff]  }
 0x2c7   :  { %3597 = vmatpush1.bf16.msra.mxu1 %v9338_v10  ;;  %v9419_v10 = vld [vmem:[#allocation11 + $0xcc] ss:$20 sps:$4 sm:$0xff]  }
 0x2c8   :  { %3562 = vmatpush2.bf16.msra.mxu0 %v9341_v11  ;;  %3598 = vmatprep.subr.bf16.mxu1 %v9346_v12  ;;  %v9397_v11 = vld [vmem:[#allocation10 + $0x1a0] ss:$20 sps:$4 sm:$0xff]   ;;  %v9417_v12 = vld [vmem:[#allocation11 + $0xc8] ss:$20 sps:$4 sm:$0xff]  }
 0x2c9   :  { %3563 = vmatprep.subr.bf16.mxu0 %v9349_v13  ;;  %v9398_v13 = vld [vmem:[#allocation10 + $0x60] ss:$20 sps:$4 sm:$0xff]  }
 0x2cb   :  { %3599 = vmatpush1.bf16.msra.mxu1 %v9344_v14  ;;  %v9422_v14 = vld [vmem:[#allocation11 + $0xa4] ss:$20 sps:$4 sm:$0xff]  }
 0x2cc   :  { %3564 = vmatpush2.bf16.msra.mxu0 %v9347_v15  ;;  %3600 = vmatprep.subr.bf16.mxu1 %v9352_v16  ;;  %v9399_v15 = vld [vmem:[#allocation10 + $0x178] ss:$20 sps:$4 sm:$0xff]   ;;  %v9420_v16 = vld [vmem:[#allocation11 + $0xa0] ss:$20 sps:$4 sm:$0xff]  }
 0x2cd   :  { %3565 = vmatprep.subr.bf16.mxu0 %v9355_v18  ;;  %v9425_v18 = vld [vmem:[#allocation11 + $0x7c] ss:$20 sps:$4 sm:$0xff]  }
 0x2cf   :  { %3601 = vmatpush1.bf16.msra.mxu1 %v9350_v19  ;;  %v9401_v19 = vld [vmem:[#allocation10 + $0x150] ss:$20 sps:$4 sm:$0xff]  }
 0x2d0   :  { %3566 = vmatpush2.bf16.msra.mxu0 %v9353_v23  ;;  %8522 = vmatprep.subr.bf16.mxu1 %v9356_v24  ;;  %v9423_v23 = vld [vmem:[#allocation11 + $0x78] ss:$20 sps:$4 sm:$0xff]   ;;  %v9402_v24 = vld [vmem:[#allocation10 + $0x10] ss:$20 sps:$4 sm:$0xff]  }
 0x2d1   :  { %3567 = vmatprep.subr.bf16.mxu0 %v9359_v40  ;;  %v9428_v40 = vld [vmem:[#allocation11 + $0x54] ss:$20 sps:$4 sm:$0xff]  }
 0x2d2   :  { %3619 = vmatmul.mubr.bf16.vlgmr.msra.gmra.mxu1 %v10449_v34 }
 0x2d3   :  { %8523 = vmatpush3.bf16.msra.mxu1 %v9360_v21  ;;  %3699 = vmatprep.mubr.bf16.mxu1 %v10440_v44  ;;  %v9372_v44 = vld [vmem:[#allocation10 + $0x3f0] ss:$20 sps:$4 sm:$0xff]  }
 0x2d4   :  { %3568 = vmatpush2.bf16.msra.mxu0 %v9357_v25  ;;  %8524 = vmatprep.subr.bf16.mxu1 %v9361_v27  ;;  %v9426_v21 = vld [vmem:[#allocation11 + $0x50] ss:$20 sps:$4 sm:$0xff]   ;;  %v9403_v25 = vld [vmem:[#allocation10 + $0x628] ss:$20 sps:$4 sm:$0xff]   ;;  %v9431_v27 = vld [vmem:[#allocation11 + $0x2c] ss:$20 sps:$4 sm:$0xff]  }
 0x2d5   :  { %3569 = vmatprep.subr.bf16.mxu0 %v9364_v29  ;;  %v9429_v29 = vld [vmem:[#allocation11 + $0x28] ss:$20 sps:$4 sm:$0xff]  }
 0x2d7   :  { %8525 = vmatpush3.bf16.msra.mxu1 %v9365_v31  ;;  %v9404_v31 = vld [vmem:[#allocation10 + $0x600] ss:$20 sps:$4 sm:$0xff]  }
 0x2d8   :  { %3570 = vmatpush2.bf16.msra.mxu0 %v9362_v32  ;;  %8526 = vmatprep.subr.bf16.mxu1 %v9366_v33  ;;  %v9434_v32 = vld [vmem:[#allocation11 + $0x4] ss:$20 sps:$4 sm:$0xff]   ;;  %v9432_v33 = vld [vmem:[#allocation11] ss:$20 sps:$4 sm:$0xff]  }
 0x2d9   :  { %3571 = vmatprep.subr.bf16.mxu0 %v9369_v52  ;;  %v9405_v52 = vld [vmem:[#allocation10 + $0x5d8] ss:$20 sps:$4 sm:$0xff]  }
 0x2db   :  { %8527 = vmatpush3.bf16.msra.mxu1 %v9370_v41  ;;  %v9437_v41 = vld [vmem:[#allocation11 + $0x25c] ss:$20 sps:$4 sm:$0xff]  }
 0x2dc   :  { %3572 = vmatpush2.bf16.msra.mxu0 %v9367_v35  ;;  %8528 = vmatprep.subr.bf16.mxu1 %v9371_v36  ;;  %v9406_v35 = vld [vmem:[#allocation10 + $0x5b0] ss:$20 sps:$4 sm:$0xff]   ;;  %v9440_v36 = vld [vmem:[#allocation11 + $0x234] ss:$20 sps:$4 sm:$0xff]  }
 0x2dd   :  { %3573 = vmatprep.subr.bf16.mxu0 %v9374_v37  ;;  %v9438_v37 = vld [vmem:[#allocation11 + $0x230] ss:$20 sps:$4 sm:$0xff]  }
 0x2df   :  { %8529 = vmatpush3.bf16.msra.mxu1 %v9375_v39  ;;  %v9407_v39 = vld [vmem:[#allocation10 + $0x588] ss:$20 sps:$4 sm:$0xff]  }
 0x2e0   :  { %3574 = vmatpush2.bf16.msra.mxu0 %v9372_v44  ;;  %8530 = vmatprep.subr.bf16.mxu1 %v9376_v42  ;;  %v9443_v44 = vld [vmem:[#allocation11 + $0x20c] ss:$20 sps:$4 sm:$0xff]   ;;  %v9441_v42 = vld [vmem:[#allocation11 + $0x208] ss:$20 sps:$4 sm:$0xff]  }
 0x2e1   :  { %3575 = vmatprep.subr.bf16.mxu0 %v9379_v43  ;;  %v9408_v43 = vld [vmem:[#allocation10 + $0x560] ss:$20 sps:$4 sm:$0xff]  }
 0x2e3   :  { %8531 = vmatpush3.bf16.msra.mxu1 %v9380_v45  ;;  %v9446_v45 = vld [vmem:[#allocation11 + $0x1e4] ss:$20 sps:$4 sm:$0xff]  }
 0x2e4   :  { %3576 = vmatpush2.bf16.msra.mxu0 %v9377_v47  ;;  %8532 = vmatprep.subr.bf16.mxu1 %v9381_v48  ;;  %v9444_v47 = vld [vmem:[#allocation11 + $0x1e0] ss:$20 sps:$4 sm:$0xff]   ;;  %v9409_v48 = vld [vmem:[#allocation10 + $0x538] ss:$20 sps:$4 sm:$0xff]  }
 0x2e5   :  { %8500 = vmatprep.subr.bf16.mxu0 %v9382_v49  ;;  %v9449_v49 = vld [vmem:[#allocation11 + $0x1bc] ss:$20 sps:$4 sm:$0xff]  }
 0x2e7   :  { %3578 = vmatmul.mubr.bf16.vlgmr.msra.gmra.mxu0 %v10442_v46  ;;  %8533 = vmatpush3.bf16.msra.mxu1 %v9383_v50  ;;  %v9447_v50 = vld [vmem:[#allocation11 + $0x1b8] ss:$20 sps:$4 sm:$0xff]  }
 0x2e8   :  { %8501 = vmatpush3.bf16.msra.mxu0 %v9384_v51  ;;  %3659 = vmatprep.mubr.bf16.mxu0 %v10429_v61  ;;  %v9411_v61 = vld [vmem:[#allocation11 + $0x118] ss:$20 sps:$4 sm:$0xff]   ;;  %v9410_v51 = vld [vmem:[#allocation10 + $0x510] ss:$20 sps:$4 sm:$0xff]  }
 0x2e9   :  { %8534 = vmatprep.subr.bf16.mxu1 %v9385_v53  ;;  %8502 = vmatprep.subr.bf16.mxu0 %v9386_v54  ;;  %v9452_v53 = vld [vmem:[#allocation11 + $0x194] ss:$20 sps:$4 sm:$0xff]   ;;  %v9461_v54 = vld [vmem:[#allocation11 + $0x39c] ss:$20 sps:$4 sm:$0xff]  }
 0x2ea   :  { %v10459_v58 = vpop.f32.mrf.mxu0 }
 0x2eb   :  { %8535 = vmatpush3.bf16.msra.mxu1 %v9387_v56  ;;  %v9450_v56 = vld [vmem:[#allocation11 + $0x190] ss:$20 sps:$4 sm:$0xff]  }
 0x2ec   :  { %8503 = vmatpush3.bf16.msra.mxu0 %v9388_v57  ;;  %v10461_v60 = vpop.f32.mrf.mxu0  ;;  %8536 = vmatprep.subr.bf16.mxu1 %v9389_v38  ;;  %v9455_v57 = vld [vmem:[#allocation11 + $0x16c] ss:$20 sps:$4 sm:$0xff]  }
 0x2ed   :  { %8504 = vmatprep.subr.bf16.mxu0 %v9390_v28  ;;  %v9459_v38 = vld [vmem:[#allocation11 + $0x398] ss:$20 sps:$4 sm:$0xff]   ;;  %v9464_v28 = vld [vmem:[#allocation11 + $0x374] ss:$20 sps:$4 sm:$0xff]  }
 0x2ee   :  { %v3419_v4 = vpop.f32.mrf.mxu0 }
 0x2ef   :  { %8537 = vmatpush3.bf16.msra.mxu1 %v9391_v59  ;;  %v9453_v59 = vld [vmem:[#allocation11 + $0x168] ss:$20 sps:$4 sm:$0xff]   ;;  %v9456_v4 = vld [vmem:[#allocation11 + $0x140] ss:$20 sps:$4 sm:$0xff]  }
 0x2f0   :  { %8505 = vmatpush3.bf16.msra.mxu0 %v9392_v1  ;;  %v3420_v55 = vpop.f32.mrf.mxu0  ;;  %5064 = vmatprep.subr.bf16.mxu1 %v9413_v2  ;;  %v9458_v1 = vld [vmem:[#allocation11 + $0x144] ss:$20 sps:$4 sm:$0xff]  }
 0x2f1   :  { %8506 = vmatprep.subr.bf16.mxu0 %v9393_v3  ;;  %v9462_v2 = vld [vmem:[#allocation11 + $0x370] ss:$20 sps:$4 sm:$0xff]   ;;  %v9467_v3 = vld [vmem:[#allocation11 + $0x34c] ss:$20 sps:$4 sm:$0xff]  }
 0x2f2   :  { %3700 = vmatmul.mubr.bf16.vlgmr.msra.gmra.mxu1 %v10442_v46  ;;  %v9400_v46 = vld [vmem:[#allocation10 + $0x38] ss:$20 sps:$4 sm:$0xff]  }
 0x2f3   :  { %5065 = vmatpush1.bf16.msra.mxu1 %v9411_v61  ;;  %v9465_v61 = vld [vmem:[#allocation11 + $0x348] ss:$20 sps:$4 sm:$0xff]   ;;  %v9470_v55 = vld [vmem:[#allocation11 + $0x324] ss:$20 sps:$4 sm:$0xff]  }
 0x2f4   :  { %8507 = vmatpush3.bf16.msra.mxu0 %v9394_v5  ;;  %5066 = vmatprep.subr.bf16.mxu1 %v9416_v6  ;;  %v9468_v5 = vld [vmem:[#allocation11 + $0x320] ss:$20 sps:$4 sm:$0xff]  }
 0x2f5   :  { %8508 = vmatprep.subr.bf16.mxu0 %v9395_v7 }
 0x2f7   :  { %5067 = vmatpush1.bf16.msra.mxu1 %v9414_v8  ;;  %v9471_v8 = vld [vmem:[#allocation11 + $0x2f8] ss:$20 sps:$4 sm:$0xff]  }
 0x2f8   :  { %8509 = vmatpush3.bf16.msra.mxu0 %v9396_v9  ;;  %5068 = vmatprep.subr.bf16.mxu1 %v9419_v10  ;;  %v9476_v9 = vld [vmem:[#allocation11 + $0x2d4] ss:$20 sps:$4 sm:$0xff]  }
 0x2f9   :  { %8510 = vmatprep.subr.bf16.mxu0 %v9397_v11 }
 0x2fb   :  { %5069 = vmatpush1.bf16.msra.mxu1 %v9417_v12  ;;  %v9474_v12 = vld [vmem:[#allocation11 + $0x2d0] ss:$20 sps:$4 sm:$0xff]  }
 0x2fc   :  { %8511 = vmatpush3.bf16.msra.mxu0 %v9398_v13  ;;  %5070 = vmatprep.subr.bf16.mxu1 %v9422_v14  ;;  %v9479_v13 = vld [vmem:[#allocation11 + $0x2ac] ss:$20 sps:$4 sm:$0xff]   ;;  %v9477_v14 = vld [vmem:[#allocation11 + $0x2a8] ss:$20 sps:$4 sm:$0xff]  }
 0x2fd   :  { %8512 = vmatprep.subr.bf16.mxu0 %v9399_v15  ;;  %v9482_v15 = vld [vmem:[#allocation11 + $0x284] ss:$20 sps:$4 sm:$0xff]  }
 0x2ff   :  { %5071 = vmatpush1.bf16.msra.mxu1 %v9420_v16  ;;  %v9480_v16 = vld [vmem:[#allocation11 + $0x280] ss:$20 sps:$4 sm:$0xff]  }
 0x300   :  { %8513 = vmatpush3.bf16.msra.mxu0 %v9400_v46  ;;  %5072 = vmatprep.subr.bf16.mxu1 %v9425_v18  ;;  %v9485_v46 = vld [vmem:[#allocation11 + $0x4dc] ss:$20 sps:$4 sm:$0xff]   ;;  %v9483_v18 = vld [vmem:[#allocation11 + $0x4d8] ss:$20 sps:$4 sm:$0xff]  }
 0x301   :  { %8514 = vmatprep.subr.bf16.mxu0 %v9401_v19  ;;  %v9488_v19 = vld [vmem:[#allocation11 + $0x4b4] ss:$20 sps:$4 sm:$0xff]  }
 0x303   :  { %5073 = vmatpush1.bf16.msra.mxu1 %v9423_v23  ;;  %v9486_v23 = vld [vmem:[#allocation11 + $0x4b0] ss:$20 sps:$4 sm:$0xff]  }
 0x304   :  { %8515 = vmatpush3.bf16.msra.mxu0 %v9402_v24  ;;  %5074 = vmatprep.subr.bf16.mxu1 %v9428_v40  ;;  %v9491_v24 = vld [vmem:[#allocation11 + $0x48c] ss:$20 sps:$4 sm:$0xff]   ;;  %v9489_v40 = vld [vmem:[#allocation11 + $0x488] ss:$20 sps:$4 sm:$0xff]  }
 0x305   :  { %8740 = vmatprep.subr.bf16.mxu0 %v10237_v17 }
 0x307   :  { %3660 = vmatmul.mubr.bf16.vlgmr.msra.gmra.mxu0 %v10431_v62  ;;  %5075 = vmatpush1.bf16.msra.mxu1 %v9426_v21  ;;  %v9435_v62 = vld [vmem:[#allocation11 + $0x258] ss:$20 sps:$4 sm:$0xff]   ;;  %v9530_v21 = vld [vmem:[#allocation11 + $0x61c] ss:$20 sps:$4 sm:$0xff]  }
 0x308   :  { %8741 = vmatpush3.bf16.msra.mxu0 %v9403_v25  ;;  %8756 = vmatprep.mubr.msk.bf16.mxu0 %vm10238_vm1, %v10237_v17  ;;  %v9494_v25 = vld [vmem:[#allocation11 + $0x464] ss:$20 sps:$4 sm:$0xff]  }
 0x309   :  { %8742 = vmatprep.subr.bf16.mxu0 %v10237_v17  ;;  %5076 = vmatprep.subr.bf16.mxu1 %v9431_v27  ;;  %v9492_v27 = vld [vmem:[#allocation11 + $0x460] ss:$20 sps:$4 sm:$0xff]  }
 0x30b   :  { %5077 = vmatpush1.bf16.msra.mxu1 %v9429_v29  ;;  %v9497_v29 = vld [vmem:[#allocation11 + $0x43c] ss:$20 sps:$4 sm:$0xff]  }
 0x30c   :  { %8743 = vmatpush3.bf16.msra.mxu0 %v9404_v31  ;;  %5078 = vmatprep.subr.bf16.mxu1 %v9434_v32  ;;  %v9495_v31 = vld [vmem:[#allocation11 + $0x438] ss:$20 sps:$4 sm:$0xff]   ;;  %v9500_v32 = vld [vmem:[#allocation11 + $0x414] ss:$20 sps:$4 sm:$0xff]  }
 0x30d   :  { %8744 = vmatprep.subr.bf16.mxu0 %v10237_v17 }
 0x30f   :  { %5079 = vmatpush1.bf16.msra.mxu1 %v9432_v33  ;;  %v9498_v33 = vld [vmem:[#allocation11 + $0x410] ss:$20 sps:$4 sm:$0xff]  }
 0x310   :  { %8745 = vmatpush3.bf16.msra.mxu0 %v9405_v52  ;;  %5080 = vmatprep.subr.bf16.mxu1 %v9437_v41  ;;  %v9503_v52 = vld [vmem:[#allocation11 + $0x3ec] ss:$20 sps:$4 sm:$0xff]   ;;  %v9501_v41 = vld [vmem:[#allocation11 + $0x3e8] ss:$20 sps:$4 sm:$0xff]  }
 0x311   :  { %8746 = vmatprep.subr.bf16.mxu0 %v10237_v17 }
 0x313   :  { %5081 = vmatpush2.bf16.msra.mxu1 %v9435_v62  ;;  %v10479_v62 = vld [vmem:[%s10640_s6] sm:$0x1f] }
 0x314   :  { %8747 = vmatpush3.bf16.msra.mxu0 %v9406_v35  ;;  %5082 = vmatprep.subr.bf16.mxu1 %v9440_v36  ;;  %v9506_v35 = vld [vmem:[#allocation11 + $0x3c4] ss:$20 sps:$4 sm:$0xff]   ;;  %v2319_v36 = vrot.slane %v10479_v62, %v10361_v20 }
 0x315   :  { %8748 = vmatprep.subr.bf16.mxu0 %v10237_v17 }
 0x317   :  { %5083 = vmatpush2.bf16.msra.mxu1 %v9438_v37  ;;  %v9504_v37 = vld [vmem:[#allocation11 + $0x3c0] ss:$20 sps:$4 sm:$0xff]  }
 0x318   :  { %8749 = vmatpush3.bf16.msra.mxu0 %v9407_v39  ;;  %5084 = vmatprep.subr.bf16.mxu1 %v9443_v44  ;;  %v9509_v39 = vld [vmem:[#allocation11 + $0x124] ss:$20 sps:$4 sm:$0xff]   ;;  %v2323_v44 = vrot.slane %v10479_v62, %v10365_v22 }
 0x319   :  { %8750 = vmatprep.subr.bf16.mxu0 %v10237_v17 }
 0x31b   :  { %5085 = vmatpush2.bf16.msra.mxu1 %v9441_v42  ;;  %v3416_v42 = vadd.f32 %v10459_v58, %v2319_v36  ;;  %v9536_v58 = vld [vmem:[#allocation11 + $0x5f4] ss:$20 sps:$4 sm:$0xff]  }
 0x31c   :  { %8751 = vmatpush3.bf16.msra.mxu0 %v9408_v43  ;;  %5086 = vmatprep.subr.bf16.mxu1 %v9446_v45  ;;  %v3418_v43 = vadd.f32 %v10461_v60, %v2323_v44  ;;  %v9512_v44 = vld [vmem:[#allocation11 + $0xfc] ss:$20 sps:$4 sm:$0xff]  }
 0x31d   :  { %8752 = vmatprep.subr.bf16.mxu0 %v10237_v17 }
 0x31f   :  { %5087 = vmatpush2.bf16.msra.mxu1 %v9444_v47 }
 0x320   :  { %8753 = vmatpush3.bf16.msra.mxu0 %v9409_v48  ;;  %5088 = vmatprep.subr.bf16.mxu1 %v9449_v49 }
 0x321   :  { %8754 = vmatprep.subr.bf16.mxu0 %v10237_v17 }
 0x323   :  { %5089 = vmatpush2.bf16.msra.mxu1 %v9447_v50 }
 0x324   :  { %8755 = vmatpush3.bf16.msra.mxu0 %v9410_v51  ;;  %5090 = vmatprep.subr.bf16.mxu1 %v9452_v53 }
 0x325   :  { %5105 = vmatprep.subr.bf16.mxu0 %v9461_v54 }
 0x327   :  { %8757 = vmatmul.mubr.bf16.vlgmr.msra.gmra.mxu0 %v10449_v34  ;;  %5091 = vmatpush2.bf16.msra.mxu1 %v9450_v56  ;;  %v9473_v34 = vld [vmem:[#allocation11 + $0x2fc] ss:$20 sps:$4 sm:$0xff]  }
 0x328   :  { %5092 = vmatprep.subr.bf16.mxu1 %v9455_v57  ;;  %5106 = vmatpush1.bf16.msra.mxu0 %v9459_v38 }
 0x329   :  { %5107 = vmatprep.subr.bf16.mxu0 %v9464_v28  ;;  %v9528_v28 = vld [vmem:[#allocation11 + $0x618] ss:$20 sps:$4 sm:$0xff]  }
 0x32b   :  { %5093 = vmatpush2.bf16.msra.mxu1 %v9453_v59 }
 0x32c   :  { %5094 = vmatprep.subr.bf16.mxu1 %v9458_v1  ;;  %5108 = vmatpush1.bf16.msra.mxu0 %v9462_v2  ;;  %v9534_v1 = vld [vmem:[#allocation11 + $0x5f0] ss:$20 sps:$4 sm:$0xff]   ;;  %v9542_v2 = vld [vmem:[#allocation11 + $0x5cc] ss:$20 sps:$4 sm:$0xff]  }
 0x32d   :  { %5109 = vmatprep.subr.bf16.mxu0 %v9467_v3 }
 0x32f   :  { %5095 = vmatpush2.bf16.msra.mxu1 %v9456_v4 }
 0x330   :  { %5110 = vmatpush1.bf16.msra.mxu0 %v9465_v61  ;;  %5146 = vmatprep.subr.bf16.mxu1 %v9530_v21  ;;  %v9540_v61 = vld [vmem:[#allocation11 + $0x5c8] ss:$20 sps:$4 sm:$0xff]  }
 0x331   :  { %5111 = vmatprep.subr.bf16.mxu0 %v9470_v55  ;;  %v9548_v55 = vld [vmem:[#allocation11 + $0x5a4] ss:$20 sps:$4 sm:$0xff]  }
 0x332   :  { %v3456_v6 = vpop.f32.mrf.mxu1 }
 0x333   :  { %v3457_v45 = vadd.f32 %v3456_v6, %v3416_v42  ;;  %v9554_v6 = vld [vmem:[#allocation11 + $0x57c] ss:$20 sps:$4 sm:$0xff]  }
 0x334   :  { %v3458_v7 = vpop.f32.mrf.mxu1  ;;  %5112 = vmatpush1.bf16.msra.mxu0 %v9468_v5 }
 0x335   :  { %5113 = vmatprep.subr.bf16.mxu0 %v9473_v34  ;;  %v3459_v48 = vadd.f32 %v3458_v7, %v3418_v43  ;;  %v9546_v34 = vld [vmem:[#allocation11 + $0x5a0] ss:$20 sps:$4 sm:$0xff]   ;;  %v9552_v7 = vld [vmem:[#allocation11 + $0x578] ss:$20 sps:$4 sm:$0xff]  }
 0x336   :  { %v3460_v10 = vpop.f32.mrf.mxu1 }
 0x337   :  { %v9566_v10 = vld [vmem:[#allocation11 + $0x52c] ss:$20 sps:$4 sm:$0xff]  }
 0x338   :  { %v3461_v11 = vpop.f32.mrf.mxu1  ;;  %5114 = vmatpush1.bf16.msra.mxu0 %v9471_v8  ;;  %v9560_v8 = vld [vmem:[#allocation11 + $0x554] ss:$20 sps:$4 sm:$0xff]  }
 0x339   :  { %5115 = vmatprep.subr.bf16.mxu0 %v9476_v9  ;;  %v9558_v9 = vld [vmem:[#allocation11 + $0x550] ss:$20 sps:$4 sm:$0xff]   ;;  %v9564_v11 = vld [vmem:[#allocation11 + $0x528] ss:$20 sps:$4 sm:$0xff]  }
 0x33c   :  { %5116 = vmatpush1.bf16.msra.mxu0 %v9474_v12  ;;  %v9572_v12 = vld [vmem:[#allocation11 + $0x504] ss:$20 sps:$4 sm:$0xff]  }
 0x33d   :  { %5117 = vmatprep.subr.bf16.mxu0 %v9479_v13  ;;  %v9570_v13 = vld [vmem:[#allocation11 + $0x500] ss:$20 sps:$4 sm:$0xff]  }
 0x340   :  { %5118 = vmatpush1.bf16.msra.mxu0 %v9477_v14  ;;  %v9578_v14 = vld [vmem:[#allocation11 + $0x3a4] ss:$20 sps:$4 sm:$0xff]  }
 0x341   :  { %5119 = vmatprep.subr.bf16.mxu0 %v9482_v15 }
 0x344   :  { %5120 = vmatpush1.bf16.msra.mxu0 %v9480_v16 }
 0x345   :  { %5121 = vmatprep.subr.bf16.mxu0 %v9485_v46 }
 0x348   :  { %5122 = vmatpush2.bf16.msra.mxu0 %v9483_v18 }
 0x349   :  { %5123 = vmatprep.subr.bf16.mxu0 %v9488_v19  ;;  %v2327_v19 = vrot.slane %v10479_v62, %v10371_v26 }
 0x34c   :  { %5124 = vmatpush2.bf16.msra.mxu0 %v9486_v23  ;;  %v2331_v23 = vrot.slane %v10479_v62, %v10373_v30 }
 0x34d   :  { %5125 = vmatprep.subr.bf16.mxu0 %v9491_v24 }
 0x350   :  { %5126 = vmatpush2.bf16.msra.mxu0 %v9489_v40 }
 0x351   :  { %5127 = vmatprep.subr.bf16.mxu0 %v9494_v25 }
 0x354   :  { %5128 = vmatpush2.bf16.msra.mxu0 %v9492_v27 }
 0x355   :  { %5129 = vmatprep.subr.bf16.mxu0 %v9497_v29 }
 0x358   :  { %5130 = vmatpush2.bf16.msra.mxu0 %v9495_v31 }
 0x359   :  { %5131 = vmatprep.subr.bf16.mxu0 %v9500_v32 }
 0x35c   :  { %5132 = vmatpush2.bf16.msra.mxu0 %v9498_v33 }
 0x35d   :  { %5133 = vmatprep.subr.bf16.mxu0 %v9503_v52 }
 0x360   :  { %5134 = vmatpush2.bf16.msra.mxu0 %v9501_v41 }
 0x361   :  { %5135 = vmatprep.subr.bf16.mxu0 %v9506_v35 }
 0x364   :  { %5136 = vmatpush2.bf16.msra.mxu0 %v9504_v37  ;;  %v9507_v37 = vld [vmem:[#allocation11 + $0x120] ss:$20 sps:$4 sm:$0xff]  }
 0x365   :  { %5187 = vmatprep.subr.bf16.mxu0 %v9509_v39 }
 0x367   :  { %v3497_v47 = vpop.f32.mrf.mxu0 }
 0x368   :  { %v3498_v49 = vadd.f32 %v3497_v47, %v3457_v45  ;;  %v9510_v45 = vld [vmem:[#allocation11 + $0xf8] ss:$20 sps:$4 sm:$0xff]   ;;  %v9515_v47 = vld [vmem:[#allocation11 + $0xd4] ss:$20 sps:$4 sm:$0xff]  }
 0x369   :  { %v3499_v50 = vpop.f32.mrf.mxu0 }
 0x36a   :  { %v3500_v51 = vadd.f32 %v3499_v50, %v3459_v48  ;;  %v3747_v53 = vmax.f32 %v3498_v49, 0.0  ;;  %v9513_v50 = vld [vmem:[#allocation11 + $0xd0] ss:$20 sps:$4 sm:$0xff]  }
 0x36b   :  { %v3501_v54 = vpop.f32.mrf.mxu0 }
 0x36c   :  { %v3748_v56 = vmax.f32 %v3500_v51, 0.0  ;;  %v10489_v59 = vpack.c.bf16 %v3747_v53, %v3747_v53  ;;  %v9518_v51 = vld [vmem:[#allocation11 + $0xac] ss:$20 sps:$4 sm:$0xff]   ;;  %v9516_v53 = vld [vmem:[#allocation11 + $0xa8] ss:$20 sps:$4 sm:$0xff]  }
 0x36d   :  { %v3502_v57 = vpop.f32.mrf.mxu0  ;;  %v9521_v54 = vld [vmem:[#allocation11 + $0x84] ss:$20 sps:$4 sm:$0xff]  }
 0x36e   :  { %v10487_v38 = vpack.c.bf16 %v3748_v56, %v3748_v56  ;;  %v9519_v56 = vld [vmem:[#allocation11 + $0x80] ss:$20 sps:$4 sm:$0xff]   ;;  %v9524_v57 = vld [vmem:[#allocation11 + $0x5c] ss:$20 sps:$4 sm:$0xff]  }
 0x370   :  { %5096 = vmatprep.mubr.bf16.mxu1 %v10487_v38 }
 0x371   :  { %5097 = vmatmul.mubr.bf16.vlgmr.msra.gmra.mxu1 %v10489_v59 }
 0x372   :  { %v3538_v60 = vpop.f32.mrf.mxu1  ;;  %5147 = vmatpush1.bf16.msra.mxu1 %v9528_v28  ;;  %5178 = vmatprep.mubr.bf16.mxu1 %v10236_v0  ;;  %v9522_v28 = vld [vmem:[#allocation11 + $0x58] ss:$20 sps:$4 sm:$0xff]  }
 0x373   :  { %5148 = vmatprep.subr.bf16.mxu1 %v9536_v58  ;;  %v3539_v24 = vadd.f32 %v3538_v60, %v2327_v19  ;;  %v9527_v58 = vld [vmem:[#allocation11 + $0x34] ss:$20 sps:$4 sm:$0xff]   ;;  %v9567_v19 = vld [vmem:[#allocation11 + $0x198] ss:$20 sps:$4 sm:$0xff]  }
 0x374   :  { %v3540_v3 = vpop.f32.mrf.mxu1 }
 0x375   :  { %v3541_v21 = vadd.f32 %v3540_v3, %v2331_v23  ;;  %v9533_v3 = vld [vmem:[#allocation11 + $0xc] ss:$20 sps:$4 sm:$0xff]   ;;  %v9575_v23 = vld [vmem:[#allocation11 + $0x174] ss:$20 sps:$4 sm:$0xff]  }
 0x376   :  { %v3542_v4 = vpop.f32.mrf.mxu1  ;;  %5149 = vmatpush1.bf16.msra.mxu1 %v9534_v1  ;;  %v9525_v1 = vld [vmem:[#allocation11 + $0x30] ss:$20 sps:$4 sm:$0xff]  }
 0x377   :  { %5150 = vmatprep.subr.bf16.mxu1 %v9542_v2 }
 0x378   :  { %v3543_v5 = vpop.f32.mrf.mxu1 }
 0x379   :  { %v9539_v5 = vld [vmem:[#allocation11 + $0x264] ss:$20 sps:$4 sm:$0xff]  }
 0x37a   :  { %5151 = vmatpush1.bf16.msra.mxu1 %v9540_v61  ;;  %v9531_v61 = vld [vmem:[#allocation11 + $0x8] ss:$20 sps:$4 sm:$0xff]  }
 0x37b   :  { %5152 = vmatprep.subr.bf16.mxu1 %v9548_v55 }
 0x37e   :  { %5153 = vmatpush1.bf16.msra.mxu1 %v9546_v34  ;;  %v9537_v34 = vld [vmem:[#allocation11 + $0x260] ss:$20 sps:$4 sm:$0xff]  }
 0x37f   :  { %5154 = vmatprep.subr.bf16.mxu1 %v9554_v6  ;;  %v9545_v6 = vld [vmem:[#allocation11 + $0x23c] ss:$20 sps:$4 sm:$0xff]  }
 0x382   :  { %5155 = vmatpush1.bf16.msra.mxu1 %v9552_v7  ;;  %v9543_v7 = vld [vmem:[#allocation11 + $0x238] ss:$20 sps:$4 sm:$0xff]  }
 0x383   :  { %5156 = vmatprep.subr.bf16.mxu1 %v9560_v8  ;;  %v9551_v8 = vld [vmem:[#allocation11 + $0x214] ss:$20 sps:$4 sm:$0xff]  }
 0x386   :  { %5157 = vmatpush1.bf16.msra.mxu1 %v9558_v9  ;;  %v9549_v9 = vld [vmem:[#allocation11 + $0x210] ss:$20 sps:$4 sm:$0xff]  }
 0x387   :  { %5158 = vmatprep.subr.bf16.mxu1 %v9566_v10  ;;  %v9557_v10 = vld [vmem:[#allocation11 + $0x1ec] ss:$20 sps:$4 sm:$0xff]  }
 0x38a   :  { %5159 = vmatpush1.bf16.msra.mxu1 %v9564_v11  ;;  %v9555_v11 = vld [vmem:[#allocation11 + $0x1e8] ss:$20 sps:$4 sm:$0xff]  }
 0x38b   :  { %5160 = vmatprep.subr.bf16.mxu1 %v9572_v12  ;;  %v9563_v12 = vld [vmem:[#allocation11 + $0x1c4] ss:$20 sps:$4 sm:$0xff]  }
 0x38e   :  { %5161 = vmatpush1.bf16.msra.mxu1 %v9570_v13  ;;  %v2335_v13 = vrot.slane %v10479_v62, %v10393_v63 }
 0x38f   :  { %5228 = vmatprep.subr.bf16.mxu1 %v9578_v14 }
 0x392   :  { %v3620_v15 = vpop.f32.mrf.mxu1 }
 0x394   :  { %v3622_v16 = vpop.f32.mrf.mxu1 }
 0x396   :  { %v3624_v46 = vpop.f32.mrf.mxu1 }
 0x398   :  { %v3625_v18 = vpop.f32.mrf.mxu1 }
 0x3a7   :  { %v3579_v40 = vpop.f32.mrf.mxu0 }
 0x3a8   :  { %v3580_v25 = vadd.f32 %v3579_v40, %v3539_v24 }
 0x3a9   :  { %v3581_v27 = vpop.f32.mrf.mxu0 }
 0x3aa   :  { %v3621_v29 = vadd.f32 %v3620_v15, %v3580_v25  ;;  %v3582_v31 = vadd.f32 %v3581_v27, %v3541_v21  ;;  %v9561_v15 = vld [vmem:[#allocation11 + $0x1c0] ss:$20 sps:$4 sm:$0xff]   ;;  %v9573_v25 = vld [vmem:[#allocation11 + $0x170] ss:$20 sps:$4 sm:$0xff]  }
 0x3ab   :  { %v3583_v32 = vpop.f32.mrf.mxu0 }
 0x3ac   :  { %v3623_v33 = vadd.f32 %v3622_v16, %v3582_v31  ;;  %v3749_v52 = vmax.f32 %v3621_v29, 0.0  ;;  %v9569_v16 = vld [vmem:[#allocation11 + $0x19c] ss:$20 sps:$4 sm:$0xff]   ;;  %v9581_v29 = vld [vmem:[#allocation11 + $0x14c] ss:$20 sps:$4 sm:$0xff]  }
 0x3ad   :  { %v3584_v41 = vpop.f32.mrf.mxu0  ;;  %v9576_v32 = vld [vmem:[#allocation11 + $0x3a0] ss:$20 sps:$4 sm:$0xff]  }
 0x3ae   :  { %v3750_v35 = vmax.f32 %v3623_v33, 0.0  ;;  %v10500_v39 = vpack.c.bf16 %v3749_v52, %v3749_v52  ;;  %v9579_v52 = vld [vmem:[#allocation11 + $0x148] ss:$20 sps:$4 sm:$0xff]  }
 0x3af   :  { %v9584_v41 = vld [vmem:[#allocation11 + $0x37c] ss:$20 sps:$4 sm:$0xff]  }
 0x3b0   :  { %v10498_v36 = vpack.c.bf16 %v3750_v35, %v3750_v35 }
 0x3b2   :  { %v8538_v42 = vpop.f32.mrf.mxu1  ;;  %5137 = vmatprep.mubr.bf16.mxu0 %v10498_v36 }
 0x3b3   :  { %5138 = vmatmul.mubr.bf16.vlgmr.msra.gmra.mxu0 %v10500_v39 }
 0x3b4   :  { %5188 = vmatpush1.bf16.msra.mxu0 %v9507_v37  ;;  %v8539_v43 = vpop.f32.mrf.mxu1  ;;  %5219 = vmatprep.mubr.bf16.mxu0 %v10487_v38  ;;  %v9587_v37 = vld [vmem:[#allocation11 + $0x624] ss:$20 sps:$4 sm:$0xff]  }
 0x3b5   :  { %5189 = vmatprep.subr.bf16.mxu0 %v9512_v44  ;;  %v8540_v18 = vadd.f32 %v8539_v43, %v8538_v42  ;;  %v9582_v44 = vld [vmem:[#allocation11 + $0x378] ss:$20 sps:$4 sm:$0xff]   ;;  %v9585_v42 = vld [vmem:[#allocation11 + $0x620] ss:$20 sps:$4 sm:$0xff]  }
 0x3b6   :  { %v8541_v48 = vpop.f32.mrf.mxu1  ;;  %v9590_v43 = vld [vmem:[#allocation11 + $0x354] ss:$20 sps:$4 sm:$0xff]  }
 0x3b7   :  { %v9591_v48 = vld [vmem:[#allocation11 + $0x5f8] ss:$20 sps:$4 sm:$0xff]  }
 0x3b8   :  { %5190 = vmatpush1.bf16.msra.mxu0 %v9510_v45  ;;  %v8542_v49 = vpop.f32.mrf.mxu1  ;;  %v9593_v45 = vld [vmem:[#allocation11 + $0x5fc] ss:$20 sps:$4 sm:$0xff]  }
 0x3b9   :  { %5191 = vmatprep.subr.bf16.mxu0 %v9515_v47  ;;  %v9588_v47 = vld [vmem:[#allocation11 + $0x350] ss:$20 sps:$4 sm:$0xff]   ;;  %v9596_v49 = vld [vmem:[#allocation11 + $0x32c] ss:$20 sps:$4 sm:$0xff]  }
 0x3bc   :  { %5192 = vmatpush1.bf16.msra.mxu0 %v9513_v50  ;;  %v9599_v50 = vld [vmem:[#allocation11 + $0x5d4] ss:$20 sps:$4 sm:$0xff]  }
 0x3bd   :  { %5193 = vmatprep.subr.bf16.mxu0 %v9518_v51  ;;  %v9594_v51 = vld [vmem:[#allocation11 + $0x328] ss:$20 sps:$4 sm:$0xff]  }
 0x3c0   :  { %5194 = vmatpush1.bf16.msra.mxu0 %v9516_v53  ;;  %v9597_v53 = vld [vmem:[#allocation11 + $0x5d0] ss:$20 sps:$4 sm:$0xff]  }
 0x3c1   :  { %5195 = vmatprep.subr.bf16.mxu0 %v9521_v54  ;;  %v9602_v54 = vld [vmem:[#allocation11 + $0x304] ss:$20 sps:$4 sm:$0xff]  }
 0x3c4   :  { %5196 = vmatpush1.bf16.msra.mxu0 %v9519_v56  ;;  %v9605_v56 = vld [vmem:[#allocation11 + $0x5ac] ss:$20 sps:$4 sm:$0xff]  }
 0x3c5   :  { %5197 = vmatprep.subr.bf16.mxu0 %v9524_v57  ;;  %v9600_v57 = vld [vmem:[#allocation11 + $0x300] ss:$20 sps:$4 sm:$0xff]  }
 0x3c7   :  { %v8516_v60 = vpop.f32.mrf.mxu0 }
 0x3c8   :  { %5198 = vmatpush1.bf16.msra.mxu0 %v9522_v28  ;;  %v9603_v28 = vld [vmem:[#allocation11 + $0x5a8] ss:$20 sps:$4 sm:$0xff]  }
 0x3c9   :  { %v8517_v2 = vpop.f32.mrf.mxu0  ;;  %5199 = vmatprep.subr.bf16.mxu0 %v9527_v58  ;;  %v9608_v58 = vld [vmem:[#allocation11 + $0x2dc] ss:$20 sps:$4 sm:$0xff]  }
 0x3ca   :  { %v8518_v14 = vadd.f32 %v8517_v2, %v8516_v60  ;;  %v9611_v60 = vld [vmem:[#allocation11 + $0x584] ss:$20 sps:$4 sm:$0xff]   ;;  %v9609_v2 = vld [vmem:[#allocation11 + $0x580] ss:$20 sps:$4 sm:$0xff]  }
 0x3cb   :  { %v8519_v4 = vpop.f32.mrf.mxu0 }
 0x3cc   :  { %5200 = vmatpush1.bf16.msra.mxu0 %v9525_v1  ;;  %v3662_v46 = vadd.f32 %v8518_v14, %v2335_v13  ;;  %v9606_v1 = vld [vmem:[#allocation11 + $0x2d8] ss:$20 sps:$4 sm:$0xff]   ;;  %v9617_v4 = vld [vmem:[#allocation11 + $0x55c] ss:$20 sps:$4 sm:$0xff]  }
 0x3cd   :  { %v8520_v55 = vpop.f32.mrf.mxu0  ;;  %5201 = vmatprep.subr.bf16.mxu0 %v9533_v3  ;;  %v9614_v3 = vld [vmem:[#allocation11 + $0x2b4] ss:$20 sps:$4 sm:$0xff]   ;;  %v9630_v14 = vld [vmem:[#allocation11 + $0x4b8] ss:$20 sps:$4 sm:$0xff]  }
 0x3ce   :  { %v3702_v24 = vadd.f32 %v8540_v18, %v3662_v46  ;;  %v9615_v55 = vld [vmem:[#allocation11 + $0x558] ss:$20 sps:$4 sm:$0xff]   ;;  %v9633_v13 = vld [vmem:[#allocation11 + $0x4e8] ss:$20 sps:$4 sm:$0xff]   ;;  %v9638_v46 = vld [vmem:[#allocation11 + $0x4c0] ss:$20 sps:$4 sm:$0xff]  }
 0x3cf   :  { %v9635_v18 = vld [vmem:[#allocation11 + $0x490] ss:$20 sps:$4 sm:$0xff]  }
 0x3d0   :  { %5202 = vmatpush1.bf16.msra.mxu0 %v9531_v61  ;;  %v9612_v61 = vld [vmem:[#allocation11 + $0x2b0] ss:$20 sps:$4 sm:$0xff]  }
 0x3d1   :  { %5203 = vmatprep.subr.bf16.mxu0 %v9539_v5  ;;  %v9620_v5 = vld [vmem:[#allocation11 + $0x28c] ss:$20 sps:$4 sm:$0xff]  }
 0x3d4   :  { %5204 = vmatpush2.bf16.msra.mxu0 %v9537_v34  ;;  %v9623_v34 = vld [vmem:[#allocation11 + $0x534] ss:$20 sps:$4 sm:$0xff]  }
 0x3d5   :  { %5205 = vmatprep.subr.bf16.mxu0 %v9545_v6  ;;  %v9618_v6 = vld [vmem:[#allocation11 + $0x288] ss:$20 sps:$4 sm:$0xff]  }
 0x3d8   :  { %5206 = vmatpush2.bf16.msra.mxu0 %v9543_v7  ;;  %v9621_v7 = vld [vmem:[#allocation11 + $0x530] ss:$20 sps:$4 sm:$0xff]  }
 0x3d9   :  { %5207 = vmatprep.subr.bf16.mxu0 %v9551_v8  ;;  %v9626_v8 = vld [vmem:[#allocation11 + $0x4e4] ss:$20 sps:$4 sm:$0xff]  }
 0x3dc   :  { %5208 = vmatpush2.bf16.msra.mxu0 %v9549_v9  ;;  %v9629_v9 = vld [vmem:[#allocation11 + $0x50c] ss:$20 sps:$4 sm:$0xff]  }
 0x3dd   :  { %5209 = vmatprep.subr.bf16.mxu0 %v9557_v10  ;;  %v9624_v10 = vld [vmem:[#allocation11 + $0x4e0] ss:$20 sps:$4 sm:$0xff]  }
 0x3e0   :  { %5210 = vmatpush2.bf16.msra.mxu0 %v9555_v11  ;;  %v9627_v11 = vld [vmem:[#allocation11 + $0x508] ss:$20 sps:$4 sm:$0xff]  }
 0x3e1   :  { %5211 = vmatprep.subr.bf16.mxu0 %v9563_v12  ;;  %v9632_v12 = vld [vmem:[#allocation11 + $0x4bc] ss:$20 sps:$4 sm:$0xff]  }
 0x3e4   :  { %5212 = vmatpush2.bf16.msra.mxu0 %v9561_v15  ;;  %v9634_v15 = vld [vmem:[#allocation11 + $0x3a8] ss:$20 sps:$4 sm:$0xff]  }
 0x3e5   :  { %5213 = vmatprep.subr.bf16.mxu0 %v9569_v16  ;;  %v9637_v16 = vld [vmem:[#allocation11 + $0x494] ss:$20 sps:$4 sm:$0xff]  }
 0x3e7   :  { %v3741_v40 = vpop.f32.mrf.mxu0 }
 0x3e8   :  { %v3742_v21 = vadd.f32 %v3741_v40, %v3702_v24  ;;  %5214 = vmatpush2.bf16.msra.mxu0 %v9567_v19  ;;  %v9639_v19 = vld [vmem:[#allocation11 + $0x380] ss:$20 sps:$4 sm:$0xff]   ;;  %v9643_v24 = vld [vmem:[#allocation11 + $0x498] ss:$20 sps:$4 sm:$0xff]   ;;  %v9640_v40 = vld [vmem:[#allocation11 + $0x468] ss:$20 sps:$4 sm:$0xff]  }
 0x3e9   :  { %v8758_v27 = vpop.f32.mrf.mxu0  ;;  %5215 = vmatprep.subr.bf16.mxu0 %v9575_v23  ;;  %v9642_v23 = vld [vmem:[#allocation11 + $0x46c] ss:$20 sps:$4 sm:$0xff]  }
 0x3ea   :  { %v3751_v62 = vmax.f32 %v3742_v21, 0.0  ;;  %v9644_v21 = vld [vmem:[#allocation11 + $0x358] ss:$20 sps:$4 sm:$0xff]   ;;  %v9648_v27 = vld [vmem:[#allocation11 + $0x470] ss:$20 sps:$4 sm:$0xff]  }
 0x3eb   :  { %v3744_v31 = vpop.f32.mrf.mxu0 }
 0x3ec   :  { %v10507_v33 = vpack.c.bf16 %v3751_v62, %v3751_v62  ;;  %5216 = vmatpush2.bf16.msra.mxu0 %v9573_v25  ;;  %v9647_v25 = vld [vmem:[#allocation11 + $0x444] ss:$20 sps:$4 sm:$0xff]   ;;  %v9652_v31 = vld [vmem:[#allocation11 + $0x41c] ss:$20 sps:$4 sm:$0xff]  }
 0x3ed   :  { %v8759_v35 = vpop.f32.mrf.mxu0  ;;  %5217 = vmatprep.subr.bf16.mxu0 %v9581_v29  ;;  %v9645_v29 = vld [vmem:[#allocation11 + $0x440] ss:$20 sps:$4 sm:$0xff]   ;;  %v9649_v62 = vld [vmem:[#allocation11 + $0x330] ss:$20 sps:$4 sm:$0xff]  }
 0x3ee   :  { %5179 = vmatmul.mubr.bf16.vlgmr.msra.gmra.mxu1 %v10507_v33  ;;  %v9658_v35 = vld [vmem:[#allocation11 + $0x420] ss:$20 sps:$4 sm:$0xff]  }
 0x3ef   :  { %5229 = vmatpush1.bf16.msra.mxu1 %v9576_v32  ;;  %5260 = vmatprep.mubr.bf16.mxu1 %v10498_v36  ;;  %v9650_v32 = vld [vmem:[#allocation11 + $0x418] ss:$20 sps:$4 sm:$0xff]  }
 0x3f0   :  { %5218 = vmatpush2.bf16.msra.mxu0 %v9579_v52  ;;  %5230 = vmatprep.subr.bf16.mxu1 %v9584_v41  ;;  %v9654_v52 = vld [vmem:[#allocation11 + $0x308] ss:$20 sps:$4 sm:$0xff]  }
 0x3f1   :  { %5269 = vmatprep.subr.bf16.mxu0 %v9587_v37  ;;  %v9657_v41 = vld [vmem:[#allocation11 + $0x3f4] ss:$20 sps:$4 sm:$0xff]   ;;  %v9655_v37 = vld [vmem:[#allocation11 + $0x3f0] ss:$20 sps:$4 sm:$0xff]  }
 0x3f3   :  { %5220 = vmatmul.mubr.bf16.vlgmr.msra.gmra.mxu0 %v10489_v59  ;;  %5231 = vmatpush1.bf16.msra.mxu1 %v9582_v44  ;;  %v9659_v44 = vld [vmem:[#allocation11 + $0x2e0] ss:$20 sps:$4 sm:$0xff]  }
 0x3f4   :  { %5270 = vmatpush1.bf16.msra.mxu0 %v9585_v42  ;;  %5232 = vmatprep.subr.bf16.mxu1 %v9590_v43  ;;  %v9662_v42 = vld [vmem:[#allocation11 + $0x3cc] ss:$20 sps:$4 sm:$0xff]  }
 0x3f5   :  { %5271 = vmatprep.subr.bf16.mxu0 %v9593_v45  ;;  %5301 = vmatprep.mubr.bf16.mxu0 %v10236_v0  ;;  %v9663_v43 = vld [vmem:[#allocation11 + $0x3f8] ss:$20 sps:$4 sm:$0xff]   ;;  %v9660_v45 = vld [vmem:[#allocation11 + $0x3c8] ss:$20 sps:$4 sm:$0xff]  }
 0x3f7   :  { %5233 = vmatpush1.bf16.msra.mxu1 %v9588_v47  ;;  %v9664_v47 = vld [vmem:[#allocation11 + $0x2b8] ss:$20 sps:$4 sm:$0xff]  }
 0x3f8   :  { %5272 = vmatpush1.bf16.msra.mxu0 %v9591_v48  ;;  %5234 = vmatprep.subr.bf16.mxu1 %v9596_v49  ;;  %v9665_v48 = vld [vmem:[#allocation11 + $0x268] ss:$20 sps:$4 sm:$0xff]   ;;  %v9667_v49 = vld [vmem:[#allocation11 + $0x3d0] ss:$20 sps:$4 sm:$0xff]  }
 0x3f9   :  { %5273 = vmatprep.subr.bf16.mxu0 %v9599_v50  ;;  %v9666_v50 = vld [vmem:[#allocation11 + $0x128] ss:$20 sps:$4 sm:$0xff]  }
 0x3fb   :  { %5235 = vmatpush1.bf16.msra.mxu1 %v9594_v51  ;;  %v9668_v51 = vld [vmem:[#allocation11 + $0x290] ss:$20 sps:$4 sm:$0xff]  }
 0x3fc   :  { %5274 = vmatpush1.bf16.msra.mxu0 %v9597_v53  ;;  %5236 = vmatprep.subr.bf16.mxu1 %v9602_v54  ;;  %v9669_v53 = vld [vmem:[#allocation11 + $0x240] ss:$20 sps:$4 sm:$0xff]  }
 0x3fd   :  { %5275 = vmatprep.subr.bf16.mxu0 %v9605_v56  ;;  %v9693_v54 = vld [vmem:[#allocation14 + $0x11c] ss:$20 sps:$4 sm:$0xff]  }
 0x3fe   :  { %v9670_v56 = vld [vmem:[#allocation11 + $0x100] ss:$20 sps:$4 sm:$0xff]  }
 0x3ff   :  { %5237 = vmatpush1.bf16.msra.mxu1 %v9600_v57  ;;  %v9671_v57 = vld [vmem:[#allocation11 + $0x218] ss:$20 sps:$4 sm:$0xff]  }
 0x400   :  { %5276 = vmatpush1.bf16.msra.mxu0 %v9603_v28  ;;  %5238 = vmatprep.subr.bf16.mxu1 %v9608_v58  ;;  %v9691_v28 = vld [vmem:[#allocation14 + $0x118] ss:$20 sps:$4 sm:$0xff]  }
 0x401   :  { %5277 = vmatprep.subr.bf16.mxu0 %v9611_v60  ;;  %v9696_v60 = vld [vmem:[#allocation14 + $0xf4] ss:$20 sps:$4 sm:$0xff]  }
 0x403   :  { %5239 = vmatpush1.bf16.msra.mxu1 %v9606_v1 }
 0x404   :  { %5278 = vmatpush1.bf16.msra.mxu0 %v9609_v2  ;;  %5240 = vmatprep.subr.bf16.mxu1 %v9614_v3  ;;  %v9672_v2 = vld [vmem:[#allocation11 + $0xd8] ss:$20 sps:$4 sm:$0xff]   ;;  %v9673_v3 = vld [vmem:[#allocation11 + $0x1f0] ss:$20 sps:$4 sm:$0xff]  }
 0x405   :  { %5279 = vmatprep.subr.bf16.mxu0 %v9617_v4  ;;  %v9694_v4 = vld [vmem:[#allocation14 + $0xf0] ss:$20 sps:$4 sm:$0xff]  }
 0x407   :  { %5241 = vmatpush1.bf16.msra.mxu1 %v9612_v61  ;;  %v9699_v61 = vld [vmem:[#allocation14 + $0xcc] ss:$20 sps:$4 sm:$0xff]  }
 0x408   :  { %5280 = vmatpush1.bf16.msra.mxu0 %v9615_v55  ;;  %5242 = vmatprep.subr.bf16.mxu1 %v9620_v5  ;;  %v9674_v5 = vld [vmem:[#allocation11 + $0xb0] ss:$20 sps:$4 sm:$0xff]  }
 0x409   :  { %5281 = vmatprep.subr.bf16.mxu0 %v9623_v34  ;;  %v9675_v34 = vld [vmem:[#allocation11 + $0x1c8] ss:$20 sps:$4 sm:$0xff]  }
 0x40b   :  { %5243 = vmatpush1.bf16.msra.mxu1 %v9618_v6  ;;  %v9697_v6 = vld [vmem:[#allocation14 + $0xc8] ss:$20 sps:$4 sm:$0xff]  }
 0x40c   :  { %5282 = vmatpush1.bf16.msra.mxu0 %v9621_v7  ;;  %5244 = vmatprep.subr.bf16.mxu1 %v9626_v8  ;;  %v9702_v7 = vld [vmem:[#allocation14 + $0xa4] ss:$20 sps:$4 sm:$0xff]  }
 0x40d   :  { %5283 = vmatprep.subr.bf16.mxu0 %v9629_v9  ;;  %v9677_v8 = vld [vmem:[#allocation11 + $0x1a0] ss:$20 sps:$4 sm:$0xff]   ;;  %v9700_v9 = vld [vmem:[#allocation14 + $0xa0] ss:$20 sps:$4 sm:$0xff]  }
 0x40f   :  { %5245 = vmatpush2.bf16.msra.mxu1 %v9624_v10  ;;  %v9705_v10 = vld [vmem:[#allocation14 + $0x7c] ss:$20 sps:$4 sm:$0xff]  }
 0x410   :  { %5284 = vmatpush1.bf16.msra.mxu0 %v9627_v11  ;;  %5246 = vmatprep.subr.bf16.mxu1 %v9632_v12  ;;  %v9678_v11 = vld [vmem:[#allocation11 + $0x60] ss:$20 sps:$4 sm:$0xff]   ;;  %v9679_v12 = vld [vmem:[#allocation11 + $0x178] ss:$20 sps:$4 sm:$0xff]  }
 0x411   :  { %8575 = vmatprep.subr.bf16.mxu0 %v9633_v13  ;;  %v9703_v13 = vld [vmem:[#allocation14 + $0x78] ss:$20 sps:$4 sm:$0xff]  }
 0x413   :  { %5247 = vmatpush2.bf16.msra.mxu1 %v9630_v14  ;;  %5302 = vmatmul.mubr.bf16.vlgmr.msra.gmra.mxu0 %v10507_v33  ;;  %v9708_v14 = vld [vmem:[#allocation14 + $0x54] ss:$20 sps:$4 sm:$0xff]  }
 0x414   :  { %8576 = vmatpush3.bf16.msra.mxu0 %v9634_v15  ;;  %5382 = vmatprep.mubr.bf16.mxu0 %v10498_v36  ;;  %v9653_v36 = vld [vmem:[#allocation11 + $0x448] ss:$20 sps:$4 sm:$0xff]   ;;  %v9680_v15 = vld [vmem:[#allocation11 + $0x38] ss:$20 sps:$4 sm:$0xff]  }
 0x415   :  { %5248 = vmatprep.subr.bf16.mxu1 %v9637_v16  ;;  %8577 = vmatprep.subr.bf16.mxu0 %v9638_v46  ;;  %v9681_v16 = vld [vmem:[#allocation11 + $0x150] ss:$20 sps:$4 sm:$0xff]   ;;  %v9706_v46 = vld [vmem:[#allocation14 + $0x50] ss:$20 sps:$4 sm:$0xff]  }
 0x417   :  { %5249 = vmatpush2.bf16.msra.mxu1 %v9635_v18  ;;  %v9711_v18 = vld [vmem:[#allocation14 + $0x2c] ss:$20 sps:$4 sm:$0xff]  }
 0x418   :  { %8578 = vmatpush3.bf16.msra.mxu0 %v9639_v19  ;;  %5250 = vmatprep.subr.bf16.mxu1 %v9642_v23  ;;  %v9682_v19 = vld [vmem:[#allocation11 + $0x10] ss:$20 sps:$4 sm:$0xff]  }
 0x419   :  { %8579 = vmatprep.subr.bf16.mxu0 %v9643_v24  ;;  %v9709_v23 = vld [vmem:[#allocation14 + $0x28] ss:$20 sps:$4 sm:$0xff]   ;;  %v9714_v24 = vld [vmem:[#allocation14 + $0x4] ss:$20 sps:$4 sm:$0xff]  }
 0x41b   :  { %5251 = vmatpush2.bf16.msra.mxu1 %v9640_v40  ;;  %v9683_v40 = vld [vmem:[#allocation11 + $0x628] ss:$20 sps:$4 sm:$0xff]  }
 0x41c   :  { %8580 = vmatpush3.bf16.msra.mxu0 %v9644_v21  ;;  %5252 = vmatprep.subr.bf16.mxu1 %v9647_v25  ;;  %v9712_v21 = vld [vmem:[#allocation14] ss:$20 sps:$4 sm:$0xff]   ;;  %v9717_v25 = vld [vmem:[#allocation14 + $0x25c] ss:$20 sps:$4 sm:$0xff]  }
 0x41d   :  { %8581 = vmatprep.subr.bf16.mxu0 %v9648_v27  ;;  %v9684_v27 = vld [vmem:[#allocation11 + $0x600] ss:$20 sps:$4 sm:$0xff]  }
 0x41f   :  { %5253 = vmatpush2.bf16.msra.mxu1 %v9645_v29  ;;  %v9715_v29 = vld [vmem:[#allocation14 + $0x258] ss:$20 sps:$4 sm:$0xff]  }
 0x420   :  { %8582 = vmatpush3.bf16.msra.mxu0 %v9649_v62  ;;  %5254 = vmatprep.subr.bf16.mxu1 %v9652_v31  ;;  %v9720_v62 = vld [vmem:[#allocation14 + $0x234] ss:$20 sps:$4 sm:$0xff]  }
 0x421   :  { %8583 = vmatprep.subr.bf16.mxu0 %v9653_v36  ;;  %v9685_v31 = vld [vmem:[#allocation11 + $0x5d8] ss:$20 sps:$4 sm:$0xff]  }
 0x422   :  { %v9718_v36 = vld [vmem:[#allocation14 + $0x230] ss:$20 sps:$4 sm:$0xff]  }
 0x423   :  { %5255 = vmatpush2.bf16.msra.mxu1 %v9650_v32  ;;  %v9723_v32 = vld [vmem:[#allocation14 + $0x20c] ss:$20 sps:$4 sm:$0xff]  }
 0x424   :  { %8584 = vmatpush3.bf16.msra.mxu0 %v9654_v52  ;;  %5256 = vmatprep.subr.bf16.mxu1 %v9657_v41  ;;  %v9721_v52 = vld [vmem:[#allocation14 + $0x208] ss:$20 sps:$4 sm:$0xff]   ;;  %v9726_v41 = vld [vmem:[#allocation14 + $0x1e4] ss:$20 sps:$4 sm:$0xff]  }
 0x425   :  { %8585 = vmatprep.subr.bf16.mxu0 %v9658_v35  ;;  %v9687_v35 = vld [vmem:[#allocation11 + $0x588] ss:$20 sps:$4 sm:$0xff]  }
 0x427   :  { %5257 = vmatpush2.bf16.msra.mxu1 %v9655_v37  ;;  %v9724_v37 = vld [vmem:[#allocation14 + $0x1e0] ss:$20 sps:$4 sm:$0xff]  }
 0x428   :  { %8586 = vmatpush3.bf16.msra.mxu0 %v9659_v44  ;;  %5258 = vmatprep.subr.bf16.mxu1 %v9662_v42  ;;  %v9729_v44 = vld [vmem:[#allocation14 + $0x1bc] ss:$20 sps:$4 sm:$0xff]  }
 0x429   :  { %8587 = vmatprep.subr.bf16.mxu0 %v9663_v43  ;;  %v9688_v42 = vld [vmem:[#allocation11 + $0x560] ss:$20 sps:$4 sm:$0xff]  }
 0x42a   :  { %v9727_v43 = vld [vmem:[#allocation14 + $0x1b8] ss:$20 sps:$4 sm:$0xff]  }
 0x42b   :  { %5259 = vmatpush2.bf16.msra.mxu1 %v9660_v45  ;;  %v9732_v45 = vld [vmem:[#allocation14 + $0x194] ss:$20 sps:$4 sm:$0xff]  }
 0x42c   :  { %8588 = vmatpush3.bf16.msra.mxu0 %v9664_v47  ;;  %8553 = vmatprep.subr.bf16.mxu1 %v9665_v48  ;;  %v9689_v47 = vld [vmem:[#allocation11 + $0x538] ss:$20 sps:$4 sm:$0xff]  }
 0x42d   :  { %8589 = vmatprep.subr.bf16.mxu0 %v9667_v49  ;;  %v9730_v48 = vld [vmem:[#allocation14 + $0x190] ss:$20 sps:$4 sm:$0xff]   ;;  %v9735_v49 = vld [vmem:[#allocation14 + $0x16c] ss:$20 sps:$4 sm:$0xff]  }
 0x42e   :  { %5261 = vmatmul.mubr.bf16.vlgmr.msra.gmra.mxu1 %v10500_v39 }
 0x42f   :  { %8554 = vmatpush3.bf16.msra.mxu1 %v9666_v50  ;;  %5342 = vmatprep.mubr.bf16.mxu1 %v10487_v38  ;;  %v9690_v50 = vld [vmem:[#allocation11 + $0x510] ss:$20 sps:$4 sm:$0xff]  }
 0x430   :  { %8590 = vmatpush3.bf16.msra.mxu0 %v9668_v51  ;;  %8555 = vmatprep.subr.bf16.mxu1 %v9669_v53  ;;  %v9733_v51 = vld [vmem:[#allocation14 + $0x168] ss:$20 sps:$4 sm:$0xff]  }
 0x431   :  { %v10517_v58 = vpop.f32.mrf.mxu1  ;;  %6747 = vmatprep.subr.bf16.mxu0 %v9693_v54  ;;  %v9741_v53 = vld [vmem:[#allocation14 + $0x39c] ss:$20 sps:$4 sm:$0xff]   ;;  %v9738_v54 = vld [vmem:[#allocation14 + $0x144] ss:$20 sps:$4 sm:$0xff]  }
 0x433   :  { %8556 = vmatpush3.bf16.msra.mxu1 %v9670_v56  ;;  %5383 = vmatmul.mubr.bf16.vlgmr.msra.gmra.mxu0 %v10500_v39  ;;  %v10520_v1 = vpop.f32.mrf.mxu1  ;;  %v9676_v39 = vld [vmem:[#allocation11 + $0x88] ss:$20 sps:$4 sm:$0xff]  }
 0x434   :  { %8557 = vmatprep.subr.bf16.mxu1 %v9671_v57  ;;  %6748 = vmatpush1.bf16.msra.mxu0 %v9691_v28  ;;  %v9739_v56 = vld [vmem:[#allocation14 + $0x398] ss:$20 sps:$4 sm:$0xff]   ;;  %v9736_v57 = vld [vmem:[#allocation14 + $0x140] ss:$20 sps:$4 sm:$0xff]  }
 0x435   :  { %v5102_v38 = vpop.f32.mrf.mxu1  ;;  %6749 = vmatprep.subr.bf16.mxu0 %v9696_v60  ;;  %v9744_v28 = vld [vmem:[#allocation14 + $0x374] ss:$20 sps:$4 sm:$0xff]   ;;  %v9742_v60 = vld [vmem:[#allocation14 + $0x370] ss:$20 sps:$4 sm:$0xff]  }
 0x436   :  { %v9750_v38 = vld [vmem:[#allocation14 + $0x324] ss:$20 sps:$4 sm:$0xff]  }
 0x437   :  { %8558 = vmatpush3.bf16.msra.mxu1 %v9672_v2  ;;  %v5103_v55 = vpop.f32.mrf.mxu1  ;;  %v9747_v2 = vld [vmem:[#allocation14 + $0x34c] ss:$20 sps:$4 sm:$0xff]  }
 0x438   :  { %8559 = vmatprep.subr.bf16.mxu1 %v9673_v3  ;;  %6750 = vmatpush1.bf16.msra.mxu0 %v9694_v4  ;;  %v9745_v4 = vld [vmem:[#allocation14 + $0x348] ss:$20 sps:$4 sm:$0xff]  }
 0x439   :  { %6751 = vmatprep.subr.bf16.mxu0 %v9699_v61 }
 0x43b   :  { %8560 = vmatpush3.bf16.msra.mxu1 %v9674_v5  ;;  %v9748_v5 = vld [vmem:[#allocation14 + $0x320] ss:$20 sps:$4 sm:$0xff]  }
 0x43c   :  { %8561 = vmatprep.subr.bf16.mxu1 %v9675_v34  ;;  %6752 = vmatpush1.bf16.msra.mxu0 %v9697_v6  ;;  %v9753_v34 = vld [vmem:[#allocation14 + $0x2fc] ss:$20 sps:$4 sm:$0xff]  }
 0x43d   :  { %6753 = vmatprep.subr.bf16.mxu0 %v9702_v7  ;;  %v9756_v7 = vld [vmem:[#allocation14 + $0x2d4] ss:$20 sps:$4 sm:$0xff]  }
 0x43f   :  { %8562 = vmatpush3.bf16.msra.mxu1 %v9676_v39  ;;  %v9754_v39 = vld [vmem:[#allocation14 + $0x2d0] ss:$20 sps:$4 sm:$0xff]  }
 0x440   :  { %8563 = vmatprep.subr.bf16.mxu1 %v9677_v8  ;;  %6754 = vmatpush1.bf16.msra.mxu0 %v9700_v9  ;;  %v9759_v8 = vld [vmem:[#allocation14 + $0x2ac] ss:$20 sps:$4 sm:$0xff]   ;;  %v9757_v9 = vld [vmem:[#allocation14 + $0x2a8] ss:$20 sps:$4 sm:$0xff]  }
 0x441   :  { %6755 = vmatprep.subr.bf16.mxu0 %v9705_v10  ;;  %v9762_v10 = vld [vmem:[#allocation14 + $0x284] ss:$20 sps:$4 sm:$0xff]  }
 0x443   :  { %8564 = vmatpush3.bf16.msra.mxu1 %v9678_v11  ;;  %v9760_v11 = vld [vmem:[#allocation14 + $0x280] ss:$20 sps:$4 sm:$0xff]  }
 0x444   :  { %8565 = vmatprep.subr.bf16.mxu1 %v9679_v12  ;;  %6756 = vmatpush1.bf16.msra.mxu0 %v9703_v13  ;;  %v9765_v12 = vld [vmem:[#allocation14 + $0x4dc] ss:$20 sps:$4 sm:$0xff]   ;;  %v9763_v13 = vld [vmem:[#allocation14 + $0x4d8] ss:$20 sps:$4 sm:$0xff]  }
 0x445   :  { %6757 = vmatprep.subr.bf16.mxu0 %v9708_v14  ;;  %v9768_v14 = vld [vmem:[#allocation14 + $0x4b4] ss:$20 sps:$4 sm:$0xff]  }
 0x447   :  { %8566 = vmatpush3.bf16.msra.mxu1 %v9680_v15  ;;  %v9766_v15 = vld [vmem:[#allocation14 + $0x4b0] ss:$20 sps:$4 sm:$0xff]  }
 0x448   :  { %8567 = vmatprep.subr.bf16.mxu1 %v9681_v16  ;;  %6758 = vmatpush1.bf16.msra.mxu0 %v9706_v46  ;;  %v9771_v16 = vld [vmem:[#allocation14 + $0x48c] ss:$20 sps:$4 sm:$0xff]   ;;  %v9769_v46 = vld [vmem:[#allocation14 + $0x488] ss:$20 sps:$4 sm:$0xff]  }
 0x449   :  { %6759 = vmatprep.subr.bf16.mxu0 %v9711_v18  ;;  %v9810_v18 = vld [vmem:[#allocation14 + $0x61c] ss:$20 sps:$4 sm:$0xff]  }
 0x44b   :  { %8568 = vmatpush3.bf16.msra.mxu1 %v9682_v19  ;;  %v9774_v19 = vld [vmem:[#allocation14 + $0x464] ss:$20 sps:$4 sm:$0xff]  }
 0x44c   :  { %8760 = vmatprep.subr.bf16.mxu1 %v10237_v17  ;;  %6760 = vmatpush1.bf16.msra.mxu0 %v9709_v23  ;;  %v9772_v23 = vld [vmem:[#allocation14 + $0x460] ss:$20 sps:$4 sm:$0xff]  }
 0x44d   :  { %6761 = vmatprep.subr.bf16.mxu0 %v9714_v24  ;;  %v9777_v24 = vld [vmem:[#allocation14 + $0x43c] ss:$20 sps:$4 sm:$0xff]  }
 0x44e   :  { %5343 = vmatmul.mubr.bf16.vlgmr.msra.gmra.mxu1 %v10489_v59  ;;  %v9686_v59 = vld [vmem:[#allocation11 + $0x5b0] ss:$20 sps:$4 sm:$0xff]  }
 0x44f   :  { %8761 = vmatpush3.bf16.msra.mxu1 %v9683_v40  ;;  %8776 = vmatprep.mubr.msk.bf16.mxu1 %vm10238_vm1, %v10237_v17  ;;  %v9775_v40 = vld [vmem:[#allocation14 + $0x438] ss:$20 sps:$4 sm:$0xff]  }
 0x450   :  { %8762 = vmatprep.subr.bf16.mxu1 %v10237_v17  ;;  %6762 = vmatpush1.bf16.msra.mxu0 %v9712_v21  ;;  %v9780_v21 = vld [vmem:[#allocation14 + $0x414] ss:$20 sps:$4 sm:$0xff]  }
 0x451   :  { %6763 = vmatprep.subr.bf16.mxu0 %v9717_v25  ;;  %v9778_v25 = vld [vmem:[#allocation14 + $0x410] ss:$20 sps:$4 sm:$0xff]  }
 0x453   :  { %8763 = vmatpush3.bf16.msra.mxu1 %v9684_v27  ;;  %v9783_v27 = vld [vmem:[#allocation14 + $0x3ec] ss:$20 sps:$4 sm:$0xff]  }
 0x454   :  { %8764 = vmatprep.subr.bf16.mxu1 %v10237_v17  ;;  %6764 = vmatpush2.bf16.msra.mxu0 %v9715_v29  ;;  %v9781_v29 = vld [vmem:[#allocation14 + $0x3e8] ss:$20 sps:$4 sm:$0xff]  }
 0x455   :  { %6765 = vmatprep.subr.bf16.mxu0 %v9720_v62  ;;  %v10538_v62 = vld [vmem:[#allocation13] sm:$0x1f] }
 0x457   :  { %8765 = vmatpush3.bf16.msra.mxu1 %v9685_v31  ;;  %v9786_v31 = vld [vmem:[#allocation14 + $0x3c4] ss:$20 sps:$4 sm:$0xff]  }
 0x458   :  { %8766 = vmatprep.subr.bf16.mxu1 %v10237_v17  ;;  %6766 = vmatpush2.bf16.msra.mxu0 %v9718_v36  ;;  %v4002_v36 = vrot.slane %v10538_v62, %v10361_v20 }
 0x459   :  { %6767 = vmatprep.subr.bf16.mxu0 %v9723_v32  ;;  %v9784_v32 = vld [vmem:[#allocation14 + $0x3c0] ss:$20 sps:$4 sm:$0xff]  }
 0x45b   :  { %8767 = vmatpush3.bf16.msra.mxu1 %v9686_v59  ;;  %v9789_v59 = vld [vmem:[#allocation14 + $0x124] ss:$20 sps:$4 sm:$0xff]  }
 0x45c   :  { %8768 = vmatprep.subr.bf16.mxu1 %v10237_v17  ;;  %6768 = vmatpush2.bf16.msra.mxu0 %v9721_v52  ;;  %v4006_v52 = vrot.slane %v10538_v62, %v10365_v22 }
 0x45d   :  { %6769 = vmatprep.subr.bf16.mxu0 %v9726_v41  ;;  %v5099_v41 = vadd.f32 %v10517_v58, %v4002_v36 }
 0x45f   :  { %8769 = vmatpush3.bf16.msra.mxu1 %v9687_v35  ;;  %v5101_v35 = vadd.f32 %v10520_v1, %v4006_v52  ;;  %v9816_v1 = vld [vmem:[#allocation14 + $0x5f4] ss:$20 sps:$4 sm:$0xff]  }
 0x460   :  { %8770 = vmatprep.subr.bf16.mxu1 %v10237_v17  ;;  %6770 = vmatpush2.bf16.msra.mxu0 %v9724_v37 }
 0x461   :  { %6771 = vmatprep.subr.bf16.mxu0 %v9729_v44 }
 0x463   :  { %8771 = vmatpush3.bf16.msra.mxu1 %v9688_v42 }
 0x464   :  { %8772 = vmatprep.subr.bf16.mxu1 %v10237_v17  ;;  %6772 = vmatpush2.bf16.msra.mxu0 %v9727_v43 }
 0x465   :  { %6773 = vmatprep.subr.bf16.mxu0 %v9732_v45 }
 0x467   :  { %8773 = vmatpush3.bf16.msra.mxu1 %v9689_v47 }
 0x468   :  { %8774 = vmatprep.subr.bf16.mxu1 %v10237_v17  ;;  %6774 = vmatpush2.bf16.msra.mxu0 %v9730_v48 }
 0x469   :  { %6775 = vmatprep.subr.bf16.mxu0 %v9735_v49 }
 0x46b   :  { %8775 = vmatpush3.bf16.msra.mxu1 %v9690_v50 }
 0x46c   :  { %6776 = vmatpush2.bf16.msra.mxu0 %v9733_v51  ;;  %6788 = vmatprep.subr.bf16.mxu1 %v9741_v53 }
 0x46d   :  { %6777 = vmatprep.subr.bf16.mxu0 %v9738_v54 }
 0x46e   :  { %8777 = vmatmul.mubr.bf16.vlgmr.msra.gmra.mxu1 %v10507_v33  ;;  %v9751_v33 = vld [vmem:[#allocation14 + $0x2f8] ss:$20 sps:$4 sm:$0xff]  }
 0x46f   :  { %6789 = vmatpush1.bf16.msra.mxu1 %v9739_v56  ;;  %v9808_v56 = vld [vmem:[#allocation14 + $0x618] ss:$20 sps:$4 sm:$0xff]  }
 0x470   :  { %6778 = vmatpush2.bf16.msra.mxu0 %v9736_v57  ;;  %6790 = vmatprep.subr.bf16.mxu1 %v9744_v28 }
 0x471   :  { %6829 = vmatprep.subr.bf16.mxu0 %v9810_v18 }
 0x473   :  { %v10534_v3 = vpop.f32.mrf.mxu0  ;;  %6791 = vmatpush1.bf16.msra.mxu1 %v9742_v60 }
 0x474   :  { %6792 = vmatprep.subr.bf16.mxu1 %v9747_v2  ;;  %v5140_v37 = vadd.f32 %v10534_v3, %v5099_v41  ;;  %v9814_v2 = vld [vmem:[#allocation14 + $0x5f0] ss:$20 sps:$4 sm:$0xff]   ;;  %v9822_v3 = vld [vmem:[#allocation14 + $0x5cc] ss:$20 sps:$4 sm:$0xff]  }
 0x475   :  { %v10536_v61 = vpop.f32.mrf.mxu0  ;;  %v9787_v41 = vld [vmem:[#allocation14 + $0x120] ss:$20 sps:$4 sm:$0xff]  }
 0x476   :  { %v5142_v42 = vadd.f32 %v10536_v61, %v5101_v35  ;;  %v9826_v61 = vld [vmem:[#allocation14 + $0x5a0] ss:$20 sps:$4 sm:$0xff]  }
 0x477   :  { %v5143_v55 = vpop.f32.mrf.mxu0  ;;  %6793 = vmatpush1.bf16.msra.mxu1 %v9745_v4  ;;  %v9820_v4 = vld [vmem:[#allocation14 + $0x5c8] ss:$20 sps:$4 sm:$0xff]  }
 0x478   :  { %6794 = vmatprep.subr.bf16.mxu1 %v9750_v38  ;;  %v9828_v38 = vld [vmem:[#allocation14 + $0x5a4] ss:$20 sps:$4 sm:$0xff]   ;;  %v9834_v55 = vld [vmem:[#allocation14 + $0x57c] ss:$20 sps:$4 sm:$0xff]  }
 0x479   :  { %v5144_v6 = vpop.f32.mrf.mxu0 }
 0x47a   :  { %v9838_v6 = vld [vmem:[#allocation14 + $0x550] ss:$20 sps:$4 sm:$0xff]  }
 0x47b   :  { %6795 = vmatpush1.bf16.msra.mxu1 %v9748_v5  ;;  %v9832_v5 = vld [vmem:[#allocation14 + $0x578] ss:$20 sps:$4 sm:$0xff]  }
 0x47c   :  { %6796 = vmatprep.subr.bf16.mxu1 %v9753_v34  ;;  %v9840_v34 = vld [vmem:[#allocation14 + $0x554] ss:$20 sps:$4 sm:$0xff]  }
 0x47f   :  { %6797 = vmatpush1.bf16.msra.mxu1 %v9751_v33  ;;  %v9846_v33 = vld [vmem:[#allocation14 + $0x52c] ss:$20 sps:$4 sm:$0xff]  }
 0x480   :  { %6798 = vmatprep.subr.bf16.mxu1 %v9756_v7  ;;  %v9844_v7 = vld [vmem:[#allocation14 + $0x528] ss:$20 sps:$4 sm:$0xff]  }
 0x483   :  { %6799 = vmatpush1.bf16.msra.mxu1 %v9754_v39  ;;  %v9852_v39 = vld [vmem:[#allocation14 + $0x504] ss:$20 sps:$4 sm:$0xff]  }
 0x484   :  { %6800 = vmatprep.subr.bf16.mxu1 %v9759_v8  ;;  %v9850_v8 = vld [vmem:[#allocation14 + $0x500] ss:$20 sps:$4 sm:$0xff]  }
 0x487   :  { %6801 = vmatpush1.bf16.msra.mxu1 %v9757_v9  ;;  %v9858_v9 = vld [vmem:[#allocation14 + $0x3a4] ss:$20 sps:$4 sm:$0xff]  }
 0x488   :  { %6802 = vmatprep.subr.bf16.mxu1 %v9762_v10 }
 0x48b   :  { %6803 = vmatpush1.bf16.msra.mxu1 %v9760_v11 }
 0x48c   :  { %6804 = vmatprep.subr.bf16.mxu1 %v9765_v12 }
 0x48f   :  { %6805 = vmatpush2.bf16.msra.mxu1 %v9763_v13 }
 0x490   :  { %6806 = vmatprep.subr.bf16.mxu1 %v9768_v14  ;;  %v4010_v14 = vrot.slane %v10538_v62, %v10371_v26 }
 0x493   :  { %6807 = vmatpush2.bf16.msra.mxu1 %v9766_v15  ;;  %v4014_v15 = vrot.slane %v10538_v62, %v10373_v30 }
 0x494   :  { %6808 = vmatprep.subr.bf16.mxu1 %v9771_v16 }
 0x497   :  { %6809 = vmatpush2.bf16.msra.mxu1 %v9769_v46 }
 0x498   :  { %6810 = vmatprep.subr.bf16.mxu1 %v9774_v19 }
 0x49b   :  { %6811 = vmatpush2.bf16.msra.mxu1 %v9772_v23 }
 0x49c   :  { %6812 = vmatprep.subr.bf16.mxu1 %v9777_v24 }
 0x49f   :  { %6813 = vmatpush2.bf16.msra.mxu1 %v9775_v40 }
 0x4a0   :  { %6814 = vmatprep.subr.bf16.mxu1 %v9780_v21 }
 0x4a3   :  { %6815 = vmatpush2.bf16.msra.mxu1 %v9778_v25 }
 0x4a4   :  { %6816 = vmatprep.subr.bf16.mxu1 %v9783_v27 }
 0x4a7   :  { %6817 = vmatpush2.bf16.msra.mxu1 %v9781_v29 }
 0x4a8   :  { %6818 = vmatprep.subr.bf16.mxu1 %v9786_v31 }
 0x4ab   :  { %6819 = vmatpush2.bf16.msra.mxu1 %v9784_v32 }
 0x4ac   :  { %6870 = vmatprep.subr.bf16.mxu1 %v9789_v59 }
 0x4ae   :  { %v5180_v44 = vpop.f32.mrf.mxu1 }
 0x4af   :  { %v5181_v43 = vadd.f32 %v5180_v44, %v5140_v37  ;;  %v9792_v37 = vld [vmem:[#allocation14 + $0xfc] ss:$20 sps:$4 sm:$0xff]  }
 0x4b0   :  { %v5182_v45 = vpop.f32.mrf.mxu1 }
 0x4b1   :  { %v5183_v47 = vadd.f32 %v5182_v45, %v5142_v42  ;;  %v5430_v48 = vmax.f32 %v5181_v43, 0.0  ;;  %v9790_v42 = vld [vmem:[#allocation14 + $0xf8] ss:$20 sps:$4 sm:$0xff]   ;;  %v9795_v43 = vld [vmem:[#allocation14 + $0xd4] ss:$20 sps:$4 sm:$0xff]  }
 0x4b2   :  { %v5184_v49 = vpop.f32.mrf.mxu1  ;;  %v9793_v45 = vld [vmem:[#allocation14 + $0xd0] ss:$20 sps:$4 sm:$0xff]  }
 0x4b3   :  { %v5431_v50 = vmax.f32 %v5183_v47, 0.0  ;;  %v5221_v51 = vpop.f32.mrf.mxu0  ;;  %v10550_v57 = vpack.c.bf16 %v5430_v48, %v5430_v48  ;;  %v9798_v47 = vld [vmem:[#allocation14 + $0xac] ss:$20 sps:$4 sm:$0xff]   ;;  %v9796_v48 = vld [vmem:[#allocation14 + $0xa8] ss:$20 sps:$4 sm:$0xff]  }
 0x4b4   :  { %v5185_v53 = vpop.f32.mrf.mxu1  ;;  %v5222_v16 = vadd.f32 %v5221_v51, %v4010_v14  ;;  %v9801_v49 = vld [vmem:[#allocation14 + $0x84] ss:$20 sps:$4 sm:$0xff]   ;;  %v9804_v51 = vld [vmem:[#allocation14 + $0x5c] ss:$20 sps:$4 sm:$0xff]  }
 0x4b5   :  { %v10548_v54 = vpack.c.bf16 %v5431_v50, %v5431_v50  ;;  %v5223_v58 = vpop.f32.mrf.mxu0  ;;  %v9799_v50 = vld [vmem:[#allocation14 + $0x80] ss:$20 sps:$4 sm:$0xff]   ;;  %v9802_v53 = vld [vmem:[#allocation14 + $0x58] ss:$20 sps:$4 sm:$0xff]  }
 0x4b6   :  { %v5224_v18 = vadd.f32 %v5223_v58, %v4014_v15  ;;  %v9807_v58 = vld [vmem:[#allocation14 + $0x34] ss:$20 sps:$4 sm:$0xff]   ;;  %v9847_v14 = vld [vmem:[#allocation14 + $0x198] ss:$20 sps:$4 sm:$0xff]  }
 0x4b7   :  { %v5225_v28 = vpop.f32.mrf.mxu0  ;;  %6779 = vmatprep.mubr.bf16.mxu0 %v10548_v54  ;;  %v9855_v15 = vld [vmem:[#allocation14 + $0x174] ss:$20 sps:$4 sm:$0xff]  }
 0x4b8   :  { %6780 = vmatmul.mubr.bf16.vlgmr.msra.gmra.mxu0 %v10550_v57 }
 0x4b9   :  { %v5226_v60 = vpop.f32.mrf.mxu0  ;;  %6830 = vmatpush1.bf16.msra.mxu0 %v9808_v56  ;;  %6861 = vmatprep.mubr.bf16.mxu0 %v10236_v0 }
 0x4ba   :  { %6831 = vmatprep.subr.bf16.mxu0 %v9816_v1  ;;  %v9805_v1 = vld [vmem:[#allocation14 + $0x30] ss:$20 sps:$4 sm:$0xff]   ;;  %v9813_v60 = vld [vmem:[#allocation14 + $0xc] ss:$20 sps:$4 sm:$0xff]  }
 0x4bd   :  { %6832 = vmatpush1.bf16.msra.mxu0 %v9814_v2 }
 0x4be   :  { %6833 = vmatprep.subr.bf16.mxu0 %v9822_v3  ;;  %v9811_v3 = vld [vmem:[#allocation14 + $0x8] ss:$20 sps:$4 sm:$0xff]  }
 0x4c1   :  { %6834 = vmatpush1.bf16.msra.mxu0 %v9820_v4 }
 0x4c2   :  { %6835 = vmatprep.subr.bf16.mxu0 %v9828_v38  ;;  %v9819_v38 = vld [vmem:[#allocation14 + $0x264] ss:$20 sps:$4 sm:$0xff]  }
 0x4c5   :  { %6836 = vmatpush1.bf16.msra.mxu0 %v9826_v61  ;;  %v9817_v61 = vld [vmem:[#allocation14 + $0x260] ss:$20 sps:$4 sm:$0xff]  }
 0x4c6   :  { %6837 = vmatprep.subr.bf16.mxu0 %v9834_v55  ;;  %v9825_v55 = vld [vmem:[#allocation14 + $0x23c] ss:$20 sps:$4 sm:$0xff]  }
 0x4c9   :  { %6838 = vmatpush1.bf16.msra.mxu0 %v9832_v5  ;;  %v9823_v5 = vld [vmem:[#allocation14 + $0x238] ss:$20 sps:$4 sm:$0xff]  }
 0x4ca   :  { %6839 = vmatprep.subr.bf16.mxu0 %v9840_v34  ;;  %v9831_v34 = vld [vmem:[#allocation14 + $0x214] ss:$20 sps:$4 sm:$0xff]  }
 0x4cd   :  { %6840 = vmatpush1.bf16.msra.mxu0 %v9838_v6  ;;  %v9829_v6 = vld [vmem:[#allocation14 + $0x210] ss:$20 sps:$4 sm:$0xff]  }
 0x4ce   :  { %6841 = vmatprep.subr.bf16.mxu0 %v9846_v33  ;;  %v9837_v33 = vld [vmem:[#allocation14 + $0x1ec] ss:$20 sps:$4 sm:$0xff]  }
 0x4d1   :  { %6842 = vmatpush1.bf16.msra.mxu0 %v9844_v7  ;;  %v9835_v7 = vld [vmem:[#allocation14 + $0x1e8] ss:$20 sps:$4 sm:$0xff]  }
 0x4d2   :  { %6843 = vmatprep.subr.bf16.mxu0 %v9852_v39  ;;  %v9843_v39 = vld [vmem:[#allocation14 + $0x1c4] ss:$20 sps:$4 sm:$0xff]  }
 0x4d3   :  { %v5303_v10 = vpop.f32.mrf.mxu0 }
 0x4d5   :  { %v5305_v11 = vpop.f32.mrf.mxu0  ;;  %6844 = vmatpush1.bf16.msra.mxu0 %v9850_v8  ;;  %v4018_v8 = vrot.slane %v10538_v62, %v10393_v63  ;;  %v9861_v62 = vld [vmem:[#allocation14 + $0x14c] ss:$20 sps:$4 sm:$0xff]  }
 0x4d6   :  { %6911 = vmatprep.subr.bf16.mxu0 %v9858_v9 }
 0x4d7   :  { %v5307_v12 = vpop.f32.mrf.mxu0 }
 0x4d9   :  { %v5308_v13 = vpop.f32.mrf.mxu0 }
 0x4ee   :  { %v5262_v46 = vpop.f32.mrf.mxu1 }
 0x4ef   :  { %v5263_v19 = vadd.f32 %v5262_v46, %v5222_v16 }
 0x4f0   :  { %v5264_v23 = vpop.f32.mrf.mxu1 }
 0x4f1   :  { %v5304_v24 = vadd.f32 %v5303_v10, %v5263_v19  ;;  %v5265_v40 = vadd.f32 %v5264_v23, %v5224_v18  ;;  %v9841_v10 = vld [vmem:[#allocation14 + $0x1c0] ss:$20 sps:$4 sm:$0xff]   ;;  %v9853_v19 = vld [vmem:[#allocation14 + $0x170] ss:$20 sps:$4 sm:$0xff]  }
 0x4f2   :  { %v5266_v21 = vpop.f32.mrf.mxu1 }
 0x4f3   :  { %v5306_v25 = vadd.f32 %v5305_v11, %v5265_v40  ;;  %v10559_v27 = vpop.f32.mrf.mxu0  ;;  %v5432_v29 = vmax.f32 %v5304_v24, 0.0  ;;  %v9849_v11 = vld [vmem:[#allocation14 + $0x19c] ss:$20 sps:$4 sm:$0xff]   ;;  %v9856_v21 = vld [vmem:[#allocation14 + $0x3a0] ss:$20 sps:$4 sm:$0xff]  }
 0x4f4   :  { %v5267_v31 = vpop.f32.mrf.mxu1 }
 0x4f5   :  { %v5433_v36 = vmax.f32 %v5306_v25, 0.0  ;;  %v10561_v32 = vpop.f32.mrf.mxu0  ;;  %v10565_v35 = vpack.c.bf16 %v5432_v29, %v5432_v29  ;;  %v9859_v29 = vld [vmem:[#allocation14 + $0x148] ss:$20 sps:$4 sm:$0xff]  }
 0x4f6   :  { %v8593_v13 = vadd.f32 %v10561_v32, %v10559_v27  ;;  %v9864_v27 = vld [vmem:[#allocation14 + $0x37c] ss:$20 sps:$4 sm:$0xff]   ;;  %v9862_v32 = vld [vmem:[#allocation14 + $0x378] ss:$20 sps:$4 sm:$0xff]  }
 0x4f7   :  { %v10563_v59 = vpack.c.bf16 %v5433_v36, %v5433_v36  ;;  %v8594_v52 = vpop.f32.mrf.mxu0  ;;  %v9867_v36 = vld [vmem:[#allocation14 + $0x624] ss:$20 sps:$4 sm:$0xff]  }
 0x4f8   :  { %v9865_v52 = vld [vmem:[#allocation14 + $0x620] ss:$20 sps:$4 sm:$0xff]  }
 0x4f9   :  { %v8595_v44 = vpop.f32.mrf.mxu0  ;;  %6820 = vmatprep.mubr.bf16.mxu1 %v10563_v59 }
 0x4fa   :  { %6821 = vmatmul.mubr.bf16.vlgmr.msra.gmra.mxu1 %v10565_v35  ;;  %v9868_v44 = vld [vmem:[#allocation14 + $0x350] ss:$20 sps:$4 sm:$0xff]  }
 0x4fb   :  { %6871 = vmatpush1.bf16.msra.mxu1 %v9787_v41  ;;  %6902 = vmatprep.mubr.bf16.mxu1 %v10548_v54  ;;  %v9870_v41 = vld [vmem:[#allocation14 + $0x354] ss:$20 sps:$4 sm:$0xff]  }
 0x4fc   :  { %6872 = vmatprep.subr.bf16.mxu1 %v9792_v37  ;;  %v9873_v37 = vld [vmem:[#allocation14 + $0x5fc] ss:$20 sps:$4 sm:$0xff]  }
 0x4ff   :  { %6873 = vmatpush1.bf16.msra.mxu1 %v9790_v42  ;;  %v9871_v42 = vld [vmem:[#allocation14 + $0x5f8] ss:$20 sps:$4 sm:$0xff]  }
 0x500   :  { %6874 = vmatprep.subr.bf16.mxu1 %v9795_v43  ;;  %v9876_v43 = vld [vmem:[#allocation14 + $0x32c] ss:$20 sps:$4 sm:$0xff]  }
 0x503   :  { %6875 = vmatpush1.bf16.msra.mxu1 %v9793_v45  ;;  %v9879_v45 = vld [vmem:[#allocation14 + $0x5d4] ss:$20 sps:$4 sm:$0xff]  }
 0x504   :  { %6876 = vmatprep.subr.bf16.mxu1 %v9798_v47  ;;  %v9874_v47 = vld [vmem:[#allocation14 + $0x328] ss:$20 sps:$4 sm:$0xff]  }
 0x507   :  { %6877 = vmatpush1.bf16.msra.mxu1 %v9796_v48  ;;  %v9877_v48 = vld [vmem:[#allocation14 + $0x5d0] ss:$20 sps:$4 sm:$0xff]  }
 0x508   :  { %6878 = vmatprep.subr.bf16.mxu1 %v9801_v49  ;;  %v9882_v49 = vld [vmem:[#allocation14 + $0x304] ss:$20 sps:$4 sm:$0xff]  }
 0x50b   :  { %6879 = vmatpush1.bf16.msra.mxu1 %v9799_v50  ;;  %v9885_v50 = vld [vmem:[#allocation14 + $0x5ac] ss:$20 sps:$4 sm:$0xff]  }
 0x50c   :  { %6880 = vmatprep.subr.bf16.mxu1 %v9804_v51  ;;  %v9880_v51 = vld [vmem:[#allocation14 + $0x300] ss:$20 sps:$4 sm:$0xff]  }
 0x50e   :  { %v8569_v56 = vpop.f32.mrf.mxu1 }
 0x50f   :  { %6881 = vmatpush1.bf16.msra.mxu1 %v9802_v53  ;;  %v9883_v53 = vld [vmem:[#allocation14 + $0x5a8] ss:$20 sps:$4 sm:$0xff]  }
 0x510   :  { %v8570_v28 = vpop.f32.mrf.mxu1  ;;  %6882 = vmatprep.subr.bf16.mxu1 %v9807_v58  ;;  %v9888_v58 = vld [vmem:[#allocation14 + $0x2dc] ss:$20 sps:$4 sm:$0xff]  }
 0x511   :  { %v8571_v9 = vadd.f32 %v8570_v28, %v8569_v56  ;;  %v9891_v56 = vld [vmem:[#allocation14 + $0x584] ss:$20 sps:$4 sm:$0xff]   ;;  %v9894_v28 = vld [vmem:[#allocation14 + $0x2b4] ss:$20 sps:$4 sm:$0xff]  }
 0x512   :  { %v8572_v2 = vpop.f32.mrf.mxu1 }
 0x513   :  { %6883 = vmatpush1.bf16.msra.mxu1 %v9805_v1  ;;  %v5345_v12 = vadd.f32 %v8571_v9, %v4018_v8  ;;  %v9886_v1 = vld [vmem:[#allocation14 + $0x2d8] ss:$20 sps:$4 sm:$0xff]   ;;  %v9892_v2 = vld [vmem:[#allocation14 + $0x2b0] ss:$20 sps:$4 sm:$0xff]   ;;  %v9914_v9 = vld [vmem:[#allocation14 + $0x3a8] ss:$20 sps:$4 sm:$0xff]  }
 0x514   :  { %v8573_v4 = vpop.f32.mrf.mxu1  ;;  %6884 = vmatprep.subr.bf16.mxu1 %v9813_v60  ;;  %v9897_v60 = vld [vmem:[#allocation14 + $0x55c] ss:$20 sps:$4 sm:$0xff]   ;;  %v9910_v8 = vld [vmem:[#allocation14 + $0x4b8] ss:$20 sps:$4 sm:$0xff]  }
 0x515   :  { %v5385_v16 = vadd.f32 %v8593_v13, %v5345_v12  ;;  %v9900_v4 = vld [vmem:[#allocation14 + $0x28c] ss:$20 sps:$4 sm:$0xff]   ;;  %v9915_v12 = vld [vmem:[#allocation14 + $0x490] ss:$20 sps:$4 sm:$0xff]  }
 0x516   :  { %v9919_v13 = vld [vmem:[#allocation14 + $0x380] ss:$20 sps:$4 sm:$0xff]  }
 0x517   :  { %6885 = vmatpush1.bf16.msra.mxu1 %v9811_v3  ;;  %v9895_v3 = vld [vmem:[#allocation14 + $0x558] ss:$20 sps:$4 sm:$0xff]  }
 0x518   :  { %6886 = vmatprep.subr.bf16.mxu1 %v9819_v38  ;;  %v9903_v38 = vld [vmem:[#allocation14 + $0x534] ss:$20 sps:$4 sm:$0xff]  }
 0x51b   :  { %6887 = vmatpush2.bf16.msra.mxu1 %v9817_v61  ;;  %v9898_v61 = vld [vmem:[#allocation14 + $0x288] ss:$20 sps:$4 sm:$0xff]  }
 0x51c   :  { %6888 = vmatprep.subr.bf16.mxu1 %v9825_v55  ;;  %v9901_v55 = vld [vmem:[#allocation14 + $0x530] ss:$20 sps:$4 sm:$0xff]  }
 0x51f   :  { %6889 = vmatpush2.bf16.msra.mxu1 %v9823_v5  ;;  %v9906_v5 = vld [vmem:[#allocation14 + $0x4e4] ss:$20 sps:$4 sm:$0xff]  }
 0x520   :  { %6890 = vmatprep.subr.bf16.mxu1 %v9831_v34  ;;  %v9909_v34 = vld [vmem:[#allocation14 + $0x50c] ss:$20 sps:$4 sm:$0xff]  }
 0x523   :  { %6891 = vmatpush2.bf16.msra.mxu1 %v9829_v6  ;;  %v9904_v6 = vld [vmem:[#allocation14 + $0x4e0] ss:$20 sps:$4 sm:$0xff]  }
 0x524   :  { %6892 = vmatprep.subr.bf16.mxu1 %v9837_v33  ;;  %v9907_v33 = vld [vmem:[#allocation14 + $0x508] ss:$20 sps:$4 sm:$0xff]  }
 0x527   :  { %6893 = vmatpush2.bf16.msra.mxu1 %v9835_v7  ;;  %v9912_v7 = vld [vmem:[#allocation14 + $0x4bc] ss:$20 sps:$4 sm:$0xff]  }
 0x528   :  { %6894 = vmatprep.subr.bf16.mxu1 %v9843_v39  ;;  %v9913_v39 = vld [vmem:[#allocation14 + $0x4e8] ss:$20 sps:$4 sm:$0xff]  }
 0x52b   :  { %6895 = vmatpush2.bf16.msra.mxu1 %v9841_v10  ;;  %v9917_v10 = vld [vmem:[#allocation14 + $0x494] ss:$20 sps:$4 sm:$0xff]  }
 0x52c   :  { %6896 = vmatprep.subr.bf16.mxu1 %v9849_v11  ;;  %v9918_v11 = vld [vmem:[#allocation14 + $0x4c0] ss:$20 sps:$4 sm:$0xff]  }
 0x52e   :  { %v5424_v46 = vpop.f32.mrf.mxu1 }
 0x52f   :  { %v5425_v18 = vadd.f32 %v5424_v46, %v5385_v16  ;;  %6897 = vmatpush2.bf16.msra.mxu1 %v9847_v14  ;;  %v9922_v14 = vld [vmem:[#allocation14 + $0x46c] ss:$20 sps:$4 sm:$0xff]   ;;  %v9920_v16 = vld [vmem:[#allocation14 + $0x468] ss:$20 sps:$4 sm:$0xff]  }
 0x530   :  { %v8778_v23 = vpop.f32.mrf.mxu1  ;;  %6898 = vmatprep.subr.bf16.mxu1 %v9855_v15  ;;  %v9923_v15 = vld [vmem:[#allocation14 + $0x498] ss:$20 sps:$4 sm:$0xff]  }
 0x531   :  { %v5434_v24 = vmax.f32 %v5425_v18, 0.0  ;;  %v9924_v46 = vld [vmem:[#allocation14 + $0x358] ss:$20 sps:$4 sm:$0xff]   ;;  %v9925_v23 = vld [vmem:[#allocation14 + $0x440] ss:$20 sps:$4 sm:$0xff]  }
 0x532   :  { %v5427_v40 = vpop.f32.mrf.mxu1  ;;  %v9927_v18 = vld [vmem:[#allocation14 + $0x444] ss:$20 sps:$4 sm:$0xff]  }
 0x533   :  { %v10574_v25 = vpack.c.bf16 %v5434_v24, %v5434_v24  ;;  %6899 = vmatpush2.bf16.msra.mxu1 %v9853_v19  ;;  %v9928_v19 = vld [vmem:[#allocation14 + $0x470] ss:$20 sps:$4 sm:$0xff]   ;;  %v9930_v40 = vld [vmem:[#allocation14 + $0x418] ss:$20 sps:$4 sm:$0xff]  }
 0x534   :  { %v8779_v31 = vpop.f32.mrf.mxu1  ;;  %6900 = vmatprep.subr.bf16.mxu1 %v9861_v62  ;;  %v9929_v62 = vld [vmem:[#allocation14 + $0x330] ss:$20 sps:$4 sm:$0xff]  }
 0x535   :  { %6862 = vmatmul.mubr.bf16.vlgmr.msra.gmra.mxu0 %v10574_v25  ;;  %v9932_v24 = vld [vmem:[#allocation14 + $0x41c] ss:$20 sps:$4 sm:$0xff]  }
 0x536   :  { %6912 = vmatpush1.bf16.msra.mxu0 %v9856_v21  ;;  %6943 = vmatprep.mubr.bf16.mxu0 %v10563_v59  ;;  %v9934_v21 = vld [vmem:[#allocation14 + $0x308] ss:$20 sps:$4 sm:$0xff]   ;;  %v9935_v31 = vld [vmem:[#allocation14 + $0x3f0] ss:$20 sps:$4 sm:$0xff]  }
 0x537   :  { %6901 = vmatpush2.bf16.msra.mxu1 %v9859_v29  ;;  %6913 = vmatprep.subr.bf16.mxu0 %v9864_v27  ;;  %v9937_v29 = vld [vmem:[#allocation14 + $0x3f4] ss:$20 sps:$4 sm:$0xff]  }
 0x538   :  { %6952 = vmatprep.subr.bf16.mxu1 %v9867_v36  ;;  %v9938_v27 = vld [vmem:[#allocation14 + $0x420] ss:$20 sps:$4 sm:$0xff]  }
 0x539   :  { %v9939_v36 = vld [vmem:[#allocation14 + $0x2e0] ss:$20 sps:$4 sm:$0xff]  }
 0x53a   :  { %6903 = vmatmul.mubr.bf16.vlgmr.msra.gmra.mxu1 %v10550_v57  ;;  %6914 = vmatpush1.bf16.msra.mxu0 %v9862_v32  ;;  %v9942_v32 = vld [vmem:[#allocation14 + $0x3cc] ss:$20 sps:$4 sm:$0xff]  }
 0x53b   :  { %6953 = vmatpush1.bf16.msra.mxu1 %v9865_v52  ;;  %6915 = vmatprep.subr.bf16.mxu0 %v9870_v41  ;;  %v9943_v52 = vld [vmem:[#allocation14 + $0x3f8] ss:$20 sps:$4 sm:$0xff]   ;;  %v9940_v41 = vld [vmem:[#allocation14 + $0x3c8] ss:$20 sps:$4 sm:$0xff]  }
 0x53c   :  { %6954 = vmatprep.subr.bf16.mxu1 %v9873_v37  ;;  %6984 = vmatprep.mubr.bf16.mxu1 %v10236_v0  ;;  %v9889_v0 = vld [vmem:[#allocation14 + $0x580] ss:$20 sps:$4 sm:$0xff]   ;;  %v9944_v37 = vld [vmem:[#allocation14 + $0x2b8] ss:$20 sps:$4 sm:$0xff]  }
 0x53e   :  { %6916 = vmatpush1.bf16.msra.mxu0 %v9868_v44  ;;  %v9945_v44 = vld [vmem:[#allocation14 + $0x268] ss:$20 sps:$4 sm:$0xff]  }
 0x53f   :  { %6955 = vmatpush1.bf16.msra.mxu1 %v9871_v42  ;;  %6917 = vmatprep.subr.bf16.mxu0 %v9876_v43  ;;  %v9947_v42 = vld [vmem:[#allocation14 + $0x3d0] ss:$20 sps:$4 sm:$0xff]   ;;  %v9946_v43 = vld [vmem:[#allocation14 + $0x128] ss:$20 sps:$4 sm:$0xff]  }
 0x540   :  { %6956 = vmatprep.subr.bf16.mxu1 %v9879_v45  ;;  %v9948_v45 = vld [vmem:[#allocation14 + $0x290] ss:$20 sps:$4 sm:$0xff]  }
 0x542   :  { %6918 = vmatpush1.bf16.msra.mxu0 %v9874_v47  ;;  %v9949_v47 = vld [vmem:[#allocation14 + $0x240] ss:$20 sps:$4 sm:$0xff]  }
 0x543   :  { %6957 = vmatpush1.bf16.msra.mxu1 %v9877_v48  ;;  %6919 = vmatprep.subr.bf16.mxu0 %v9882_v49  ;;  %v9971_v48 = vld [vmem:[#allocation16 + $0x78] sm:$0xff]   ;;  %v9950_v49 = vld [vmem:[#allocation14 + $0x100] ss:$20 sps:$4 sm:$0xff]  }
 0x544   :  { %6958 = vmatprep.subr.bf16.mxu1 %v9885_v50  ;;  %v9951_v50 = vld [vmem:[#allocation14 + $0x218] ss:$20 sps:$4 sm:$0xff]  }
 0x546   :  { %6920 = vmatpush1.bf16.msra.mxu0 %v9880_v51  ;;  %v9972_v51 = vld [vmem:[#allocation16 + $0x38] sm:$0xff]  }
 0x547   :  { %6959 = vmatpush1.bf16.msra.mxu1 %v9883_v53  ;;  %6921 = vmatprep.subr.bf16.mxu0 %v9888_v58  ;;  %v9973_v58 = vld [vmem:[#allocation16 + $0x70] sm:$0xff]  }
 0x548   :  { %6960 = vmatprep.subr.bf16.mxu1 %v9891_v56 }
 0x54a   :  { %6922 = vmatpush1.bf16.msra.mxu0 %v9886_v1  ;;  %v9952_v1 = vld [vmem:[#allocation14 + $0xd8] ss:$20 sps:$4 sm:$0xff]  }
 0x54b   :  { %6961 = vmatpush1.bf16.msra.mxu1 %v9889_v0  ;;  %6923 = vmatprep.subr.bf16.mxu0 %v9894_v28  ;;  %v9953_v0 = vld [vmem:[#allocation14 + $0x1f0] ss:$20 sps:$4 sm:$0xff]  }
 0x54c   :  { %6962 = vmatprep.subr.bf16.mxu1 %v9897_v60  ;;  %v9974_v28 = vld [vmem:[#allocation16 + $0x30] sm:$0xff]   ;;  %v9975_v60 = vld [vmem:[#allocation16 + $0x68] sm:$0xff]  }
 0x54e   :  { %6924 = vmatpush1.bf16.msra.mxu0 %v9892_v2 }
 0x54f   :  { %6963 = vmatpush1.bf16.msra.mxu1 %v9895_v3  ;;  %6925 = vmatprep.subr.bf16.mxu0 %v9900_v4  ;;  %v9954_v3 = vld [vmem:[#allocation14 + $0xb0] ss:$20 sps:$4 sm:$0xff]   ;;  %v9955_v4 = vld [vmem:[#allocation14 + $0x1c8] ss:$20 sps:$4 sm:$0xff]  }
 0x550   :  { %6964 = vmatprep.subr.bf16.mxu1 %v9903_v38  ;;  %v9976_v38 = vld [vmem:[#allocation16 + $0x28] sm:$0xff]  }
 0x552   :  { %6926 = vmatpush1.bf16.msra.mxu0 %v9898_v61  ;;  %v9977_v61 = vld [vmem:[#allocation16 + $0x60] sm:$0xff]  }
 0x553   :  { %6965 = vmatpush1.bf16.msra.mxu1 %v9901_v55  ;;  %6927 = vmatprep.subr.bf16.mxu0 %v9906_v5  ;;  %v9957_v55 = vld [vmem:[#allocation14 + $0x1a0] ss:$20 sps:$4 sm:$0xff]  }
 0x554   :  { %6966 = vmatprep.subr.bf16.mxu1 %v9909_v34  ;;  %v9978_v5 = vld [vmem:[#allocation16 + $0x20] sm:$0xff]   ;;  %v9979_v34 = vld [vmem:[#allocation16 + $0x58] sm:$0xff]  }
 0x556   :  { %6928 = vmatpush2.bf16.msra.mxu0 %v9904_v6  ;;  %v9958_v6 = vld [vmem:[#allocation14 + $0x60] ss:$20 sps:$4 sm:$0xff]  }
 0x557   :  { %6967 = vmatpush1.bf16.msra.mxu1 %v9907_v33  ;;  %6929 = vmatprep.subr.bf16.mxu0 %v9912_v7  ;;  %v9959_v33 = vld [vmem:[#allocation14 + $0x178] ss:$20 sps:$4 sm:$0xff]  }
 0x558   :  { %8628 = vmatprep.subr.bf16.mxu1 %v9913_v39  ;;  %v9980_v7 = vld [vmem:[#allocation16 + $0x18] sm:$0xff]   ;;  %v9981_v39 = vld [vmem:[#allocation16 + $0x50] sm:$0xff]  }
 0x55a   :  { %6930 = vmatpush2.bf16.msra.mxu0 %v9910_v8  ;;  %6985 = vmatmul.mubr.bf16.vlgmr.msra.gmra.mxu1 %v10574_v25  ;;  %v9960_v8 = vld [vmem:[#allocation14 + $0x38] ss:$20 sps:$4 sm:$0xff]  }
 0x55b   :  { %8629 = vmatpush3.bf16.msra.mxu1 %v9914_v9  ;;  %7065 = vmatprep.mubr.bf16.mxu1 %v10563_v59  ;;  %v9933_v59 = vld [vmem:[#allocation14 + $0x448] ss:$20 sps:$4 sm:$0xff]   ;;  %v9961_v9 = vld [vmem:[#allocation14 + $0x150] ss:$20 sps:$4 sm:$0xff]  }
 0x55c   :  { %6931 = vmatprep.subr.bf16.mxu0 %v9917_v10  ;;  %8630 = vmatprep.subr.bf16.mxu1 %v9918_v11  ;;  %v9982_v10 = vld [vmem:[#allocation16 + $0x10] sm:$0xff]   ;;  %v9983_v11 = vld [vmem:[#allocation16 + $0x48] sm:$0xff]  }
 0x55e   :  { %6932 = vmatpush2.bf16.msra.mxu0 %v9915_v12  ;;  %v9962_v12 = vld [vmem:[#allocation14 + $0x10] ss:$20 sps:$4 sm:$0xff]  }
 0x55f   :  { %8631 = vmatpush3.bf16.msra.mxu1 %v9919_v13  ;;  %6933 = vmatprep.subr.bf16.mxu0 %v9922_v14  ;;  %v9984_v13 = vld [vmem:[#allocation16 + $0x8] sm:$0xff]   ;;  %v9985_v14 = vld [vmem:[#allocation16 + $0x40] sm:$0xff]  }
 0x560   :  { %8632 = vmatprep.subr.bf16.mxu1 %v9923_v15  ;;  %v9963_v15 = vld [vmem:[#allocation14 + $0x628] ss:$20 sps:$4 sm:$0xff]  }
 0x562   :  { %6934 = vmatpush2.bf16.msra.mxu0 %v9920_v16  ;;  %v9986_v16 = vld [vmem:[#allocation16] sm:$0xff]  }
 0x563   :  { %8633 = vmatpush3.bf16.msra.mxu1 %v9924_v46  ;;  %6935 = vmatprep.subr.bf16.mxu0 %v9927_v18  ;;  %v9964_v46 = vld [vmem:[#allocation14 + $0x600] ss:$20 sps:$4 sm:$0xff]   ;;  %v9965_v18 = vld [vmem:[#allocation14 + $0x5d8] ss:$20 sps:$4 sm:$0xff]  }
 0x564   :  { %8634 = vmatprep.subr.bf16.mxu1 %v9928_v19  ;;  %v9966_v19 = vld [vmem:[#allocation14 + $0x5b0] ss:$20 sps:$4 sm:$0xff]  }
 0x566   :  { %6936 = vmatpush2.bf16.msra.mxu0 %v9925_v23  ;;  %v9968_v23 = vld [vmem:[#allocation14 + $0x560] ss:$20 sps:$4 sm:$0xff]  }
 0x567   :  { %8635 = vmatpush3.bf16.msra.mxu1 %v9929_v62  ;;  %6937 = vmatprep.subr.bf16.mxu0 %v9932_v24  ;;  %v9969_v62 = vld [vmem:[#allocation14 + $0x538] ss:$20 sps:$4 sm:$0xff]   ;;  %v9970_v24 = vld [vmem:[#allocation14 + $0x510] ss:$20 sps:$4 sm:$0xff]  }
 0x568   :  { %8636 = vmatprep.subr.bf16.mxu1 %v9933_v59  ;;  %v9987_v59 = vld [vmem:[#allocation16 + $0xf8] sm:$0xff]  }
 0x56a   :  { %6938 = vmatpush2.bf16.msra.mxu0 %v9930_v40  ;;  %v9988_v40 = vld [vmem:[#allocation16 + $0xb8] sm:$0xff]  }
 0x56b   :  { %8637 = vmatpush3.bf16.msra.mxu1 %v9934_v21  ;;  %6939 = vmatprep.subr.bf16.mxu0 %v9937_v29  ;;  %v9989_v21 = vld [vmem:[#allocation16 + $0xf0] sm:$0xff]  }
 0x56c   :  { %8638 = vmatprep.subr.bf16.mxu1 %v9938_v27  ;;  %v9990_v29 = vld [vmem:[#allocation16 + $0xb0] sm:$0xff]   ;;  %v9991_v27 = vld [vmem:[#allocation16 + $0xe8] sm:$0xff]  }
 0x56e   :  { %6940 = vmatpush2.bf16.msra.mxu0 %v9935_v31 }
 0x56f   :  { %8639 = vmatpush3.bf16.msra.mxu1 %v9939_v36  ;;  %6941 = vmatprep.subr.bf16.mxu0 %v9942_v32  ;;  %v9992_v36 = vld [vmem:[#allocation16 + $0xa8] sm:$0xff]   ;;  %v9993_v32 = vld [vmem:[#allocation16 + $0xe0] sm:$0xff]  }
 0x570   :  { %8640 = vmatprep.subr.bf16.mxu1 %v9943_v52 }
 0x572   :  { %6942 = vmatpush2.bf16.msra.mxu0 %v9940_v41 }
 0x573   :  { %8641 = vmatpush3.bf16.msra.mxu1 %v9944_v37  ;;  %8606 = vmatprep.subr.bf16.mxu0 %v9945_v44  ;;  %v9994_v37 = vld [vmem:[#allocation16 + $0xa0] sm:$0xff]   ;;  %v9995_v44 = vld [vmem:[#allocation16 + $0xd8] sm:$0xff]  }
 0x574   :  { %8642 = vmatprep.subr.bf16.mxu1 %v9947_v42 }
 0x575   :  { %6944 = vmatmul.mubr.bf16.vlgmr.msra.gmra.mxu0 %v10565_v35 }
 0x576   :  { %8607 = vmatpush3.bf16.msra.mxu0 %v9946_v43  ;;  %7025 = vmatprep.mubr.bf16.mxu0 %v10548_v54  ;;  %v9996_v43 = vld [vmem:[#allocation16 + $0x98] sm:$0xff]  }
 0x577   :  { %8643 = vmatpush3.bf16.msra.mxu1 %v9948_v45  ;;  %8608 = vmatprep.subr.bf16.mxu0 %v9949_v47  ;;  %v9998_v45 = vld [vmem:[#allocation16 + $0x90] sm:$0xff]   ;;  %v9999_v47 = vld [vmem:[#allocation16 + $0xc8] sm:$0xff]  }
 0x578   :  { %v10584_v53 = vpop.f32.mrf.mxu0  ;;  %8659 = vmatprep.subr.bf16.mxu1 %v9971_v48  ;;  %v10000_v48 = vld [vmem:[#allocation16 + $0x88] sm:$0xff]  }
 0x57a   :  { %8609 = vmatpush3.bf16.msra.mxu0 %v9950_v49  ;;  %7066 = vmatmul.mubr.bf16.vlgmr.msra.gmra.mxu1 %v10565_v35  ;;  %v10587_v56 = vpop.f32.mrf.mxu0  ;;  %v9956_v35 = vld [vmem:[#allocation14 + $0x88] ss:$20 sps:$4 sm:$0xff]   ;;  %v10001_v49 = vld [vmem:[#allocation16 + $0xc0] sm:$0xff]  }
 0x57b   :  { %8610 = vmatprep.subr.bf16.mxu0 %v9951_v50  ;;  %8660 = vmatpush3.bf16.msra.mxu1 %v9972_v51  ;;  %v10002_v50 = vld [vmem:[#allocation16 + $0x80] sm:$0xff]  }
 0x57c   :  { %v6785_v54 = vpop.f32.mrf.mxu0  ;;  %8661 = vmatprep.subr.bf16.mxu1 %v9973_v58  ;;  %v10605_v51 = vld [vmem:[%s10644_s10] sm:$0x1f] }
 0x57d   :  { %v5685_v58 = vrot.slane %v10605_v51, %v10361_v20 }
 0x57e   :  { %8611 = vmatpush3.bf16.msra.mxu0 %v9952_v1  ;;  %v6786_v2 = vpop.f32.mrf.mxu0  ;;  %v5689_v1 = vrot.slane %v10605_v51, %v10365_v22 }
 0x57f   :  { %8612 = vmatprep.subr.bf16.mxu0 %v9953_v0  ;;  %8662 = vmatpush3.bf16.msra.mxu1 %v9974_v28  ;;  %v6782_v0 = vadd.f32 %v10584_v53, %v5685_v58 }
 0x580   :  { %8663 = vmatprep.subr.bf16.mxu1 %v9975_v60  ;;  %v6784_v28 = vadd.f32 %v10587_v56, %v5689_v1  ;;  %v10004_v56 = vld [vmem:[#allocation16 + $0x130] sm:$0xff]  }
 0x582   :  { %8613 = vmatpush3.bf16.msra.mxu0 %v9954_v3 }
 0x583   :  { %8614 = vmatprep.subr.bf16.mxu0 %v9955_v4  ;;  %8664 = vmatpush3.bf16.msra.mxu1 %v9976_v38 }
 0x584   :  { %8665 = vmatprep.subr.bf16.mxu1 %v9977_v61 }
 0x586   :  { %8615 = vmatpush3.bf16.msra.mxu0 %v9956_v35 }
 0x587   :  { %8616 = vmatprep.subr.bf16.mxu0 %v9957_v55  ;;  %8666 = vmatpush3.bf16.msra.mxu1 %v9978_v5 }
 0x588   :  { %8667 = vmatprep.subr.bf16.mxu1 %v9979_v34 }
 0x58a   :  { %8617 = vmatpush3.bf16.msra.mxu0 %v9958_v6 }
 0x58b   :  { %8618 = vmatprep.subr.bf16.mxu0 %v9959_v33  ;;  %8668 = vmatpush3.bf16.msra.mxu1 %v9980_v7  ;;  %v10003_v33 = vld [vmem:[#allocation16 + $0x138] sm:$0xff]  }
 0x58c   :  { %8669 = vmatprep.subr.bf16.mxu1 %v9981_v39  ;;  %v10005_v39 = vld [vmem:[#allocation16 + $0x128] sm:$0xff]  }
 0x58e   :  { %8619 = vmatpush3.bf16.msra.mxu0 %v9960_v8  ;;  %v10006_v8 = vld [vmem:[#allocation16 + $0x120] sm:$0xff]  }
 0x58f   :  { %8620 = vmatprep.subr.bf16.mxu0 %v9961_v9  ;;  %8670 = vmatpush3.bf16.msra.mxu1 %v9982_v10  ;;  %v10007_v9 = vld [vmem:[#allocation16 + $0x118] sm:$0xff]   ;;  %v10008_v10 = vld [vmem:[#allocation16 + $0x110] sm:$0xff]  }
 0x590   :  { %8671 = vmatprep.subr.bf16.mxu1 %v9983_v11  ;;  %v10009_v11 = vld [vmem:[#allocation16 + $0x108] sm:$0xff]  }
 0x592   :  { %8621 = vmatpush3.bf16.msra.mxu0 %v9962_v12  ;;  %v10010_v12 = vld [vmem:[#allocation16 + $0x100] sm:$0xff]  }
 0x593   :  { %8780 = vmatprep.subr.bf16.mxu0 %v10237_v17  ;;  %8672 = vmatpush3.bf16.msra.mxu1 %v9984_v13 }
 0x594   :  { %8673 = vmatprep.subr.bf16.mxu1 %v9985_v14 }
 0x595   :  { %7026 = vmatmul.mubr.bf16.vlgmr.msra.gmra.mxu0 %v10550_v57  ;;  %v9967_v57 = vld [vmem:[#allocation14 + $0x588] ss:$20 sps:$4 sm:$0xff]  }
 0x596   :  { %8781 = vmatpush3.bf16.msra.mxu0 %v9963_v15  ;;  %8796 = vmatprep.mubr.msk.bf16.mxu0 %vm10238_vm1, %v10237_v17 }
 0x597   :  { %8782 = vmatprep.subr.bf16.mxu0 %v10237_v17  ;;  %8674 = vmatpush3.bf16.msra.mxu1 %v9986_v16 }
 0x598   :  { %8800 = vmatprep.subr.bf16.mxu1 %v10237_v17 }
 0x59a   :  { %8783 = vmatpush3.bf16.msra.mxu0 %v9964_v46  ;;  %v5693_v46 = vrot.slane %v10605_v51, %v10371_v26 }
 0x59b   :  { %8784 = vmatprep.subr.bf16.mxu0 %v10237_v17 }
 0x59e   :  { %8785 = vmatpush3.bf16.msra.mxu0 %v9965_v18  ;;  %v5697_v18 = vrot.slane %v10605_v51, %v10373_v30 }
 0x59f   :  { %8786 = vmatprep.subr.bf16.mxu0 %v10237_v17 }
 0x5a2   :  { %8787 = vmatpush3.bf16.msra.mxu0 %v9966_v19 }
 0x5a3   :  { %8788 = vmatprep.subr.bf16.mxu0 %v10237_v17 }
 0x5a6   :  { %8789 = vmatpush3.bf16.msra.mxu0 %v9967_v57 }
 0x5a7   :  { %8790 = vmatprep.subr.bf16.mxu0 %v10237_v17 }
 0x5aa   :  { %8791 = vmatpush3.bf16.msra.mxu0 %v9968_v23 }
 0x5ab   :  { %8792 = vmatprep.subr.bf16.mxu0 %v10237_v17 }
 0x5ae   :  { %8793 = vmatpush3.bf16.msra.mxu0 %v9969_v62 }
 0x5af   :  { %8794 = vmatprep.subr.bf16.mxu0 %v10237_v17 }
 0x5b2   :  { %8795 = vmatpush3.bf16.msra.mxu0 %v9970_v24 }
 0x5b3   :  { %8681 = vmatprep.subr.bf16.mxu0 %v9987_v59 }
 0x5b5   :  { %8797 = vmatmul.mubr.bf16.vlgmr.msra.gmra.mxu0 %v10574_v25  ;;  %v9997_v25 = vld [vmem:[#allocation16 + $0xd0] sm:$0xff]  }
 0x5b6   :  { %8682 = vmatpush3.bf16.msra.mxu0 %v9988_v40 }
 0x5b7   :  { %8683 = vmatprep.subr.bf16.mxu0 %v9989_v21 }
 0x5ba   :  { %v6822_v31 = vpop.f32.mrf.mxu1  ;;  %8684 = vmatpush3.bf16.msra.mxu0 %v9990_v29 }
 0x5bb   :  { %8685 = vmatprep.subr.bf16.mxu0 %v9991_v27  ;;  %v6823_v54 = vadd.f32 %v6822_v31, %v6782_v0 }
 0x5bc   :  { %v6824_v52 = vpop.f32.mrf.mxu1 }
 0x5bd   :  { %v6825_v2 = vadd.f32 %v6824_v52, %v6784_v28 }
 0x5be   :  { %v6826_v41 = vpop.f32.mrf.mxu1  ;;  %8686 = vmatpush3.bf16.msra.mxu0 %v9992_v36 }
 0x5bf   :  { %8687 = vmatprep.subr.bf16.mxu0 %v9993_v32 }
 0x5c0   :  { %v6827_v42 = vpop.f32.mrf.mxu1 }
 0x5c2   :  { %8688 = vmatpush3.bf16.msra.mxu0 %v9994_v37 }
 0x5c3   :  { %8689 = vmatprep.subr.bf16.mxu0 %v9995_v44 }
 0x5c6   :  { %8690 = vmatpush3.bf16.msra.mxu0 %v9996_v43 }
 0x5c7   :  { %8691 = vmatprep.subr.bf16.mxu0 %v9997_v25  ;;  %v5701_v25 = vrot.slane %v10605_v51, %v10393_v63 }
 0x5ca   :  { %8692 = vmatpush3.bf16.msra.mxu0 %v9998_v45 }
 0x5cb   :  { %8693 = vmatprep.subr.bf16.mxu0 %v9999_v47 }
 0x5ce   :  { %8694 = vmatpush3.bf16.msra.mxu0 %v10000_v48 }
 0x5cf   :  { %8695 = vmatprep.subr.bf16.mxu0 %v10001_v49 }
 0x5d2   :  { %8696 = vmatpush3.bf16.msra.mxu0 %v10002_v50 }
 0x5f5   :  { %v6863_v60 = vpop.f32.mrf.mxu0 }
 0x5f6   :  { %v6864_v3 = vadd.f32 %v6863_v60, %v6823_v54 }
 0x5f7   :  { %v6865_v4 = vpop.f32.mrf.mxu0 }
 0x5f8   :  { %v6866_v38 = vadd.f32 %v6865_v4, %v6825_v2  ;;  %v7113_v61 = vmax.f32 %v6864_v3, 0.0 }
 0x5f9   :  { %v6867_v35 = vpop.f32.mrf.mxu0 }
 0x5fa   :  { %v7114_v55 = vmax.f32 %v6866_v38, 0.0  ;;  %v6904_v5 = vpop.f32.mrf.mxu1  ;;  %v7118_v7 = vpack.c.bf16 %v7113_v61, %v7113_v61 }
 0x5fb   :  { %v6868_v34 = vpop.f32.mrf.mxu0  ;;  %v6905_v19 = vadd.f32 %v6904_v5, %v5693_v46  ;;  %v8403_v5 = vld [vmem:[%s10646_s12] ss:$0 sm:$0xff] }
 0x5fc   :  { %v7119_v6 = vpack.c.bf16 %v7114_v55, %v7114_v55  ;;  %v6906_v20 = vpop.f32.mrf.mxu1 }
 0x5fd   :  { %v6907_v23 = vadd.f32 %v6906_v20, %v5697_v18 }
 0x5fe   :  { %v6908_v22 = vpop.f32.mrf.mxu1  ;;  %7482 = vmatprep.mubr.bf16.mxu1 %v7119_v6 }
 0x5ff   :  { %7483 = vmatmul.mubr.bf16.vlgmr.msra.gmra.mxu1 %v7118_v7 }
 0x600   :  { %v6909_v53 = vpop.f32.mrf.mxu1  ;;  %8801 = vmatpush3.bf16.msra.mxu1 %v10003_v33  ;;  %8816 = vmatprep.mubr.msk.bf16.mxu1 %vm10238_vm1, %v10237_v17 }
 0x601   :  { %8802 = vmatprep.subr.bf16.mxu1 %v10237_v17 }
 0x604   :  { %8803 = vmatpush3.bf16.msra.mxu1 %v10004_v56 }
 0x605   :  { %8804 = vmatprep.subr.bf16.mxu1 %v10237_v17 }
 0x608   :  { %8805 = vmatpush3.bf16.msra.mxu1 %v10005_v39 }
 0x609   :  { %8806 = vmatprep.subr.bf16.mxu1 %v10237_v17 }
 0x60c   :  { %8807 = vmatpush3.bf16.msra.mxu1 %v10006_v8 }
 0x60d   :  { %8808 = vmatprep.subr.bf16.mxu1 %v10237_v17 }
 0x610   :  { %8809 = vmatpush3.bf16.msra.mxu1 %v10007_v9 }
 0x611   :  { %8810 = vmatprep.subr.bf16.mxu1 %v10237_v17 }
 0x614   :  { %8811 = vmatpush3.bf16.msra.mxu1 %v10008_v10 }
 0x615   :  { %8812 = vmatprep.subr.bf16.mxu1 %v10237_v17 }
 0x618   :  { %8813 = vmatpush3.bf16.msra.mxu1 %v10009_v11 }
 0x619   :  { %8814 = vmatprep.subr.bf16.mxu1 %v10237_v17 }
 0x61a   :  { %v6986_v13 = vpop.f32.mrf.mxu1 }
 0x61c   :  { %v6988_v14 = vpop.f32.mrf.mxu1  ;;  %8815 = vmatpush3.bf16.msra.mxu1 %v10010_v12 }
 0x61e   :  { %v6990_v15 = vpop.f32.mrf.mxu1 }
 0x620   :  { %v6991_v16 = vpop.f32.mrf.mxu1 }
 0x635   :  { %v6945_v57 = vpop.f32.mrf.mxu0 }
 0x636   :  { %v6946_v62 = vadd.f32 %v6945_v57, %v6905_v19 }
 0x637   :  { %v6947_v24 = vpop.f32.mrf.mxu0 }
 0x638   :  { %v6987_v59 = vadd.f32 %v6986_v13, %v6946_v62  ;;  %v6948_v40 = vadd.f32 %v6947_v24, %v6907_v23 }
 0x639   :  { %v6949_v21 = vpop.f32.mrf.mxu0 }
 0x63a   :  { %v6989_v17 = vadd.f32 %v6988_v14, %v6948_v40  ;;  %v8644_v29 = vpop.f32.mrf.mxu1  ;;  %v7115_v27 = vmax.f32 %v6987_v59, 0.0 }
 0x63b   :  { %v6950_v31 = vpop.f32.mrf.mxu0 }
 0x63c   :  { %v7116_v36 = vmax.f32 %v6989_v17, 0.0  ;;  %v8645_v32 = vpop.f32.mrf.mxu1  ;;  %v7120_v26 = vpack.c.bf16 %v7115_v27, %v7115_v27 }
 0x63d   :  { %v8646_v48 = vadd.f32 %v8645_v32, %v8644_v29 }
 0x63e   :  { %v7121_v52 = vpack.c.bf16 %v7116_v36, %v7116_v36  ;;  %v8647_v41 = vpop.f32.mrf.mxu1 }
 0x640   :  { %v8648_v37 = vpop.f32.mrf.mxu1  ;;  %7522 = vmatprep.mubr.bf16.mxu0 %v7121_v52 }
 0x641   :  { %7523 = vmatmul.mubr.bf16.vlgmr.msra.gmra.mxu0 %v7120_v26 }
 0x655   :  { %v8622_v30 = vpop.f32.mrf.mxu0 }
 0x657   :  { %v8623_v44 = vpop.f32.mrf.mxu0 }
 0x658   :  { %v8624_v45 = vadd.f32 %v8623_v44, %v8622_v30 }
 0x659   :  { %v8625_v42 = vpop.f32.mrf.mxu0 }
 0x65a   :  { %v7028_v47 = vadd.f32 %v8624_v45, %v5701_v25 }
 0x65b   :  { %v8626_v43 = vpop.f32.mrf.mxu0 }
 0x65c   :  { %v7068_v49 = vadd.f32 %v8646_v48, %v7028_v47 }
 0x675   :  { %v7107_v50 = vpop.f32.mrf.mxu0 }
 0x676   :  { %v7108_v58 = vadd.f32 %v7107_v50, %v7068_v49 }
 0x677   :  { %v8798_v1 = vpop.f32.mrf.mxu0 }
 0x678   :  { %v7117_v0 = vmax.f32 %v7108_v58, 0.0 }
 0x679   :  { %v7110_v28 = vpop.f32.mrf.mxu0 }
 0x67a   :  { %v7122_v54 = vpack.c.bf16 %v7117_v0, %v7117_v0 }
 0x67b   :  { %v8799_v60 = vpop.f32.mrf.mxu0 }
 0x67c   :  { %8817 = vmatmul.mubr.bf16.vlgmr.msra.gmra.mxu1 %v7122_v54 }
 0x6bf   :  { %v8675_v2 = vpop.f32.mrf.mxu1 }
 0x6c1   :  { %v8676_v3 = vpop.f32.mrf.mxu1 }
 0x6c2   :  { %v8677_v4 = vadd.f32 %v8676_v3, %v8675_v2 }
 0x6c3   :  { %v8678_v38 = vpop.f32.mrf.mxu1 }
 0x6c4   :  { %v7485_v6 = vadd.f32 %v8677_v4, %v8403_v5 }
 0x6c5   :  { %v8679_v61 = vpop.f32.mrf.mxu1 }
 0x701   :  { %v8697_v35 = vpop.f32.mrf.mxu0 }
 0x703   :  { %v8698_v55 = vpop.f32.mrf.mxu0 }
 0x704   :  { %v8699_v34 = vadd.f32 %v8698_v55, %v8697_v35 }
 0x705   :  { %v8700_v63 = vpop.f32.mrf.mxu0 }
 0x706   :  { %v7525_v20 = vadd.f32 %v8699_v34, %v7485_v6 }
 0x707   :  { %v8701_v51 = vpop.f32.mrf.mxu0 }
 0x73c   :  { %v7564_v33 = vpop.f32.mrf.mxu1 }
 0x73d   :  { %v7565_v7 = vadd.f32 %v7564_v33, %v7525_v20 }
 0x73e   :  { %v8818_v22 = vpop.f32.mrf.mxu1 }
 0x73f   :  { %7570 = vst [vmem:[#allocation17] sm:$0xff] %v7565_v7 }
 0x740   :  { %v7567_v53 = vpop.f32.mrf.mxu1 }
 0x741   :  { %10202 = shalt.err (!%p10199_p7)
}
 0x742   :  { %7580 = dma.vmem_to_hbm [thread:$0]  %s7578_s21, 128, %s10647_s13, [#allocation4]   ;;  %v8819_v56 = vpop.f32.mrf.mxu1 }
 0x743   :  { %10221 = dma.done.wait [#allocation4], 128  }
 0x744   :  { %10222 = vsyncadd [#allocation4], 4294967168 }
 0x745   :  { %7584 = vsyncpa [#allocation3], 1 }
 0x746   :  { %7585 = vsyncpa [#allocation6], 1 }
 0x747   :  { %7586 = vsyncpa [#allocation9], 1 }
 0x748   :  { %7587 = vsyncpa [#allocation12], 1 }
 0x749   :  { %7588 = vsyncpa [#allocation15], 1 }
 0x74a   :  { %7589 = vsyncpa [#allocation4], 1 }

</bundles_post_ra>
